<compile_context>
chip_gen: v6e
topology: v6e:2x2x1
jax: 0.10.0
libtpu: 0.0.40
codegen_flags: <defaults>
</compile_context>

<pallas_src>
import numpy as np
import jax
import jax.numpy as jnp
from jax.experimental import pallas as pl
from jax.experimental.pallas import tpu as pltpu

H = 256  # hidden size fixed by the module


def make_actor_kernel(T, BT):
    """T: timesteps, BT: batch-tile rows (multiple of 8)."""

    def actor_kernel(gx_ref, lens_ref,
                     whh_ref,
                     w2_ref, b2_ref, wout_ref, bout_ref,
                     h0_ref, c0_ref,
                     probs_ref, hn_ref, cn_ref,
                     outh_sc):
        # gx_ref   : (T, BT, 4H) f32  precomputed x@W_ih^T + b_ih + b_hh (token-table gather)
        # lens_ref : (BT, 1)     i32  sequence lengths (0 for padded batch rows)
        # whh_ref  : (H, 4H)     bf16 LSTM recurrent weights^T, gate order [i, f, g, o]
        # w2_ref   : (H, H)      bf16 fc2 weight^T ; b2_ref (1,H) f32
        # wout_ref : (H, Ap)     bf16 fc_out weight^T, zero-padded cols
        # bout_ref : (1, Ap)     f32  fc_out bias, -1e30 in padded cols (keep f32!)
        # h0/c0    : (BT, H)     f32  initial LSTM state
        # probs_ref: (T, BT, Ap) f32  softmax action probabilities (output)
        # hn/cn    : (BT, H)     f32  final LSTM state (outputs)
        # outh_sc  : (T*BT, H)   bf16 LSTM outputs (padded positions zeroed)

        lens = lens_ref[...]
        whh = whh_ref[...]

        # ---- (1) serial recurrence: h/c live in vregs, only h @ W_hh per step ----
        def step(t, carry):
            h, c = carry
            gates = (gx_ref[t]
                     + jnp.dot(h.astype(jnp.bfloat16), whh,
                               preferred_element_type=jnp.float32))      # (BT, 4H)

            i_g = jax.nn.sigmoid(gates[:, 0 * H:1 * H])
            f_g = jax.nn.sigmoid(gates[:, 1 * H:2 * H])
            g_g = jnp.tanh(gates[:, 2 * H:3 * H])
            o_g = jax.nn.sigmoid(gates[:, 3 * H:4 * H])

            c_new = f_g * c + i_g * g_g
            h_new = o_g * jnp.tanh(c_new)

            valid = lens > t                         # (BT, 1) packed-seq mask
            h = jnp.where(valid, h_new, h)
            c = jnp.where(valid, c_new, c)

            # pad_packed_sequence zeros padded positions before the MLP head.
            row = pl.multiple_of(t * BT, 8)
            outh_sc[pl.ds(row, BT), :] = jnp.where(valid, h, 0.0).astype(jnp.bfloat16)
            return h, c

        h, c = jax.lax.fori_loop(0, T, step, (h0_ref[...], c0_ref[...]), unroll=True)
        hn_ref[...] = h
        cn_ref[...] = c

        # ---- (2) batched MLP head + softmax over all timesteps ----
        oh = outh_sc[...]                            # (T*BT, H) bf16
        hidden = jnp.maximum(
            jnp.dot(oh, w2_ref[...], preferred_element_type=jnp.float32)
            + b2_ref[...], 0.0)                      # (T*BT, H)
        logits = (jnp.dot(hidden.astype(jnp.bfloat16), wout_ref[...],
                          preferred_element_type=jnp.float32)
                  + bout_ref[...])                   # (T*BT, Ap)

        m = jnp.max(logits, axis=-1, keepdims=True)
        e = jnp.exp(logits - m)
        denom = jnp.sum(e, axis=-1, keepdims=True)
        inv = pl.reciprocal(denom, approx=True)
        inv = inv * (2.0 - denom * inv)              # one Newton step -> ~f32 precision
        probs_ref[...] = (e * inv).reshape(probs_ref.shape)

    return actor_kernel


def init_actor_params(key, n_obs, n_actions):
    """Deterministic synthetic parameters with PyTorch-default-like init."""
    ks = jax.random.split(key, 10)
    s = 1.0 / np.sqrt(H)
    u = lambda k, shape: jax.random.uniform(k, shape, jnp.float32, -s, s)
    return {
        "embedding": jax.random.normal(ks[0], (n_obs, H), jnp.float32),
        "w_ih": u(ks[1], (4 * H, H)),      # gate order [i, f, g, o]
        "w_hh": u(ks[2], (4 * H, H)),
        "b_ih": u(ks[3], (4 * H,)),
        "b_hh": u(ks[4], (4 * H,)),
        "w_fc2": u(ks[5], (H, H)),
        "b_fc2": u(ks[6], (H,)),
        "w_out": u(ks[7], (n_actions, H)),
        "b_out": u(ks[8], (n_actions,)),
    }


def _nbytes(shape, dtype):
    return int(np.prod(shape)) * jnp.dtype(dtype).itemsize


def actor_forward(params, x_tokens, seq_lengths, in_hidden=None, *, bt_max=128):
    """Equivalent of Actor.forward.

    x_tokens    : (T, B) int32 discrete observations (time-major)
    seq_lengths : (B,)   int lengths, max(seq_lengths) <= T
    in_hidden   : optional (h0, c0), each (1, B, H)
    returns (action_probs (T_max, B, A), (h_n, c_n) each (1, B, H))
    """
    T, B = x_tokens.shape
    A = params["b_out"].shape[0]
    Ap = int(-(-A // 128) * 128)          # pad actions to lane multiple

    B8 = int(-(-B // 8) * 8)              # sublane multiple
    if B8 <= bt_max:
        BT, nb = B8, 1                    # single tile, no batch-grid overhead
    else:
        BT = bt_max
        nb = int(-(-B8 // BT))
    Bp = nb * BT

    # TODO(synk): embedding gather stays in XLA (dynamic row gather has no clean
    # rectangular BlockSpec).  The discrete input lets us fold embedding + W_ih +
    # biases into one (n_obs, 4H) table, so the kernel sees the gate pre-activations
    # directly and never runs the input-projection matmul.
    gx_table = (params["embedding"] @ params["w_ih"].T
                + params["b_ih"] + params["b_hh"]).astype(jnp.float32)   # (n_obs, 4H)
    gx = gx_table[x_tokens]                                              # (T, B, 4H)
    gx = jnp.pad(gx, ((0, 0), (0, Bp - B), (0, 0)))                      # (T, Bp, 4H)

    lens = jnp.zeros((Bp, 1), jnp.int32).at[:B, 0].set(
        jnp.asarray(seq_lengths, jnp.int32))

    if in_hidden is None:
        h0 = jnp.zeros((Bp, H), jnp.float32)
        c0 = jnp.zeros((Bp, H), jnp.float32)
    else:
        h0 = jnp.zeros((Bp, H), jnp.float32).at[:B].set(
            in_hidden[0].reshape(B, H).astype(jnp.float32))
        c0 = jnp.zeros((Bp, H), jnp.float32).at[:B].set(
            in_hidden[1].reshape(B, H).astype(jnp.float32))

    whh_t = params["w_hh"].T.astype(jnp.bfloat16)                        # (H, 4H)
    w2_t = params["w_fc2"].T.astype(jnp.bfloat16)                        # (H, H)
    b2 = params["b_fc2"].reshape(1, H).astype(jnp.float32)
    wout_t = jnp.zeros((H, Ap), jnp.bfloat16).at[:, :A].set(
        params["w_out"].T.astype(jnp.bfloat16))                          # (H, Ap)
    bout = jnp.full((1, Ap), -1e30, jnp.float32).at[0, :A].set(
        params["b_out"].astype(jnp.float32))                             # (1, Ap), f32!

    # Explicit scoped-VMEM budget (per batch tile, double-buffered) with headroom.
    block_bytes = (_nbytes((T, BT, 4 * H), jnp.float32)
                   + _nbytes((BT, 1), jnp.int32)
                   + 4 * _nbytes((BT, H), jnp.float32)        # h0,c0,hn,cn
                   + _nbytes((T, BT, Ap), jnp.float32))       # probs
    weight_bytes = (_nbytes((H, 4 * H), jnp.bfloat16) + _nbytes((H, H), jnp.bfloat16)
                    + _nbytes((1, H), jnp.float32) + _nbytes((H, Ap), jnp.bfloat16)
                    + _nbytes((1, Ap), jnp.float32))
    scratch_bytes = _nbytes((T * BT, H), jnp.bfloat16)
    vmem_limit = int(min(64 << 20,
                         max(32 << 20,
                             2 * (block_bytes + weight_bytes) + scratch_bytes + (4 << 20))))

    kernel = make_actor_kernel(T, BT)

    probs_p, h_n, c_n = pl.pallas_call(
        kernel,
        out_shape=(
            jax.ShapeDtypeStruct((T, Bp, Ap), jnp.float32),
            jax.ShapeDtypeStruct((Bp, H), jnp.float32),
            jax.ShapeDtypeStruct((Bp, H), jnp.float32),
        ),
        grid_spec=pltpu.PrefetchScalarGridSpec(
            num_scalar_prefetch=0,
            grid=(nb,),                                        # independent batch tiles
            in_specs=[
                pl.BlockSpec((T, BT, 4 * H), lambda b: (0, b, 0)),   # gx
                pl.BlockSpec((BT, 1), lambda b: (b, 0)),             # lens
                pl.BlockSpec((H, 4 * H), lambda b: (0, 0)),          # W_hh^T
                pl.BlockSpec((H, H), lambda b: (0, 0)),              # W_fc2^T
                pl.BlockSpec((1, H), lambda b: (0, 0)),              # b_fc2
                pl.BlockSpec((H, Ap), lambda b: (0, 0)),             # W_out^T
                pl.BlockSpec((1, Ap), lambda b: (0, 0)),             # b_out
                pl.BlockSpec((BT, H), lambda b: (b, 0)),             # h0
                pl.BlockSpec((BT, H), lambda b: (b, 0)),             # c0
            ],
            out_specs=[
                pl.BlockSpec((T, BT, Ap), lambda b: (0, b, 0)),      # probs
                pl.BlockSpec((BT, H), lambda b: (b, 0)),             # h_n
                pl.BlockSpec((BT, H), lambda b: (b, 0)),             # c_n
            ],
            scratch_shapes=[pltpu.VMEM((T * BT, H), jnp.bfloat16)],  # masked LSTM outputs
        ),
        compiler_params=pltpu.CompilerParams(
            dimension_semantics=("parallel",),
            vmem_limit_bytes=vmem_limit),
    )(gx, lens, whh_t, w2_t, b2, wout_t, bout, h0, c0)

    # pad_packed_sequence pads only up to max(seq_lengths); drop pad batch/action cols
    t_max = int(np.max(np.asarray(seq_lengths)))
    probs = probs_p[:t_max, :B, :A]
    return probs, (h_n[:B][None, ...], c_n[:B][None, ...])


def actor_forward_ref(params, x_tokens, seq_lengths):
    """Pure-JAX f32 reference (packed-LSTM semantics via masking)."""
    T, B = x_tokens.shape
    x = params["embedding"][x_tokens]
    h = jnp.zeros((B, H), jnp.float32)
    c = jnp.zeros((B, H), jnp.float32)
    lens = jnp.asarray(seq_lengths, jnp.int32)[:, None]
    outs = []
    for t in range(T):
        gates = (x[t] @ params["w_ih"].T + h @ params["w_hh"].T
                 + params["b_ih"] + params["b_hh"])
        i_g = jax.nn.sigmoid(gates[:, 0 * H:1 * H])
        f_g = jax.nn.sigmoid(gates[:, 1 * H:2 * H])
        g_g = jnp.tanh(gates[:, 2 * H:3 * H])
        o_g = jax.nn.sigmoid(gates[:, 3 * H:4 * H])
        c_new = f_g * c + i_g * g_g
        h_new = o_g * jnp.tanh(c_new)
        valid = lens > t
        h = jnp.where(valid, h_new, h)
        c = jnp.where(valid, c_new, c)
        outs.append(jnp.where(valid, h, 0.0))
    out = jnp.stack(outs)                                   # (T, B, H)
    hidden = jax.nn.relu(out @ params["w_fc2"].T + params["b_fc2"])
    logits = hidden @ params["w_out"].T + params["b_out"]
    probs = jax.nn.softmax(logits, axis=-1)
    t_max = int(np.max(np.asarray(seq_lengths)))
    return probs[:t_max], h, c


if __name__ == "__main__":
    key = jax.random.PRNGKey(0)
    k_params, k_tokens = jax.random.split(key)

    N_OBS = 10      # env.single_observation_space.n
    N_ACTIONS = 6   # env.single_action_space.n
    T, B = 8, 2

    params = init_actor_params(k_params, N_OBS, N_ACTIONS)

    x_tokens = jax.random.randint(k_tokens, (T, B), 0, N_OBS, dtype=jnp.int32)
    seq_lengths = np.array([8, 5], dtype=np.int32)   # max length == T

    action_probs, (h_n, c_n) = actor_forward(params, x_tokens, seq_lengths)
    action_probs = jax.block_until_ready(action_probs)
    h_n = jax.block_until_ready(h_n)
    c_n = jax.block_until_ready(c_n)

    t_max = int(np.max(seq_lengths))
    assert action_probs.shape == (t_max, B, N_ACTIONS)
    assert h_n.shape == (1, B, H) and c_n.shape == (1, B, H)
    assert bool(jnp.all(jnp.isfinite(action_probs)))
    # softmax rows sum to 1 (approx reciprocal + Newton step -> near-f32 exact)
    assert bool(jnp.allclose(jnp.sum(action_probs, axis=-1), 1.0, atol=1e-3))

    # compare against pure-JAX f32 reference (bf16 matmul operands => small drift)
    ref_probs, ref_h, ref_c = actor_forward_ref(params, x_tokens, seq_lengths)
    assert bool(jnp.allclose(action_probs, ref_probs, atol=3e-2))
    assert bool(jnp.allclose(h_n[0], ref_h, atol=3e-2))
    assert bool(jnp.allclose(c_n[0], ref_c, atol=5e-2))

    print("KERNEL_OK")
</pallas_src>

<mosaic_0001>
module attributes {stable_mosaic.version = 11 : i64} {
  func.func @actor_kernel(%arg0: i32, %arg1: memref<8x8x1024xf32, #tpu.memory_space<vmem>>, %arg2: memref<8x1xi32, #tpu.memory_space<vmem>>, %arg3: memref<256x1024xbf16, #tpu.memory_space<vmem>>, %arg4: memref<256x256xbf16, #tpu.memory_space<vmem>>, %arg5: memref<1x256xf32, #tpu.memory_space<vmem>>, %arg6: memref<256x128xbf16, #tpu.memory_space<vmem>>, %arg7: memref<1x128xf32, #tpu.memory_space<vmem>>, %arg8: memref<8x256xf32, #tpu.memory_space<vmem>>, %arg9: memref<8x256xf32, #tpu.memory_space<vmem>>, %arg10: memref<8x8x128xf32, #tpu.memory_space<vmem>>, %arg11: memref<8x256xf32, #tpu.memory_space<vmem>>, %arg12: memref<8x256xf32, #tpu.memory_space<vmem>>, %arg13: memref<64x256xbf16, #tpu.memory_space<vmem>>) attributes {dimension_semantics = [#tpu.dimension_semantics<parallel>], iteration_bounds = array<i64: 1>, scalar_prefetch = 0 : i64, scratch_operands = 1 : i64, tpu.core_type = #tpu.core_type<tc>, window_params = [{transform_indices = @transform_0, window_bounds = array<i64: 8, 8, 1024>}, {transform_indices = @transform_1, window_bounds = array<i64: 8, 1>}, {pipeline_mode = #tpu.pipeline_mode<synchronous>, transform_indices = @transform_2, window_bounds = array<i64: 256, 1024>}, {pipeline_mode = #tpu.pipeline_mode<synchronous>, transform_indices = @transform_3, window_bounds = array<i64: 256, 256>}, {pipeline_mode = #tpu.pipeline_mode<synchronous>, transform_indices = @transform_4, window_bounds = array<i64: 1, 256>}, {pipeline_mode = #tpu.pipeline_mode<synchronous>, transform_indices = @transform_5, window_bounds = array<i64: 256, 128>}, {pipeline_mode = #tpu.pipeline_mode<synchronous>, transform_indices = @transform_6, window_bounds = array<i64: 1, 128>}, {transform_indices = @transform_7, window_bounds = array<i64: 8, 256>}, {transform_indices = @transform_8, window_bounds = array<i64: 8, 256>}, {transform_indices = @transform_9, window_bounds = array<i64: 8, 8, 128>}, {transform_indices = @transform_10, window_bounds = array<i64: 8, 256>}, {transform_indices = @transform_11, window_bounds = array<i64: 8, 256>}]} {
    %c0 = arith.constant 0 : index
    %c0_0 = arith.constant 0 : index
    %0 = vector.load %arg2[%c0, %c0_0] : memref<8x1xi32, #tpu.memory_space<vmem>>, vector<8x1xi32>
    %c0_1 = arith.constant 0 : index
    %c0_2 = arith.constant 0 : index
    %1 = vector.load %arg3[%c0_1, %c0_2] : memref<256x1024xbf16, #tpu.memory_space<vmem>>, vector<256x1024xbf16>
    %c0_3 = arith.constant 0 : index
    %c0_4 = arith.constant 0 : index
    %2 = vector.load %arg8[%c0_3, %c0_4] : memref<8x256xf32, #tpu.memory_space<vmem>>, vector<8x256xf32>
    %c0_5 = arith.constant 0 : index
    %c0_6 = arith.constant 0 : index
    %3 = vector.load %arg9[%c0_5, %c0_6] : memref<8x256xf32, #tpu.memory_space<vmem>>, vector<8x256xf32>
    %c0_i32 = arith.constant 0 : i32
    %4 = arith.index_cast %c0_i32 : i32 to index
    %c0_7 = arith.constant 0 : index
    %c0_8 = arith.constant 0 : index
    %5 = vector.load %arg1[%4, %c0_7, %c0_8] : memref<8x8x1024xf32, #tpu.memory_space<vmem>>, vector<1x8x1024xf32>
    %6 = vector.shape_cast %5 : vector<1x8x1024xf32> to vector<8x1024xf32>
    %7 = arith.truncf %2 : vector<8x256xf32> to vector<8x256xbf16>
    %cst = arith.constant dense<0.000000e+00> : vector<8x1024xf32>
    %8 = tpu.matmul %7, %1, %cst {dimension_numbers = #tpu.dot_dimension_numbers<[1], [0], [0], [1], [0, 0, 1, 1], [], []>} : vector<8x256xbf16>, vector<256x1024xbf16>, vector<8x1024xf32> -> vector<8x1024xf32>
    %9 = arith.addf %6, %8 : vector<8x1024xf32>
    %10 = vector.extract_strided_slice %9 {offsets = [0, 0], sizes = [8, 256], strides = [1, 1]} : vector<8x1024xf32> to vector<8x256xf32>
    %11 = arith.negf %10 : vector<8x256xf32>
    %12 = math.exp %11 : vector<8x256xf32>
    %cst_9 = arith.constant 1.000000e+00 : f32
    %13 = vector.broadcast %cst_9 : f32 to vector<8x256xf32>
    %14 = arith.addf %13, %12 : vector<8x256xf32>
    %15 = arith.divf %13, %14 : vector<8x256xf32>
    %16 = vector.extract_strided_slice %9 {offsets = [0, 256], sizes = [8, 256], strides = [1, 1]} : vector<8x1024xf32> to vector<8x256xf32>
    %17 = arith.negf %16 : vector<8x256xf32>
    %18 = math.exp %17 : vector<8x256xf32>
    %cst_10 = arith.constant 1.000000e+00 : f32
    %19 = vector.broadcast %cst_10 : f32 to vector<8x256xf32>
    %20 = arith.addf %19, %18 : vector<8x256xf32>
    %21 = arith.divf %19, %20 : vector<8x256xf32>
    %22 = vector.extract_strided_slice %9 {offsets = [0, 512], sizes = [8, 256], strides = [1, 1]} : vector<8x1024xf32> to vector<8x256xf32>
    %23 = math.tanh %22 : vector<8x256xf32>
    %24 = vector.extract_strided_slice %9 {offsets = [0, 768], sizes = [8, 256], strides = [1, 1]} : vector<8x1024xf32> to vector<8x256xf32>
    %25 = arith.negf %24 : vector<8x256xf32>
    %26 = math.exp %25 : vector<8x256xf32>
    %cst_11 = arith.constant 1.000000e+00 : f32
    %27 = vector.broadcast %cst_11 : f32 to vector<8x256xf32>
    %28 = arith.addf %27, %26 : vector<8x256xf32>
    %29 = arith.divf %27, %28 : vector<8x256xf32>
    %30 = arith.mulf %21, %3 : vector<8x256xf32>
    %31 = arith.mulf %15, %23 : vector<8x256xf32>
    %32 = arith.addf %30, %31 : vector<8x256xf32>
    %33 = math.tanh %32 : vector<8x256xf32>
    %34 = arith.mulf %29, %33 : vector<8x256xf32>
    %35 = vector.broadcast %c0_i32 : i32 to vector<8x1xi32>
    %36 = arith.cmpi sgt, %0, %35 : vector<8x1xi32>
    %37 = vector.shape_cast %36 : vector<8x1xi1> to vector<8x1xi1>
    %38 = vector.broadcast %37 : vector<8x1xi1> to vector<8x256xi1>
    %39 = arith.select %38, %34, %2 : vector<8x256xi1>, vector<8x256xf32>
    %40 = vector.shape_cast %36 : vector<8x1xi1> to vector<8x1xi1>
    %41 = vector.broadcast %40 : vector<8x1xi1> to vector<8x256xi1>
    %42 = arith.select %41, %32, %3 : vector<8x256xi1>, vector<8x256xf32>
    %c8_i32 = arith.constant 8 : i32
    %43 = arith.muli %c0_i32, %c8_i32 : i32
    %44 = tpu.assume_multiple %43, 8 : i32
    %cst_12 = arith.constant 0.000000e+00 : f32
    %45 = vector.shape_cast %36 : vector<8x1xi1> to vector<8x1xi1>
    %46 = vector.broadcast %45 : vector<8x1xi1> to vector<8x256xi1>
    %47 = vector.broadcast %cst_12 : f32 to vector<8x256xf32>
    %48 = arith.select %46, %39, %47 : vector<8x256xi1>, vector<8x256xf32>
    %49 = arith.truncf %48 : vector<8x256xf32> to vector<8x256xbf16>
    %50 = arith.index_cast %44 : i32 to index
    %c0_13 = arith.constant 0 : index
    %51 = vector.load %arg13[%50, %c0_13] : memref<64x256xbf16, #tpu.memory_space<vmem>>, vector<8x256xbf16>
    tpu.vector_store %arg13[%50, %c0_13], %49 {strides = array<i32>} : memref<64x256xbf16, #tpu.memory_space<vmem>>, vector<8x256xbf16>,
    %c1_i32 = arith.constant 1 : i32
    %52 = arith.index_cast %c1_i32 : i32 to index
    %c0_14 = arith.constant 0 : index
    %c0_15 = arith.constant 0 : index
    %53 = vector.load %arg1[%52, %c0_14, %c0_15] : memref<8x8x1024xf32, #tpu.memory_space<vmem>>, vector<1x8x1024xf32>
    %54 = vector.shape_cast %53 : vector<1x8x1024xf32> to vector<8x1024xf32>
    %55 = arith.truncf %39 : vector<8x256xf32> to vector<8x256xbf16>
    %cst_16 = arith.constant dense<0.000000e+00> : vector<8x1024xf32>
    %56 = tpu.matmul %55, %1, %cst_16 {dimension_numbers = #tpu.dot_dimension_numbers<[1], [0], [0], [1], [0, 0, 1, 1], [], []>} : vector<8x256xbf16>, vector<256x1024xbf16>, vector<8x1024xf32> -> vector<8x1024xf32>
    %57 = arith.addf %54, %56 : vector<8x1024xf32>
    %58 = vector.extract_strided_slice %57 {offsets = [0, 0], sizes = [8, 256], strides = [1, 1]} : vector<8x1024xf32> to vector<8x256xf32>
    %59 = arith.negf %58 : vector<8x256xf32>
    %60 = math.exp %59 : vector<8x256xf32>
    %cst_17 = arith.constant 1.000000e+00 : f32
    %61 = vector.broadcast %cst_17 : f32 to vector<8x256xf32>
    %62 = arith.addf %61, %60 : vector<8x256xf32>
    %63 = arith.divf %61, %62 : vector<8x256xf32>
    %64 = vector.extract_strided_slice %57 {offsets = [0, 256], sizes = [8, 256], strides = [1, 1]} : vector<8x1024xf32> to vector<8x256xf32>
    %65 = arith.negf %64 : vector<8x256xf32>
    %66 = math.exp %65 : vector<8x256xf32>
    %cst_18 = arith.constant 1.000000e+00 : f32
    %67 = vector.broadcast %cst_18 : f32 to vector<8x256xf32>
    %68 = arith.addf %67, %66 : vector<8x256xf32>
    %69 = arith.divf %67, %68 : vector<8x256xf32>
    %70 = vector.extract_strided_slice %57 {offsets = [0, 512], sizes = [8, 256], strides = [1, 1]} : vector<8x1024xf32> to vector<8x256xf32>
    %71 = math.tanh %70 : vector<8x256xf32>
    %72 = vector.extract_strided_slice %57 {offsets = [0, 768], sizes = [8, 256], strides = [1, 1]} : vector<8x1024xf32> to vector<8x256xf32>
    %73 = arith.negf %72 : vector<8x256xf32>
    %74 = math.exp %73 : vector<8x256xf32>
    %cst_19 = arith.constant 1.000000e+00 : f32
    %75 = vector.broadcast %cst_19 : f32 to vector<8x256xf32>
    %76 = arith.addf %75, %74 : vector<8x256xf32>
    %77 = arith.divf %75, %76 : vector<8x256xf32>
    %78 = arith.mulf %69, %42 : vector<8x256xf32>
    %79 = arith.mulf %63, %71 : vector<8x256xf32>
    %80 = arith.addf %78, %79 : vector<8x256xf32>
    %81 = math.tanh %80 : vector<8x256xf32>
    %82 = arith.mulf %77, %81 : vector<8x256xf32>
    %83 = vector.broadcast %c1_i32 : i32 to vector<8x1xi32>
    %84 = arith.cmpi sgt, %0, %83 : vector<8x1xi32>
    %85 = vector.shape_cast %84 : vector<8x1xi1> to vector<8x1xi1>
    %86 = vector.broadcast %85 : vector<8x1xi1> to vector<8x256xi1>
    %87 = arith.select %86, %82, %39 : vector<8x256xi1>, vector<8x256xf32>
    %88 = vector.shape_cast %84 : vector<8x1xi1> to vector<8x1xi1>
    %89 = vector.broadcast %88 : vector<8x1xi1> to vector<8x256xi1>
    %90 = arith.select %89, %80, %42 : vector<8x256xi1>, vector<8x256xf32>
    %c8_i32_20 = arith.constant 8 : i32
    %91 = arith.muli %c1_i32, %c8_i32_20 : i32
    %92 = tpu.assume_multiple %91, 8 : i32
    %cst_21 = arith.constant 0.000000e+00 : f32
    %93 = vector.shape_cast %84 : vector<8x1xi1> to vector<8x1xi1>
    %94 = vector.broadcast %93 : vector<8x1xi1> to vector<8x256xi1>
    %95 = vector.broadcast %cst_21 : f32 to vector<8x256xf32>
    %96 = arith.select %94, %87, %95 : vector<8x256xi1>, vector<8x256xf32>
    %97 = arith.truncf %96 : vector<8x256xf32> to vector<8x256xbf16>
    %98 = arith.index_cast %92 : i32 to index
    %c0_22 = arith.constant 0 : index
    %99 = vector.load %arg13[%98, %c0_22] : memref<64x256xbf16, #tpu.memory_space<vmem>>, vector<8x256xbf16>
    tpu.vector_store %arg13[%98, %c0_22], %97 {strides = array<i32>} : memref<64x256xbf16, #tpu.memory_space<vmem>>, vector<8x256xbf16>,
    %c2_i32 = arith.constant 2 : i32
    %100 = arith.index_cast %c2_i32 : i32 to index
    %c0_23 = arith.constant 0 : index
    %c0_24 = arith.constant 0 : index
    %101 = vector.load %arg1[%100, %c0_23, %c0_24] : memref<8x8x1024xf32, #tpu.memory_space<vmem>>, vector<1x8x1024xf32>
    %102 = vector.shape_cast %101 : vector<1x8x1024xf32> to vector<8x1024xf32>
    %103 = arith.truncf %87 : vector<8x256xf32> to vector<8x256xbf16>
    %cst_25 = arith.constant dense<0.000000e+00> : vector<8x1024xf32>
    %104 = tpu.matmul %103, %1, %cst_25 {dimension_numbers = #tpu.dot_dimension_numbers<[1], [0], [0], [1], [0, 0, 1, 1], [], []>} : vector<8x256xbf16>, vector<256x1024xbf16>, vector<8x1024xf32> -> vector<8x1024xf32>
    %105 = arith.addf %102, %104 : vector<8x1024xf32>
    %106 = vector.extract_strided_slice %105 {offsets = [0, 0], sizes = [8, 256], strides = [1, 1]} : vector<8x1024xf32> to vector<8x256xf32>
    %107 = arith.negf %106 : vector<8x256xf32>
    %108 = math.exp %107 : vector<8x256xf32>
    %cst_26 = arith.constant 1.000000e+00 : f32
    %109 = vector.broadcast %cst_26 : f32 to vector<8x256xf32>
    %110 = arith.addf %109, %108 : vector<8x256xf32>
    %111 = arith.divf %109, %110 : vector<8x256xf32>
    %112 = vector.extract_strided_slice %105 {offsets = [0, 256], sizes = [8, 256], strides = [1, 1]} : vector<8x1024xf32> to vector<8x256xf32>
    %113 = arith.negf %112 : vector<8x256xf32>
    %114 = math.exp %113 : vector<8x256xf32>
    %cst_27 = arith.constant 1.000000e+00 : f32
    %115 = vector.broadcast %cst_27 : f32 to vector<8x256xf32>
    %116 = arith.addf %115, %114 : vector<8x256xf32>
    %117 = arith.divf %115, %116 : vector<8x256xf32>
    %118 = vector.extract_strided_slice %105 {offsets = [0, 512], sizes = [8, 256], strides = [1, 1]} : vector<8x1024xf32> to vector<8x256xf32>
    %119 = math.tanh %118 : vector<8x256xf32>
    %120 = vector.extract_strided_slice %105 {offsets = [0, 768], sizes = [8, 256], strides = [1, 1]} : vector<8x1024xf32> to vector<8x256xf32>
    %121 = arith.negf %120 : vector<8x256xf32>
    %122 = math.exp %121 : vector<8x256xf32>
    %cst_28 = arith.constant 1.000000e+00 : f32
    %123 = vector.broadcast %cst_28 : f32 to vector<8x256xf32>
    %124 = arith.addf %123, %122 : vector<8x256xf32>
    %125 = arith.divf %123, %124 : vector<8x256xf32>
    %126 = arith.mulf %117, %90 : vector<8x256xf32>
    %127 = arith.mulf %111, %119 : vector<8x256xf32>
    %128 = arith.addf %126, %127 : vector<8x256xf32>
    %129 = math.tanh %128 : vector<8x256xf32>
    %130 = arith.mulf %125, %129 : vector<8x256xf32>
    %131 = vector.broadcast %c2_i32 : i32 to vector<8x1xi32>
    %132 = arith.cmpi sgt, %0, %131 : vector<8x1xi32>
    %133 = vector.shape_cast %132 : vector<8x1xi1> to vector<8x1xi1>
    %134 = vector.broadcast %133 : vector<8x1xi1> to vector<8x256xi1>
    %135 = arith.select %134, %130, %87 : vector<8x256xi1>, vector<8x256xf32>
    %136 = vector.shape_cast %132 : vector<8x1xi1> to vector<8x1xi1>
    %137 = vector.broadcast %136 : vector<8x1xi1> to vector<8x256xi1>
    %138 = arith.select %137, %128, %90 : vector<8x256xi1>, vector<8x256xf32>
    %c8_i32_29 = arith.constant 8 : i32
    %139 = arith.muli %c2_i32, %c8_i32_29 : i32
    %140 = tpu.assume_multiple %139, 8 : i32
    %cst_30 = arith.constant 0.000000e+00 : f32
    %141 = vector.shape_cast %132 : vector<8x1xi1> to vector<8x1xi1>
    %142 = vector.broadcast %141 : vector<8x1xi1> to vector<8x256xi1>
    %143 = vector.broadcast %cst_30 : f32 to vector<8x256xf32>
    %144 = arith.select %142, %135, %143 : vector<8x256xi1>, vector<8x256xf32>
    %145 = arith.truncf %144 : vector<8x256xf32> to vector<8x256xbf16>
    %146 = arith.index_cast %140 : i32 to index
    %c0_31 = arith.constant 0 : index
    %147 = vector.load %arg13[%146, %c0_31] : memref<64x256xbf16, #tpu.memory_space<vmem>>, vector<8x256xbf16>
    tpu.vector_store %arg13[%146, %c0_31], %145 {strides = array<i32>} : memref<64x256xbf16, #tpu.memory_space<vmem>>, vector<8x256xbf16>,
    %c3_i32 = arith.constant 3 : i32
    %148 = arith.index_cast %c3_i32 : i32 to index
    %c0_32 = arith.constant 0 : index
    %c0_33 = arith.constant 0 : index
    %149 = vector.load %arg1[%148, %c0_32, %c0_33] : memref<8x8x1024xf32, #tpu.memory_space<vmem>>, vector<1x8x1024xf32>
    %150 = vector.shape_cast %149 : vector<1x8x1024xf32> to vector<8x1024xf32>
    %151 = arith.truncf %135 : vector<8x256xf32> to vector<8x256xbf16>
    %cst_34 = arith.constant dense<0.000000e+00> : vector<8x1024xf32>
    %152 = tpu.matmul %151, %1, %cst_34 {dimension_numbers = #tpu.dot_dimension_numbers<[1], [0], [0], [1], [0, 0, 1, 1], [], []>} : vector<8x256xbf16>, vector<256x1024xbf16>, vector<8x1024xf32> -> vector<8x1024xf32>
    %153 = arith.addf %150, %152 : vector<8x1024xf32>
    %154 = vector.extract_strided_slice %153 {offsets = [0, 0], sizes = [8, 256], strides = [1, 1]} : vector<8x1024xf32> to vector<8x256xf32>
    %155 = arith.negf %154 : vector<8x256xf32>
    %156 = math.exp %155 : vector<8x256xf32>
    %cst_35 = arith.constant 1.000000e+00 : f32
    %157 = vector.broadcast %cst_35 : f32 to vector<8x256xf32>
    %158 = arith.addf %157, %156 : vector<8x256xf32>
    %159 = arith.divf %157, %158 : vector<8x256xf32>
    %160 = vector.extract_strided_slice %153 {offsets = [0, 256], sizes = [8, 256], strides = [1, 1]} : vector<8x1024xf32> to vector<8x256xf32>
    %161 = arith.negf %160 : vector<8x256xf32>
    %162 = math.exp %161 : vector<8x256xf32>
    %cst_36 = arith.constant 1.000000e+00 : f32
    %163 = vector.broadcast %cst_36 : f32 to vector<8x256xf32>
    %164 = arith.addf %163, %162 : vector<8x256xf32>
    %165 = arith.divf %163, %164 : vector<8x256xf32>
    %166 = vector.extract_strided_slice %153 {offsets = [0, 512], sizes = [8, 256], strides = [1, 1]} : vector<8x1024xf32> to vector<8x256xf32>
    %167 = math.tanh %166 : vector<8x256xf32>
    %168 = vector.extract_strided_slice %153 {offsets = [0, 768], sizes = [8, 256], strides = [1, 1]} : vector<8x1024xf32> to vector<8x256xf32>
    %169 = arith.negf %168 : vector<8x256xf32>
    %170 = math.exp %169 : vector<8x256xf32>
    %cst_37 = arith.constant 1.000000e+00 : f32
    %171 = vector.broadcast %cst_37 : f32 to vector<8x256xf32>
    %172 = arith.addf %171, %170 : vector<8x256xf32>
    %173 = arith.divf %171, %172 : vector<8x256xf32>
    %174 = arith.mulf %165, %138 : vector<8x256xf32>
    %175 = arith.mulf %159, %167 : vector<8x256xf32>
    %176 = arith.addf %174, %175 : vector<8x256xf32>
    %177 = math.tanh %176 : vector<8x256xf32>
    %178 = arith.mulf %173, %177 : vector<8x256xf32>
    %179 = vector.broadcast %c3_i32 : i32 to vector<8x1xi32>
    %180 = arith.cmpi sgt, %0, %179 : vector<8x1xi32>
    %181 = vector.shape_cast %180 : vector<8x1xi1> to vector<8x1xi1>
    %182 = vector.broadcast %181 : vector<8x1xi1> to vector<8x256xi1>
    %183 = arith.select %182, %178, %135 : vector<8x256xi1>, vector<8x256xf32>
    %184 = vector.shape_cast %180 : vector<8x1xi1> to vector<8x1xi1>
    %185 = vector.broadcast %184 : vector<8x1xi1> to vector<8x256xi1>
    %186 = arith.select %185, %176, %138 : vector<8x256xi1>, vector<8x256xf32>
    %c8_i32_38 = arith.constant 8 : i32
    %187 = arith.muli %c3_i32, %c8_i32_38 : i32
    %188 = tpu.assume_multiple %187, 8 : i32
    %cst_39 = arith.constant 0.000000e+00 : f32
    %189 = vector.shape_cast %180 : vector<8x1xi1> to vector<8x1xi1>
    %190 = vector.broadcast %189 : vector<8x1xi1> to vector<8x256xi1>
    %191 = vector.broadcast %cst_39 : f32 to vector<8x256xf32>
    %192 = arith.select %190, %183, %191 : vector<8x256xi1>, vector<8x256xf32>
    %193 = arith.truncf %192 : vector<8x256xf32> to vector<8x256xbf16>
    %194 = arith.index_cast %188 : i32 to index
    %c0_40 = arith.constant 0 : index
    %195 = vector.load %arg13[%194, %c0_40] : memref<64x256xbf16, #tpu.memory_space<vmem>>, vector<8x256xbf16>
    tpu.vector_store %arg13[%194, %c0_40], %193 {strides = array<i32>} : memref<64x256xbf16, #tpu.memory_space<vmem>>, vector<8x256xbf16>,
    %c4_i32 = arith.constant 4 : i32
    %196 = arith.index_cast %c4_i32 : i32 to index
    %c0_41 = arith.constant 0 : index
    %c0_42 = arith.constant 0 : index
    %197 = vector.load %arg1[%196, %c0_41, %c0_42] : memref<8x8x1024xf32, #tpu.memory_space<vmem>>, vector<1x8x1024xf32>
    %198 = vector.shape_cast %197 : vector<1x8x1024xf32> to vector<8x1024xf32>
    %199 = arith.truncf %183 : vector<8x256xf32> to vector<8x256xbf16>
    %cst_43 = arith.constant dense<0.000000e+00> : vector<8x1024xf32>
    %200 = tpu.matmul %199, %1, %cst_43 {dimension_numbers = #tpu.dot_dimension_numbers<[1], [0], [0], [1], [0, 0, 1, 1], [], []>} : vector<8x256xbf16>, vector<256x1024xbf16>, vector<8x1024xf32> -> vector<8x1024xf32>
    %201 = arith.addf %198, %200 : vector<8x1024xf32>
    %202 = vector.extract_strided_slice %201 {offsets = [0, 0], sizes = [8, 256], strides = [1, 1]} : vector<8x1024xf32> to vector<8x256xf32>
    %203 = arith.negf %202 : vector<8x256xf32>
    %204 = math.exp %203 : vector<8x256xf32>
    %cst_44 = arith.constant 1.000000e+00 : f32
    %205 = vector.broadcast %cst_44 : f32 to vector<8x256xf32>
    %206 = arith.addf %205, %204 : vector<8x256xf32>
    %207 = arith.divf %205, %206 : vector<8x256xf32>
    %208 = vector.extract_strided_slice %201 {offsets = [0, 256], sizes = [8, 256], strides = [1, 1]} : vector<8x1024xf32> to vector<8x256xf32>
    %209 = arith.negf %208 : vector<8x256xf32>
    %210 = math.exp %209 : vector<8x256xf32>
    %cst_45 = arith.constant 1.000000e+00 : f32
    %211 = vector.broadcast %cst_45 : f32 to vector<8x256xf32>
    %212 = arith.addf %211, %210 : vector<8x256xf32>
    %213 = arith.divf %211, %212 : vector<8x256xf32>
    %214 = vector.extract_strided_slice %201 {offsets = [0, 512], sizes = [8, 256], strides = [1, 1]} : vector<8x1024xf32> to vector<8x256xf32>
    %215 = math.tanh %214 : vector<8x256xf32>
    %216 = vector.extract_strided_slice %201 {offsets = [0, 768], sizes = [8, 256], strides = [1, 1]} : vector<8x1024xf32> to vector<8x256xf32>
    %217 = arith.negf %216 : vector<8x256xf32>
    %218 = math.exp %217 : vector<8x256xf32>
    %cst_46 = arith.constant 1.000000e+00 : f32
    %219 = vector.broadcast %cst_46 : f32 to vector<8x256xf32>
    %220 = arith.addf %219, %218 : vector<8x256xf32>
    %221 = arith.divf %219, %220 : vector<8x256xf32>
    %222 = arith.mulf %213, %186 : vector<8x256xf32>
    %223 = arith.mulf %207, %215 : vector<8x256xf32>
    %224 = arith.addf %222, %223 : vector<8x256xf32>
    %225 = math.tanh %224 : vector<8x256xf32>
    %226 = arith.mulf %221, %225 : vector<8x256xf32>
    %227 = vector.broadcast %c4_i32 : i32 to vector<8x1xi32>
    %228 = arith.cmpi sgt, %0, %227 : vector<8x1xi32>
    %229 = vector.shape_cast %228 : vector<8x1xi1> to vector<8x1xi1>
    %230 = vector.broadcast %229 : vector<8x1xi1> to vector<8x256xi1>
    %231 = arith.select %230, %226, %183 : vector<8x256xi1>, vector<8x256xf32>
    %232 = vector.shape_cast %228 : vector<8x1xi1> to vector<8x1xi1>
    %233 = vector.broadcast %232 : vector<8x1xi1> to vector<8x256xi1>
    %234 = arith.select %233, %224, %186 : vector<8x256xi1>, vector<8x256xf32>
    %c8_i32_47 = arith.constant 8 : i32
    %235 = arith.muli %c4_i32, %c8_i32_47 : i32
    %236 = tpu.assume_multiple %235, 8 : i32
    %cst_48 = arith.constant 0.000000e+00 : f32
    %237 = vector.shape_cast %228 : vector<8x1xi1> to vector<8x1xi1>
    %238 = vector.broadcast %237 : vector<8x1xi1> to vector<8x256xi1>
    %239 = vector.broadcast %cst_48 : f32 to vector<8x256xf32>
    %240 = arith.select %238, %231, %239 : vector<8x256xi1>, vector<8x256xf32>
    %241 = arith.truncf %240 : vector<8x256xf32> to vector<8x256xbf16>
    %242 = arith.index_cast %236 : i32 to index
    %c0_49 = arith.constant 0 : index
    %243 = vector.load %arg13[%242, %c0_49] : memref<64x256xbf16, #tpu.memory_space<vmem>>, vector<8x256xbf16>
    tpu.vector_store %arg13[%242, %c0_49], %241 {strides = array<i32>} : memref<64x256xbf16, #tpu.memory_space<vmem>>, vector<8x256xbf16>,
    %c5_i32 = arith.constant 5 : i32
    %244 = arith.index_cast %c5_i32 : i32 to index
    %c0_50 = arith.constant 0 : index
    %c0_51 = arith.constant 0 : index
    %245 = vector.load %arg1[%244, %c0_50, %c0_51] : memref<8x8x1024xf32, #tpu.memory_space<vmem>>, vector<1x8x1024xf32>
    %246 = vector.shape_cast %245 : vector<1x8x1024xf32> to vector<8x1024xf32>
    %247 = arith.truncf %231 : vector<8x256xf32> to vector<8x256xbf16>
    %cst_52 = arith.constant dense<0.000000e+00> : vector<8x1024xf32>
    %248 = tpu.matmul %247, %1, %cst_52 {dimension_numbers = #tpu.dot_dimension_numbers<[1], [0], [0], [1], [0, 0, 1, 1], [], []>} : vector<8x256xbf16>, vector<256x1024xbf16>, vector<8x1024xf32> -> vector<8x1024xf32>
    %249 = arith.addf %246, %248 : vector<8x1024xf32>
    %250 = vector.extract_strided_slice %249 {offsets = [0, 0], sizes = [8, 256], strides = [1, 1]} : vector<8x1024xf32> to vector<8x256xf32>
    %251 = arith.negf %250 : vector<8x256xf32>
    %252 = math.exp %251 : vector<8x256xf32>
    %cst_53 = arith.constant 1.000000e+00 : f32
    %253 = vector.broadcast %cst_53 : f32 to vector<8x256xf32>
    %254 = arith.addf %253, %252 : vector<8x256xf32>
    %255 = arith.divf %253, %254 : vector<8x256xf32>
    %256 = vector.extract_strided_slice %249 {offsets = [0, 256], sizes = [8, 256], strides = [1, 1]} : vector<8x1024xf32> to vector<8x256xf32>
    %257 = arith.negf %256 : vector<8x256xf32>
    %258 = math.exp %257 : vector<8x256xf32>
    %cst_54 = arith.constant 1.000000e+00 : f32
    %259 = vector.broadcast %cst_54 : f32 to vector<8x256xf32>
    %260 = arith.addf %259, %258 : vector<8x256xf32>
    %261 = arith.divf %259, %260 : vector<8x256xf32>
    %262 = vector.extract_strided_slice %249 {offsets = [0, 512], sizes = [8, 256], strides = [1, 1]} : vector<8x1024xf32> to vector<8x256xf32>
    %263 = math.tanh %262 : vector<8x256xf32>
    %264 = vector.extract_strided_slice %249 {offsets = [0, 768], sizes = [8, 256], strides = [1, 1]} : vector<8x1024xf32> to vector<8x256xf32>
    %265 = arith.negf %264 : vector<8x256xf32>
    %266 = math.exp %265 : vector<8x256xf32>
    %cst_55 = arith.constant 1.000000e+00 : f32
    %267 = vector.broadcast %cst_55 : f32 to vector<8x256xf32>
    %268 = arith.addf %267, %266 : vector<8x256xf32>
    %269 = arith.divf %267, %268 : vector<8x256xf32>
    %270 = arith.mulf %261, %234 : vector<8x256xf32>
    %271 = arith.mulf %255, %263 : vector<8x256xf32>
    %272 = arith.addf %270, %271 : vector<8x256xf32>
    %273 = math.tanh %272 : vector<8x256xf32>
    %274 = arith.mulf %269, %273 : vector<8x256xf32>
    %275 = vector.broadcast %c5_i32 : i32 to vector<8x1xi32>
    %276 = arith.cmpi sgt, %0, %275 : vector<8x1xi32>
    %277 = vector.shape_cast %276 : vector<8x1xi1> to vector<8x1xi1>
    %278 = vector.broadcast %277 : vector<8x1xi1> to vector<8x256xi1>
    %279 = arith.select %278, %274, %231 : vector<8x256xi1>, vector<8x256xf32>
    %280 = vector.shape_cast %276 : vector<8x1xi1> to vector<8x1xi1>
    %281 = vector.broadcast %280 : vector<8x1xi1> to vector<8x256xi1>
    %282 = arith.select %281, %272, %234 : vector<8x256xi1>, vector<8x256xf32>
    %c8_i32_56 = arith.constant 8 : i32
    %283 = arith.muli %c5_i32, %c8_i32_56 : i32
    %284 = tpu.assume_multiple %283, 8 : i32
    %cst_57 = arith.constant 0.000000e+00 : f32
    %285 = vector.shape_cast %276 : vector<8x1xi1> to vector<8x1xi1>
    %286 = vector.broadcast %285 : vector<8x1xi1> to vector<8x256xi1>
    %287 = vector.broadcast %cst_57 : f32 to vector<8x256xf32>
    %288 = arith.select %286, %279, %287 : vector<8x256xi1>, vector<8x256xf32>
    %289 = arith.truncf %288 : vector<8x256xf32> to vector<8x256xbf16>
    %290 = arith.index_cast %284 : i32 to index
    %c0_58 = arith.constant 0 : index
    %291 = vector.load %arg13[%290, %c0_58] : memref<64x256xbf16, #tpu.memory_space<vmem>>, vector<8x256xbf16>
    tpu.vector_store %arg13[%290, %c0_58], %289 {strides = array<i32>} : memref<64x256xbf16, #tpu.memory_space<vmem>>, vector<8x256xbf16>,
    %c6_i32 = arith.constant 6 : i32
    %292 = arith.index_cast %c6_i32 : i32 to index
    %c0_59 = arith.constant 0 : index
    %c0_60 = arith.constant 0 : index
    %293 = vector.load %arg1[%292, %c0_59, %c0_60] : memref<8x8x1024xf32, #tpu.memory_space<vmem>>, vector<1x8x1024xf32>
    %294 = vector.shape_cast %293 : vector<1x8x1024xf32> to vector<8x1024xf32>
    %295 = arith.truncf %279 : vector<8x256xf32> to vector<8x256xbf16>
    %cst_61 = arith.constant dense<0.000000e+00> : vector<8x1024xf32>
    %296 = tpu.matmul %295, %1, %cst_61 {dimension_numbers = #tpu.dot_dimension_numbers<[1], [0], [0], [1], [0, 0, 1, 1], [], []>} : vector<8x256xbf16>, vector<256x1024xbf16>, vector<8x1024xf32> -> vector<8x1024xf32>
    %297 = arith.addf %294, %296 : vector<8x1024xf32>
    %298 = vector.extract_strided_slice %297 {offsets = [0, 0], sizes = [8, 256], strides = [1, 1]} : vector<8x1024xf32> to vector<8x256xf32>
    %299 = arith.negf %298 : vector<8x256xf32>
    %300 = math.exp %299 : vector<8x256xf32>
    %cst_62 = arith.constant 1.000000e+00 : f32
    %301 = vector.broadcast %cst_62 : f32 to vector<8x256xf32>
    %302 = arith.addf %301, %300 : vector<8x256xf32>
    %303 = arith.divf %301, %302 : vector<8x256xf32>
    %304 = vector.extract_strided_slice %297 {offsets = [0, 256], sizes = [8, 256], strides = [1, 1]} : vector<8x1024xf32> to vector<8x256xf32>
    %305 = arith.negf %304 : vector<8x256xf32>
    %306 = math.exp %305 : vector<8x256xf32>
    %cst_63 = arith.constant 1.000000e+00 : f32
    %307 = vector.broadcast %cst_63 : f32 to vector<8x256xf32>
    %308 = arith.addf %307, %306 : vector<8x256xf32>
    %309 = arith.divf %307, %308 : vector<8x256xf32>
    %310 = vector.extract_strided_slice %297 {offsets = [0, 512], sizes = [8, 256], strides = [1, 1]} : vector<8x1024xf32> to vector<8x256xf32>
    %311 = math.tanh %310 : vector<8x256xf32>
    %312 = vector.extract_strided_slice %297 {offsets = [0, 768], sizes = [8, 256], strides = [1, 1]} : vector<8x1024xf32> to vector<8x256xf32>
    %313 = arith.negf %312 : vector<8x256xf32>
    %314 = math.exp %313 : vector<8x256xf32>
    %cst_64 = arith.constant 1.000000e+00 : f32
    %315 = vector.broadcast %cst_64 : f32 to vector<8x256xf32>
    %316 = arith.addf %315, %314 : vector<8x256xf32>
    %317 = arith.divf %315, %316 : vector<8x256xf32>
    %318 = arith.mulf %309, %282 : vector<8x256xf32>
    %319 = arith.mulf %303, %311 : vector<8x256xf32>
    %320 = arith.addf %318, %319 : vector<8x256xf32>
    %321 = math.tanh %320 : vector<8x256xf32>
    %322 = arith.mulf %317, %321 : vector<8x256xf32>
    %323 = vector.broadcast %c6_i32 : i32 to vector<8x1xi32>
    %324 = arith.cmpi sgt, %0, %323 : vector<8x1xi32>
    %325 = vector.shape_cast %324 : vector<8x1xi1> to vector<8x1xi1>
    %326 = vector.broadcast %325 : vector<8x1xi1> to vector<8x256xi1>
    %327 = arith.select %326, %322, %279 : vector<8x256xi1>, vector<8x256xf32>
    %328 = vector.shape_cast %324 : vector<8x1xi1> to vector<8x1xi1>
    %329 = vector.broadcast %328 : vector<8x1xi1> to vector<8x256xi1>
    %330 = arith.select %329, %320, %282 : vector<8x256xi1>, vector<8x256xf32>
    %c8_i32_65 = arith.constant 8 : i32
    %331 = arith.muli %c6_i32, %c8_i32_65 : i32
    %332 = tpu.assume_multiple %331, 8 : i32
    %cst_66 = arith.constant 0.000000e+00 : f32
    %333 = vector.shape_cast %324 : vector<8x1xi1> to vector<8x1xi1>
    %334 = vector.broadcast %333 : vector<8x1xi1> to vector<8x256xi1>
    %335 = vector.broadcast %cst_66 : f32 to vector<8x256xf32>
    %336 = arith.select %334, %327, %335 : vector<8x256xi1>, vector<8x256xf32>
    %337 = arith.truncf %336 : vector<8x256xf32> to vector<8x256xbf16>
    %338 = arith.index_cast %332 : i32 to index
    %c0_67 = arith.constant 0 : index
    %339 = vector.load %arg13[%338, %c0_67] : memref<64x256xbf16, #tpu.memory_space<vmem>>, vector<8x256xbf16>
    tpu.vector_store %arg13[%338, %c0_67], %337 {strides = array<i32>} : memref<64x256xbf16, #tpu.memory_space<vmem>>, vector<8x256xbf16>,
    %c7_i32 = arith.constant 7 : i32
    %340 = arith.index_cast %c7_i32 : i32 to index
    %c0_68 = arith.constant 0 : index
    %c0_69 = arith.constant 0 : index
    %341 = vector.load %arg1[%340, %c0_68, %c0_69] : memref<8x8x1024xf32, #tpu.memory_space<vmem>>, vector<1x8x1024xf32>
    %342 = vector.shape_cast %341 : vector<1x8x1024xf32> to vector<8x1024xf32>
    %343 = arith.truncf %327 : vector<8x256xf32> to vector<8x256xbf16>
    %cst_70 = arith.constant dense<0.000000e+00> : vector<8x1024xf32>
    %344 = tpu.matmul %343, %1, %cst_70 {dimension_numbers = #tpu.dot_dimension_numbers<[1], [0], [0], [1], [0, 0, 1, 1], [], []>} : vector<8x256xbf16>, vector<256x1024xbf16>, vector<8x1024xf32> -> vector<8x1024xf32>
    %345 = arith.addf %342, %344 : vector<8x1024xf32>
    %346 = vector.extract_strided_slice %345 {offsets = [0, 0], sizes = [8, 256], strides = [1, 1]} : vector<8x1024xf32> to vector<8x256xf32>
    %347 = arith.negf %346 : vector<8x256xf32>
    %348 = math.exp %347 : vector<8x256xf32>
    %cst_71 = arith.constant 1.000000e+00 : f32
    %349 = vector.broadcast %cst_71 : f32 to vector<8x256xf32>
    %350 = arith.addf %349, %348 : vector<8x256xf32>
    %351 = arith.divf %349, %350 : vector<8x256xf32>
    %352 = vector.extract_strided_slice %345 {offsets = [0, 256], sizes = [8, 256], strides = [1, 1]} : vector<8x1024xf32> to vector<8x256xf32>
    %353 = arith.negf %352 : vector<8x256xf32>
    %354 = math.exp %353 : vector<8x256xf32>
    %cst_72 = arith.constant 1.000000e+00 : f32
    %355 = vector.broadcast %cst_72 : f32 to vector<8x256xf32>
    %356 = arith.addf %355, %354 : vector<8x256xf32>
    %357 = arith.divf %355, %356 : vector<8x256xf32>
    %358 = vector.extract_strided_slice %345 {offsets = [0, 512], sizes = [8, 256], strides = [1, 1]} : vector<8x1024xf32> to vector<8x256xf32>
    %359 = math.tanh %358 : vector<8x256xf32>
    %360 = vector.extract_strided_slice %345 {offsets = [0, 768], sizes = [8, 256], strides = [1, 1]} : vector<8x1024xf32> to vector<8x256xf32>
    %361 = arith.negf %360 : vector<8x256xf32>
    %362 = math.exp %361 : vector<8x256xf32>
    %cst_73 = arith.constant 1.000000e+00 : f32
    %363 = vector.broadcast %cst_73 : f32 to vector<8x256xf32>
    %364 = arith.addf %363, %362 : vector<8x256xf32>
    %365 = arith.divf %363, %364 : vector<8x256xf32>
    %366 = arith.mulf %357, %330 : vector<8x256xf32>
    %367 = arith.mulf %351, %359 : vector<8x256xf32>
    %368 = arith.addf %366, %367 : vector<8x256xf32>
    %369 = math.tanh %368 : vector<8x256xf32>
    %370 = arith.mulf %365, %369 : vector<8x256xf32>
    %371 = vector.broadcast %c7_i32 : i32 to vector<8x1xi32>
    %372 = arith.cmpi sgt, %0, %371 : vector<8x1xi32>
    %373 = vector.shape_cast %372 : vector<8x1xi1> to vector<8x1xi1>
    %374 = vector.broadcast %373 : vector<8x1xi1> to vector<8x256xi1>
    %375 = arith.select %374, %370, %327 : vector<8x256xi1>, vector<8x256xf32>
    %376 = vector.shape_cast %372 : vector<8x1xi1> to vector<8x1xi1>
    %377 = vector.broadcast %376 : vector<8x1xi1> to vector<8x256xi1>
    %378 = arith.select %377, %368, %330 : vector<8x256xi1>, vector<8x256xf32>
    %c8_i32_74 = arith.constant 8 : i32
    %379 = arith.muli %c7_i32, %c8_i32_74 : i32
    %380 = tpu.assume_multiple %379, 8 : i32
    %cst_75 = arith.constant 0.000000e+00 : f32
    %381 = vector.shape_cast %372 : vector<8x1xi1> to vector<8x1xi1>
    %382 = vector.broadcast %381 : vector<8x1xi1> to vector<8x256xi1>
    %383 = vector.broadcast %cst_75 : f32 to vector<8x256xf32>
    %384 = arith.select %382, %375, %383 : vector<8x256xi1>, vector<8x256xf32>
    %385 = arith.truncf %384 : vector<8x256xf32> to vector<8x256xbf16>
    %386 = arith.index_cast %380 : i32 to index
    %c0_76 = arith.constant 0 : index
    %387 = vector.load %arg13[%386, %c0_76] : memref<64x256xbf16, #tpu.memory_space<vmem>>, vector<8x256xbf16>
    tpu.vector_store %arg13[%386, %c0_76], %385 {strides = array<i32>} : memref<64x256xbf16, #tpu.memory_space<vmem>>, vector<8x256xbf16>,
    %c8_i32_77 = arith.constant 8 : i32
    %c0_78 = arith.constant 0 : index
    %c0_79 = arith.constant 0 : index
    %388 = vector.load %arg11[%c0_78, %c0_79] : memref<8x256xf32, #tpu.memory_space<vmem>>, vector<8x256xf32>
    tpu.vector_store %arg11[%c0_78, %c0_79], %375 {strides = array<i32>} : memref<8x256xf32, #tpu.memory_space<vmem>>, vector<8x256xf32>,
    %c0_80 = arith.constant 0 : index
    %c0_81 = arith.constant 0 : index
    %389 = vector.load %arg12[%c0_80, %c0_81] : memref<8x256xf32, #tpu.memory_space<vmem>>, vector<8x256xf32>
    tpu.vector_store %arg12[%c0_80, %c0_81], %378 {strides = array<i32>} : memref<8x256xf32, #tpu.memory_space<vmem>>, vector<8x256xf32>,
    %c0_82 = arith.constant 0 : index
    %c0_83 = arith.constant 0 : index
    %390 = vector.load %arg13[%c0_82, %c0_83] : memref<64x256xbf16, #tpu.memory_space<vmem>>, vector<64x256xbf16>
    %c0_84 = arith.constant 0 : index
    %c0_85 = arith.constant 0 : index
    %391 = vector.load %arg4[%c0_84, %c0_85] : memref<256x256xbf16, #tpu.memory_space<vmem>>, vector<256x256xbf16>
    %cst_86 = arith.constant dense<0.000000e+00> : vector<64x256xf32>
    %392 = tpu.matmul %390, %391, %cst_86 {dimension_numbers = #tpu.dot_dimension_numbers<[1], [0], [0], [1], [0, 0, 1, 1], [], []>} : vector<64x256xbf16>, vector<256x256xbf16>, vector<64x256xf32> -> vector<64x256xf32>
    %c0_87 = arith.constant 0 : index
    %c0_88 = arith.constant 0 : index
    %393 = vector.load %arg5[%c0_87, %c0_88] : memref<1x256xf32, #tpu.memory_space<vmem>>, vector<1x256xf32>
    %394 = vector.broadcast %393 : vector<1x256xf32> to vector<64x256xf32>
    %395 = arith.addf %392, %394 : vector<64x256xf32>
    %cst_89 = arith.constant 0.000000e+00 : f32
    %396 = vector.broadcast %cst_89 : f32 to vector<64x256xf32>
    %397 = arith.maximumf %395, %396 : vector<64x256xf32>
    %398 = arith.truncf %397 : vector<64x256xf32> to vector<64x256xbf16>
    %c0_90 = arith.constant 0 : index
    %c0_91 = arith.constant 0 : index
    %399 = vector.load %arg6[%c0_90, %c0_91] : memref<256x128xbf16, #tpu.memory_space<vmem>>, vector<256x128xbf16>
    %cst_92 = arith.constant dense<0.000000e+00> : vector<64x128xf32>
    %400 = tpu.matmul %398, %399, %cst_92 {dimension_numbers = #tpu.dot_dimension_numbers<[1], [0], [0], [1], [0, 0, 1, 1], [], []>} : vector<64x256xbf16>, vector<256x128xbf16>, vector<64x128xf32> -> vector<64x128xf32>
    %c0_93 = arith.constant 0 : index
    %c0_94 = arith.constant 0 : index
    %401 = vector.load %arg7[%c0_93, %c0_94] : memref<1x128xf32, #tpu.memory_space<vmem>>, vector<1x128xf32>
    %402 = vector.broadcast %401 : vector<1x128xf32> to vector<64x128xf32>
    %403 = arith.addf %400, %402 : vector<64x128xf32>
    %cst_95 = arith.constant dense<0xFF800000> : vector<64xf32>
    %404 = vector.multi_reduction <maximumf>, %403, %cst_95 [1] : vector<64x128xf32> to vector<64xf32>
    %405 = vector.shape_cast %404 : vector<64xf32> to vector<64x1xf32>
    %406 = vector.broadcast %405 : vector<64x1xf32> to vector<64x128xf32>
    %407 = arith.subf %403, %406 : vector<64x128xf32>
    %408 = math.exp %407 : vector<64x128xf32>
    %cst_96 = arith.constant dense<0.000000e+00> : vector<64xf32>
    %409 = vector.multi_reduction <add>, %408, %cst_96 [1] : vector<64x128xf32> to vector<64xf32>
    %410 = vector.shape_cast %409 : vector<64xf32> to vector<64x1xf32>
    %411 = tpu.reciprocal %410 {approx = true} : vector<64x1xf32> -> vector<64x1xf32>
    %412 = arith.mulf %410, %411 : vector<64x1xf32>
    %cst_97 = arith.constant 2.000000e+00 : f32
    %413 = vector.broadcast %cst_97 : f32 to vector<64x1xf32>
    %414 = arith.subf %413, %412 : vector<64x1xf32>
    %415 = arith.mulf %411, %414 : vector<64x1xf32>
    %416 = vector.broadcast %415 : vector<64x1xf32> to vector<64x128xf32>
    %417 = arith.mulf %408, %416 : vector<64x128xf32>
    %418 = vector.shape_cast %417 : vector<64x128xf32> to vector<8x8x128xf32>
    %c0_98 = arith.constant 0 : index
    %c0_99 = arith.constant 0 : index
    %c0_100 = arith.constant 0 : index
    %419 = vector.load %arg10[%c0_98, %c0_99, %c0_100] : memref<8x8x128xf32, #tpu.memory_space<vmem>>, vector<8x8x128xf32>
    tpu.vector_store %arg10[%c0_98, %c0_99, %c0_100], %418 {strides = array<i32>} : memref<8x8x128xf32, #tpu.memory_space<vmem>>, vector<8x8x128xf32>,
    return
  }
  func.func @transform_0(%arg0: i32) -> (i32, i32, i32) {
    %c0_i32 = arith.constant 0 : i32
    %c0_i32_0 = arith.constant 0 : i32
    %c0_i32_1 = arith.constant 0 : i32
    return %c0_i32, %arg0, %c0_i32_0 : i32, i32, i32
  }
  func.func @transform_1(%arg0: i32) -> (i32, i32) {
    %c0_i32 = arith.constant 0 : i32
    %c0_i32_0 = arith.constant 0 : i32
    return %arg0, %c0_i32 : i32, i32
  }
  func.func @transform_2(%arg0: i32) -> (i32, i32) {
    %c0_i32 = arith.constant 0 : i32
    %c0_i32_0 = arith.constant 0 : i32
    %c0_i32_1 = arith.constant 0 : i32
    return %c0_i32, %c0_i32_0 : i32, i32
  }
  func.func @transform_3(%arg0: i32) -> (i32, i32) {
    %c0_i32 = arith.constant 0 : i32
    %c0_i32_0 = arith.constant 0 : i32
    %c0_i32_1 = arith.constant 0 : i32
    return %c0_i32, %c0_i32_0 : i32, i32
  }
  func.func @transform_4(%arg0: i32) -> (i32, i32) {
    %c0_i32 = arith.constant 0 : i32
    %c0_i32_0 = arith.constant 0 : i32
    %c0_i32_1 = arith.constant 0 : i32
    return %c0_i32, %c0_i32_0 : i32, i32
  }
  func.func @transform_5(%arg0: i32) -> (i32, i32) {
    %c0_i32 = arith.constant 0 : i32
    %c0_i32_0 = arith.constant 0 : i32
    %c0_i32_1 = arith.constant 0 : i32
    return %c0_i32, %c0_i32_0 : i32, i32
  }
  func.func @transform_6(%arg0: i32) -> (i32, i32) {
    %c0_i32 = arith.constant 0 : i32
    %c0_i32_0 = arith.constant 0 : i32
    %c0_i32_1 = arith.constant 0 : i32
    return %c0_i32, %c0_i32_0 : i32, i32
  }
  func.func @transform_7(%arg0: i32) -> (i32, i32) {
    %c0_i32 = arith.constant 0 : i32
    %c0_i32_0 = arith.constant 0 : i32
    return %arg0, %c0_i32 : i32, i32
  }
  func.func @transform_8(%arg0: i32) -> (i32, i32) {
    %c0_i32 = arith.constant 0 : i32
    %c0_i32_0 = arith.constant 0 : i32
    return %arg0, %c0_i32 : i32, i32
  }
  func.func @transform_9(%arg0: i32) -> (i32, i32, i32) {
    %c0_i32 = arith.constant 0 : i32
    %c0_i32_0 = arith.constant 0 : i32
    %c0_i32_1 = arith.constant 0 : i32
    return %c0_i32, %arg0, %c0_i32_0 : i32, i32, i32
  }
  func.func @transform_10(%arg0: i32) -> (i32, i32) {
    %c0_i32 = arith.constant 0 : i32
    %c0_i32_0 = arith.constant 0 : i32
    return %arg0, %c0_i32 : i32, i32
  }
  func.func @transform_11(%arg0: i32) -> (i32, i32) {
    %c0_i32 = arith.constant 0 : i32
    %c0_i32_0 = arith.constant 0 : i32
    return %arg0, %c0_i32 : i32, i32
  }
}

</mosaic_0001>

<bundles_post_ra>
// kernel: tpu_custom_call.1
= control target key start
LH: loop header
LB: loop body
LE: loop exit
PB: predicated region body
PF: predicated region fallthrough
CT: control target
= control target key end

     0   :  { %17 = vsyncpa [#allocation4], 0  ;;  %s6255_s0 = inlined_call_operand.hbm [shape: f32[8,8,1024], index: 0, kind: input, shape index: {}]   ;;  %s6256_s1 = inlined_call_operand.vmem [shape: s32[8,1], index: 1, kind: input, shape index: {}]   ;;  %s6257_s2 = inlined_call_operand.hbm [shape: bf16[256,1024], index: 2, kind: input, shape index: {}]   ;;  %s6258_s3 = inlined_call_operand.hbm [shape: bf16[256,256], index: 3, kind: input, shape index: {}]   ;;  %s6259_s4 = inlined_call_operand.vmem [shape: f32[1,256], index: 4, kind: input, shape index: {}]   ;;  %s6260_s5 = inlined_call_operand.hbm [shape: bf16[256,128], index: 5, kind: input, shape index: {}]   ;;  %s6261_s6 = inlined_call_operand.vmem [shape: f32[1,128], index: 6, kind: input, shape index: {}]   ;;  %s6262_s7 = inlined_call_operand.vmem [shape: f32[8,256], index: 7, kind: input, shape index: {}]   ;;  %s6263_s8 = inlined_call_operand.hbm [shape: f32[8,256], index: 8, kind: input, shape index: {}]   ;;  %s6264_s9 = inlined_call_operand.hbm [shape: f32[8,8,128], index: 9, kind: output, shape index: {0}]   ;;  %s6265_s10 = inlined_call_operand.hbm [shape: f32[8,256], index: 10, kind: output, shape index: {1}]   ;;  %s6266_s11 = inlined_call_operand.hbm [shape: f32[8,256], index: 11, kind: output, shape index: {2}]  }
   0x1   :  { %18 = vsyncpa [#allocation7], 0 }
   0x2   :  { %19 = vsyncpa [#allocation10], 0 }
   0x3   :  { %20 = vsyncpa [#allocation5], 0 }
   0x4   :  { %21 = vsyncpa [#allocation14], 0  ;;  %s4488_s17 = smov [#allocation6]  }
   0x5   :  { %s41_s18 = sshll.u32 %s4488_s17, 4  ;;  %s42_s18 = int_to_ptr.vmem [resolvable:$true] %s41_s18 }
   0x6   :  { %s4326_s19 = scalar_lea.vmem %s42_s18, 16384  ;;  %p4331_p1 = scmp.lt.s32.totalorder %s42_s18, %s42_s18 }
   0x7   :  { %p4327_p0 = scmp.ne.s32.totalorder %s42_s18, %s4326_s19  ;;  %p4332_p2 = scmp.lt.s32.totalorder %s4326_s19, %s4326_s19 }
   0x9   :  { %p4333_p3 = por %p4332_p2, %p4331_p1 }
   0xb   :  { %p4334_p4 = pnand %p4333_p3, %p4327_p0 }
   0xd   :  { %4337 = shalt.err (!%p4334_p4)
}
   0xe   :  { %s4489_s20 = smov 512   ;;  %s4490_s21 = smov 32  }
   0xf   :  { %47 = dma.hbm_to_vmem [thread:$0]  %s6257_s2, 16384, %s42_s18, [#allocation7], %s4489_s20, %s4489_s20, %s4490_s21  }
  0x10   :  { %s4491_s24 = smov [#allocation9]   ;;  %s4492_s26 = smov [#allocation3]  }
  0x11   :  { %s67_s25 = sshll.u32 %s4491_s24, 4  ;;  %s27_s27 = sshll.u32 %s4492_s26, 4  ;;  %s68_s25 = int_to_ptr.vmem [resolvable:$true] %s67_s25  ;;  %s28_s27 = int_to_ptr.vmem [resolvable:$true] %s27_s27 }
  0x12   :  { %s4346_s28 = scalar_lea.vmem %s68_s25, 2048  ;;  %p4351_p6 = scmp.lt.s32.totalorder %s68_s25, %s68_s25 }
  0x13   :  { %p4347_p5 = scmp.ne.s32.totalorder %s68_s25, %s4346_s28  ;;  %p4352_p7 = scmp.lt.s32.totalorder %s4346_s28, %s4346_s28 }
  0x15   :  { %p4353_p8 = por %p4352_p7, %p4351_p6 }
  0x17   :  { %p4354_p9 = pnand %p4353_p8, %p4347_p5 }
  0x19   :  { %4357 = shalt.err (!%p4354_p9)
}
  0x1a   :  { %s4493_s29 = smov 64   ;;  %s4494_s30 = smov 4  }
  0x1b   :  { %73 = dma.hbm_to_vmem [thread:$0]  %s6260_s5, 2048, %s68_s25, [#allocation10], %s4493_s29, %s4493_s29, %s4494_s30  }
  0x1c   :  { %s4366_s2 = scalar_lea.vmem %s28_s27, 8192  ;;  %p4371_p11 = scmp.lt.s32.totalorder %s28_s27, %s28_s27 }
  0x1d   :  { %p4367_p10 = scmp.ne.s32.totalorder %s28_s27, %s4366_s2  ;;  %p4372_p12 = scmp.lt.s32.totalorder %s4366_s2, %s4366_s2 }
  0x1f   :  { %p4373_p13 = por %p4372_p12, %p4371_p11 }
  0x21   :  { %p4374_p0 = pnand %p4373_p13, %p4367_p10 }
  0x23   :  { %4377 = shalt.err (!%p4374_p0)
}
  0x24   :  { %s4495_s14 = smov 1024   ;;  %s4496_s17 = smov [#allocation8]  }
  0x25   :  { %33 = dma.hbm_to_vmem [thread:$0]  %s6255_s0, 8192, %s28_s27, [#allocation4], %s4495_s14, %s4495_s14, %s4493_s29  }
  0x26   :  { %s53_s18 = sshll.u32 %s4496_s17, 4  ;;  %s54_s18 = int_to_ptr.vmem [resolvable:$true] %s53_s18 }
  0x27   :  { %s4386_s19 = scalar_lea.vmem %s54_s18, 4096  ;;  %p4391_p2 = scmp.lt.s32.totalorder %s54_s18, %s54_s18 }
  0x28   :  { %p4387_p1 = scmp.ne.s32.totalorder %s54_s18, %s4386_s19  ;;  %p4392_p3 = scmp.lt.s32.totalorder %s4386_s19, %s4386_s19 }
  0x2a   :  { %p4393_p4 = por %p4392_p3, %p4391_p2 }
  0x2c   :  { %p4394_p5 = pnand %p4393_p4, %p4387_p1 }
  0x2e   :  { %4397 = shalt.err (!%p4394_p5)
}
  0x2f   :  { %s4497_s5 = smov 128   ;;  %s4498_s20 = smov 8  }
  0x30   :  { %59 = dma.hbm_to_vmem [thread:$0]  %s6258_s3, 4096, %s54_s18, [#allocation7], %s4497_s5, %s4497_s5, %s4498_s20  }
  0x31   :  { %s4499_s0 = smov [#allocation11]  }
  0x32   :  { %s84_s23 = sshll.u32 %s4499_s0, 4  ;;  %s85_s23 = int_to_ptr.vmem [resolvable:$true] %s84_s23 }
  0x33   :  { %s4406_s24 = scalar_lea.vmem %s85_s23, 256  ;;  %p4411_p7 = scmp.lt.s32.totalorder %s85_s23, %s85_s23 }
  0x34   :  { %p4407_p6 = scmp.ne.s32.totalorder %s85_s23, %s4406_s24  ;;  %p4412_p8 = scmp.lt.s32.totalorder %s4406_s24, %s4406_s24 }
  0x36   :  { %p4413_p9 = por %p4412_p8, %p4411_p7 }
  0x38   :  { %p4414_p10 = pnand %p4413_p9, %p4407_p6 }
  0x3a   :  { %4417 = shalt.err (!%p4414_p10)
}
  0x3b   :  { %87 = dma.hbm_to_vmem [thread:$0]  %s6263_s8, 256, %s85_s23, [#allocation10]  }
  0x3c   :  { %4478 = dma.done.wait [#allocation4], 8192  }
  0x3d   :  { %4479 = vsyncadd [#allocation4], 4294959104 }
  0x3e   :  { %4480 = dma.done.wait [#allocation7], 20480  }
  0x3f   :  { %4481 = vsyncadd [#allocation7], 4294946816 }
  0x40   :  { %4482 = dma.done.wait [#allocation10], 2304  }
  0x41   :  { %4483 = vsyncadd [#allocation10], 4294964992  ;;  %v161_v0 = vld [vmem:[#allocation6 + $0x1c0] sm:$0xff]  ;;  %v162_v2 = vld [vmem:[#allocation6 + $0x1c8] sm:$0xff]  ;;  %v4500_v26 = vmov 0  }
  0x42   :  { %v165_v1 = vld [vmem:[#allocation6 + $0x1e0] sm:$0xff]  ;;  %v166_v4 = vld [vmem:[#allocation6 + $0x1e8] sm:$0xff]  ;;  %3963 = vset.pattern.permute.xlu0 %v4500_v26  ;;  %3964 = vset.pattern.permute.xlu1 %v4500_v26 }
  0x43   :  { %v4582_v3 = vcombine.high %v161_v0, %v165_v1  ;;  %v4584_v5 = vcombine.low %v161_v0, %v165_v1  ;;  %v153_v6 = vld [vmem:[#allocation6 + $0x180] sm:$0xff]  ;;  %v4586_v8 = vcombine.high %v162_v2, %v166_v4  ;;  %v4588_v9 = vcombine.low %v162_v2, %v166_v4  ;;  %v154_v11 = vld [vmem:[#allocation6 + $0x188] sm:$0xff] }
  0x44   :  { %v157_v7 = vld [vmem:[#allocation6 + $0x1a0] sm:$0xff]  ;;  %v158_v12 = vld [vmem:[#allocation6 + $0x1a8] sm:$0xff] }
  0x45   :  { %6554 = vst [vmem:[#allocation21_spill] sm:$0xff] %v4582_v3  ;;  %6555 = vst [vmem:[#allocation22_spill] sm:$0xff] %v4584_v5  ;;  %v4590_v10 = vcombine.high %v153_v6, %v157_v7  ;;  %v145_v13 = vld [vmem:[#allocation6 + $0x140] sm:$0xff]  ;;  %887 = vmatprep.subr.bf16.mxu0 %v4582_v3  ;;  %v4593_v14 = vcombine.high %v154_v11, %v158_v12  ;;  %v146_v16 = vld [vmem:[#allocation6 + $0x148] sm:$0xff]  ;;  %928 = vmatprep.subr.bf16.mxu1 %v4586_v8 }
  0x46   :  { %6556 = vst [vmem:[#allocation23_spill] sm:$0xff] %v4586_v8  ;;  %6557 = vst [vmem:[#allocation24_spill] sm:$0xff] %v4588_v9  ;;  %v149_v15 = vld [vmem:[#allocation6 + $0x160] sm:$0xff]  ;;  %v150_v17 = vld [vmem:[#allocation6 + $0x168] sm:$0xff]  ;;  %888 = vmatpush1.bf16.msra.mxu0 %v4584_v5  ;;  %v4597_v18 = vcombine.low %v153_v6, %v157_v7  ;;  %929 = vmatpush1.bf16.msra.mxu1 %v4588_v9  ;;  %v4601_v19 = vcombine.low %v154_v11, %v158_v12 }
  0x47   :  { %6558 = vst [vmem:[#allocation25_spill] sm:$0xff] %v4590_v10  ;;  %6559 = vst [vmem:[#allocation26_spill] sm:$0xff] %v4593_v14  ;;  %889 = vmatprep.subr.bf16.mxu0 %v4590_v10  ;;  %v4603_v20 = vcombine.high %v145_v13, %v149_v15  ;;  %930 = vmatprep.subr.bf16.mxu1 %v4593_v14  ;;  %v4606_v21 = vcombine.high %v146_v16, %v150_v17  ;;  %v137_v22 = vld [vmem:[#allocation6 + $0x100] sm:$0xff]  ;;  %v138_v24 = vld [vmem:[#allocation6 + $0x108] sm:$0xff] }
  0x48   :  { %6560 = vst [vmem:[#allocation27_spill] sm:$0xff] %v4597_v18  ;;  %6561 = vst [vmem:[#allocation28_spill] sm:$0xff] %v4601_v19  ;;  %v141_v23 = vld [vmem:[#allocation6 + $0x120] sm:$0xff]  ;;  %v142_v25 = vld [vmem:[#allocation6 + $0x128] sm:$0xff]  ;;  %v4611_v27 = vcombine.low %v145_v13, %v149_v15  ;;  %v4615_v28 = vcombine.low %v146_v16, %v150_v17 }
  0x49   :  { %6562 = vst [vmem:[#allocation29_spill] sm:$0xff] %v4603_v20  ;;  %6563 = vst [vmem:[#allocation30_spill] sm:$0xff] %v4606_v21  ;;  %v4617_v29 = vcombine.high %v137_v22, %v141_v23  ;;  %v4620_v30 = vcombine.high %v138_v24, %v142_v25  ;;  %v129_v31 = vld [vmem:[#allocation6 + $0xc0] sm:$0xff]  ;;  %v130_v33 = vld [vmem:[#allocation6 + $0xc8] sm:$0xff]  ;;  %v4623_v35 = vcombine.low %v137_v22, %v141_v23 }
  0x4a   :  { %890 = vmatpush1.bf16.msra.mxu0 %v4597_v18  ;;  %6564 = vst [vmem:[#allocation31_spill] sm:$0xff] %v4611_v27  ;;  %931 = vmatpush1.bf16.msra.mxu1 %v4601_v19  ;;  %6565 = vst [vmem:[#allocation32_spill] sm:$0xff] %v4615_v28  ;;  %v133_v32 = vld [vmem:[#allocation6 + $0xe0] sm:$0xff]  ;;  %v134_v34 = vld [vmem:[#allocation6 + $0xe8] sm:$0xff]  ;;  %v4627_v36 = vcombine.low %v138_v24, %v142_v25 }
  0x4b   :  { %891 = vmatprep.subr.bf16.mxu0 %v4603_v20  ;;  %6566 = vst [vmem:[#allocation33_spill] sm:$0xff] %v4617_v29  ;;  %932 = vmatprep.subr.bf16.mxu1 %v4606_v21  ;;  %6567 = vst [vmem:[#allocation34_spill] sm:$0xff] %v4620_v30  ;;  %v4629_v37 = vcombine.high %v129_v31, %v133_v32  ;;  %v4632_v38 = vcombine.high %v130_v33, %v134_v34  ;;  %v121_v39 = vld [vmem:[#allocation6 + $0x80] sm:$0xff]  ;;  %v122_v41 = vld [vmem:[#allocation6 + $0x88] sm:$0xff] }
  0x4c   :  { %6568 = vst [vmem:[#allocation35_spill] sm:$0xff] %v4623_v35  ;;  %6569 = vst [vmem:[#allocation36_spill] sm:$0xff] %v4627_v36  ;;  %v125_v40 = vld [vmem:[#allocation6 + $0xa0] sm:$0xff]  ;;  %v126_v42 = vld [vmem:[#allocation6 + $0xa8] sm:$0xff]  ;;  %v4635_v43 = vcombine.low %v129_v31, %v133_v32  ;;  %v4639_v44 = vcombine.low %v130_v33, %v134_v34 }
  0x4d   :  { %6570 = vst [vmem:[#allocation37_spill] sm:$0xff] %v4629_v37  ;;  %6571 = vst [vmem:[#allocation38_spill] sm:$0xff] %v4632_v38  ;;  %v4641_v45 = vcombine.high %v121_v39, %v125_v40  ;;  %v4644_v46 = vcombine.high %v122_v41, %v126_v42  ;;  %v113_v47 = vld [vmem:[#allocation6 + $0x40] sm:$0xff]  ;;  %v114_v49 = vld [vmem:[#allocation6 + $0x48] sm:$0xff]  ;;  %v4647_v51 = vcombine.low %v121_v39, %v125_v40 }
  0x4e   :  { %892 = vmatpush1.bf16.msra.mxu0 %v4611_v27  ;;  %933 = vmatpush1.bf16.msra.mxu1 %v4615_v28  ;;  %6572 = vst [vmem:[#allocation39_spill] sm:$0xff] %v4635_v43  ;;  %6573 = vst [vmem:[#allocation40_spill] sm:$0xff] %v4639_v44  ;;  %v117_v48 = vld [vmem:[#allocation6 + $0x60] sm:$0xff]  ;;  %v118_v50 = vld [vmem:[#allocation6 + $0x68] sm:$0xff]  ;;  %v4651_v52 = vcombine.low %v122_v41, %v126_v42 }
  0x4f   :  { %893 = vmatprep.subr.bf16.mxu0 %v4617_v29  ;;  %934 = vmatprep.subr.bf16.mxu1 %v4620_v30  ;;  %6574 = vst [vmem:[#allocation41_spill] sm:$0xff] %v4641_v45  ;;  %6575 = vst [vmem:[#allocation42_spill] sm:$0xff] %v4644_v46  ;;  %v4653_v53 = vcombine.high %v113_v47, %v117_v48  ;;  %v234_v54 = vld [vmem:[%s6262_s7 + $0x8] sm:$0xff]  ;;  %v4659_v55 = vcombine.high %v114_v49, %v118_v50  ;;  %v105_v56 = vld [vmem:[#allocation6] sm:$0xff] }
  0x50   :  { %6576 = vst [vmem:[#allocation43_spill] sm:$0xff] %v4647_v51  ;;  %6577 = vst [vmem:[#allocation44_spill] sm:$0xff] %v4651_v52  ;;  %v109_v57 = vld [vmem:[#allocation6 + $0x20] sm:$0xff]  ;;  %v4661_v58 = vpack.c.bf16 %v234_v54, %v234_v54  ;;  %v106_v59 = vld [vmem:[#allocation6 + $0x8] sm:$0xff]  ;;  %v4664_v61 = vcombine.low %v113_v47, %v117_v48  ;;  %v4669_v62 = vcombine.low %v114_v49, %v118_v50 }
  0x51   :  { %6578 = vst [vmem:[#allocation45_spill] sm:$0xff] %v4653_v53  ;;  %6579 = vst [vmem:[#allocation46_spill] sm:$0xff] %v4659_v55  ;;  %v110_v60 = vld [vmem:[#allocation6 + $0x28] sm:$0xff]  ;;  %v4671_v63 = vcombine.high %v105_v56, %v109_v57  ;;  %v225_v1 = vld [vmem:[#allocation6 + $0x3c0] sm:$0xff]  ;;  %v4678_v7 = vcombine.low %v105_v56, %v109_v57 }
  0x52   :  { %894 = vmatpush1.bf16.msra.mxu0 %v4623_v35  ;;  %935 = vmatpush1.bf16.msra.mxu1 %v4627_v36  ;;  %6580 = vst [vmem:[#allocation47_spill] sm:$0xff] %v4664_v61  ;;  %6581 = vst [vmem:[#allocation48_spill] sm:$0xff] %v4669_v62  ;;  %v4674_v0 = vcombine.high %v106_v59, %v110_v60  ;;  %v229_v2 = vld [vmem:[#allocation6 + $0x3e0] sm:$0xff]  ;;  %v226_v4 = vld [vmem:[#allocation6 + $0x3c8] sm:$0xff]  ;;  %v4682_v11 = vcombine.low %v106_v59, %v110_v60 }
  0x53   :  { %895 = vmatprep.subr.bf16.mxu0 %v4629_v37  ;;  %936 = vmatprep.subr.bf16.mxu1 %v4632_v38  ;;  %6582 = vst [vmem:[#allocation49_spill] sm:$0xff] %v4671_v63  ;;  %v230_v6 = vld [vmem:[#allocation6 + $0x3e8] sm:$0xff]  ;;  %6584 = vst [vmem:[#allocation51_spill] sm:$0xff] %v4678_v7  ;;  %v4684_v12 = vcombine.high %v225_v1, %v229_v2  ;;  %v217_v15 = vld [vmem:[#allocation6 + $0x380] sm:$0xff]  ;;  %v4690_v23 = vcombine.low %v225_v1, %v229_v2 }
  0x54   :  { %919 = vmatprep.mubr.bf16.mxu0 %v4661_v58  ;;  %6583 = vst [vmem:[#allocation50_spill] sm:$0xff] %v4674_v0  ;;  %960 = vmatprep.mubr.bf16.mxu1 %v4661_v58  ;;  %6585 = vst [vmem:[#allocation52_spill] sm:$0xff] %v4682_v11  ;;  %v4687_v13 = vcombine.high %v226_v4, %v230_v6  ;;  %v221_v16 = vld [vmem:[#allocation6 + $0x3a0] sm:$0xff]  ;;  %v218_v17 = vld [vmem:[#allocation6 + $0x388] sm:$0xff]  ;;  %v4694_v24 = vcombine.low %v226_v4, %v230_v6 }
  0x55   :  { %6586 = vst [vmem:[#allocation53_spill] sm:$0xff] %v4684_v12  ;;  %v222_v22 = vld [vmem:[#allocation6 + $0x3a8] sm:$0xff]  ;;  %6588 = vst [vmem:[#allocation55_spill] sm:$0xff] %v4690_v23  ;;  %v4696_v25 = vcombine.high %v217_v15, %v221_v16  ;;  %v209_v32 = vld [vmem:[#allocation6 + $0x340] sm:$0xff]  ;;  %v4702_v40 = vcombine.low %v217_v15, %v221_v16 }
  0x56   :  { %896 = vmatpush1.bf16.msra.mxu0 %v4635_v43  ;;  %937 = vmatpush1.bf16.msra.mxu1 %v4639_v44  ;;  %6587 = vst [vmem:[#allocation54_spill] sm:$0xff] %v4687_v13  ;;  %6589 = vst [vmem:[#allocation56_spill] sm:$0xff] %v4694_v24  ;;  %v4699_v31 = vcombine.high %v218_v17, %v222_v22  ;;  %v213_v33 = vld [vmem:[#allocation6 + $0x360] sm:$0xff]  ;;  %v210_v34 = vld [vmem:[#allocation6 + $0x348] sm:$0xff]  ;;  %v4706_v41 = vcombine.low %v218_v17, %v222_v22 }
  0x57   :  { %897 = vmatprep.subr.bf16.mxu0 %v4641_v45  ;;  %938 = vmatprep.subr.bf16.mxu1 %v4644_v46  ;;  %6590 = vst [vmem:[#allocation57_spill] sm:$0xff] %v4696_v25  ;;  %v214_v39 = vld [vmem:[#allocation6 + $0x368] sm:$0xff]  ;;  %6592 = vst [vmem:[#allocation59_spill] sm:$0xff] %v4702_v40  ;;  %v4708_v42 = vcombine.high %v209_v32, %v213_v33  ;;  %v201_v48 = vld [vmem:[#allocation6 + $0x300] sm:$0xff]  ;;  %v4714_v56 = vcombine.low %v209_v32, %v213_v33 }
  0x58   :  { %6591 = vst [vmem:[#allocation58_spill] sm:$0xff] %v4699_v31  ;;  %6593 = vst [vmem:[#allocation60_spill] sm:$0xff] %v4706_v41  ;;  %v4711_v47 = vcombine.high %v210_v34, %v214_v39  ;;  %v205_v49 = vld [vmem:[#allocation6 + $0x320] sm:$0xff]  ;;  %v202_v50 = vld [vmem:[#allocation6 + $0x308] sm:$0xff]  ;;  %v4718_v57 = vcombine.low %v210_v34, %v214_v39 }
  0x59   :  { %6594 = vst [vmem:[#allocation61_spill] sm:$0xff] %v4708_v42  ;;  %v206_v54 = vld [vmem:[#allocation6 + $0x328] sm:$0xff]  ;;  %6596 = vst [vmem:[#allocation63_spill] sm:$0xff] %v4714_v56  ;;  %v4720_v59 = vcombine.high %v201_v48, %v205_v49  ;;  %v193_v60 = vld [vmem:[#allocation6 + $0x2c0] sm:$0xff]  ;;  %v4725_v4 = vcombine.low %v201_v48, %v205_v49 }
  0x5a   :  { %898 = vmatpush1.bf16.msra.mxu0 %v4647_v51  ;;  %939 = vmatpush1.bf16.msra.mxu1 %v4651_v52  ;;  %6595 = vst [vmem:[#allocation62_spill] sm:$0xff] %v4711_v47  ;;  %6597 = vst [vmem:[#allocation64_spill] sm:$0xff] %v4718_v57  ;;  %v197_v1 = vld [vmem:[#allocation6 + $0x2e0] sm:$0xff]  ;;  %v4723_v2 = vcombine.high %v202_v50, %v206_v54  ;;  %v194_v6 = vld [vmem:[#allocation6 + $0x2c8] sm:$0xff]  ;;  %v4731_v17 = vcombine.low %v202_v50, %v206_v54 }
  0x5b   :  { %899 = vmatprep.subr.bf16.mxu0 %v4653_v53  ;;  %940 = vmatprep.subr.bf16.mxu1 %v4659_v55  ;;  %6598 = vst [vmem:[#allocation65_spill] sm:$0xff] %v4720_v59  ;;  %6600 = vst [vmem:[#allocation67_spill] sm:$0xff] %v4725_v4  ;;  %v198_v15 = vld [vmem:[#allocation6 + $0x2e8] sm:$0xff]  ;;  %v104_v16 = vld [vmem:[%s6256_s1] sm:$0xff]  ;;  %v4733_v22 = vcombine.high %v193_v60, %v197_v1 }
  0x5c   :  { %6599 = vst [vmem:[#allocation66_spill] sm:$0xff] %v4723_v2  ;;  %6601 = vst [vmem:[#allocation68_spill] sm:$0xff] %v4731_v17  ;;  %v185_v32 = vld [vmem:[#allocation6 + $0x280] sm:$0xff]  ;;  %vm1107_vm0 = vcmp.gt.s32.totalorder %v104_v16, 0  ;;  %vm1617_vm1 = vcmp.gt.s32.totalorder %v104_v16, 2  ;;  %vm1872_vm2 = vcmp.gt.s32.totalorder %v104_v16, 3  ;;  %v4740_v48 = vcombine.high %v194_v6, %v198_v15 }
  0x5d   :  { %6602 = vst [vmem:[#allocation69_spill] sm:$0xff] %v4733_v22  ;;  %v189_v33 = vld [vmem:[#allocation6 + $0x2a0] sm:$0xff]  ;;  %v1108_v34 = vsel %vm1107_vm0, 1, %v4500_v26  ;;  %v1618_v39 = vsel %vm1617_vm1, 1, %v4500_v26  ;;  %vm1362_vm3 = vcmp.gt.s32.totalorder %v104_v16, 1  ;;  %v186_v49 = vld [vmem:[#allocation6 + $0x288] sm:$0xff] }
  0x5e   :  { %900 = vmatpush1.bf16.msra.mxu0 %v4664_v61  ;;  %941 = vmatpush1.bf16.msra.mxu1 %v4669_v62  ;;  %6603 = vst [vmem:[#allocation70_spill] sm:$0xff] %v4740_v48  ;;  %v190_v50 = vld [vmem:[#allocation6 + $0x2a8] sm:$0xff]  ;;  %v1363_v54 = vsel %vm1362_vm3, 1, %v4500_v26  ;;  %vm2127_vm4 = vcmp.gt.s32.totalorder %v104_v16, 4  ;;  %vm2382_vm5 = vcmp.gt.s32.totalorder %v104_v16, 5  ;;  %vm2892_vm6 = vcmp.gt.s32.totalorder %v104_v16, 7 }
  0x5f   :  { %901 = vmatprep.subr.bf16.mxu0 %v4671_v63  ;;  %942 = vmatprep.subr.bf16.mxu1 %v4674_v0  ;;  %vm2637_vm7 = vcmp.gt.s32.totalorder %v104_v16, 6 }
  0x60   :  { %1110 = vperm.xlu0 %3963, %v1108_v34   ;;  %1620 = vperm.xlu1 %3964, %v1618_v39   ;;  %v4751_v34 = vcombine.high %v185_v32, %v189_v33  ;;  %v178_v39 = vld [vmem:[#allocation6 + $0x248] sm:$0xff]  ;;  %v2638_v16 = vsel %vm2637_vm7, 1, %v4500_v26 }
  0x62   :  { %902 = vmatpush1.bf16.msra.mxu0 %v4678_v7  ;;  %943 = vmatpush1.bf16.msra.mxu1 %v4682_v11  ;;  %6606 = vst [vmem:[#allocation73_spill] sm:$0xff] %v4751_v34 }
  0x63   :  { %903 = vmatprep.subr.bf16.mxu0 %v4684_v12  ;;  %944 = vmatprep.subr.bf16.mxu1 %v4687_v13 }
  0x64   :  { %1365 = vperm.xlu0 %3963, %v1363_v54  }
  0x66   :  { %904 = vmatpush2.bf16.msra.mxu0 %v4690_v23  ;;  %945 = vmatpush2.bf16.msra.mxu1 %v4694_v24 }
  0x67   :  { %905 = vmatprep.subr.bf16.mxu0 %v4696_v25  ;;  %946 = vmatprep.subr.bf16.mxu1 %v4699_v31 }
  0x6a   :  { %906 = vmatpush2.bf16.msra.mxu0 %v4702_v40  ;;  %947 = vmatpush2.bf16.msra.mxu1 %v4706_v41 }
  0x6b   :  { %907 = vmatprep.subr.bf16.mxu0 %v4708_v42  ;;  %948 = vmatprep.subr.bf16.mxu1 %v4711_v47  ;;  %v1873_v47 = vsel %vm1872_vm2, 1, %v4500_v26  ;;  %v182_v42 = vld [vmem:[#allocation6 + $0x268] sm:$0xff] }
  0x6c   :  { %1875 = vperm.xlu1 %3964, %v1873_v47   ;;  %v170_v47 = vld [vmem:[#allocation6 + $0x208] sm:$0xff] }
  0x6e   :  { %908 = vmatpush2.bf16.msra.mxu0 %v4714_v56  ;;  %949 = vmatpush2.bf16.msra.mxu1 %v4718_v57  ;;  %v4744_v57 = vcombine.low %v193_v60, %v197_v1  ;;  %v181_v56 = vld [vmem:[#allocation6 + $0x260] sm:$0xff]  ;;  %v4754_v60 = vcombine.high %v186_v49, %v190_v50  ;;  %v2128_v1 = vsel %vm2127_vm4, 1, %v4500_v26 }
  0x6f   :  { %909 = vmatprep.subr.bf16.mxu0 %v4720_v59  ;;  %950 = vmatprep.subr.bf16.mxu1 %v4723_v2  ;;  %v177_v59 = vld [vmem:[#allocation6 + $0x240] sm:$0xff]  ;;  %v4749_v2 = vcombine.low %v194_v6, %v198_v15  ;;  %v2383_v15 = vsel %vm2382_vm5, 1, %v4500_v26 }
  0x70   :  { %6604 = vst [vmem:[#allocation71_spill] sm:$0xff] %v4744_v57  ;;  %6607 = vst [vmem:[#allocation74_spill] sm:$0xff] %v4754_v60  ;;  %v173_v6 = vld [vmem:[#allocation6 + $0x220] sm:$0xff]  ;;  %v4765_v54 = vcombine.high %v177_v59, %v181_v56  ;;  %2130 = vperm.xlu0 %3963, %v2128_v1   ;;  %2385 = vperm.xlu1 %3964, %v2383_v15   ;;  %v164_v1 = vld [vmem:[#allocation6 + $0x1d8] sm:$0xff] }
  0x71   :  { %6605 = vst [vmem:[#allocation72_spill] sm:$0xff] %v4749_v2  ;;  %v168_v15 = vld [vmem:[#allocation6 + $0x1f8] sm:$0xff] }
  0x72   :  { %910 = vmatpush2.bf16.msra.mxu0 %v4725_v4  ;;  %951 = vmatpush2.bf16.msra.mxu1 %v4731_v17  ;;  %v4758_v17 = vcombine.low %v185_v32, %v189_v33  ;;  %6610 = vst [vmem:[#allocation77_spill] sm:$0xff] %v4765_v54  ;;  %v174_v4 = vld [vmem:[#allocation6 + $0x228] sm:$0xff]  ;;  %v4768_v32 = vcombine.high %v178_v39, %v182_v42  ;;  %v2893_v33 = vsel %vm2892_vm6, 1, %v4500_v26  ;;  %v4787_v26 = vld [vmem:[%s6262_s7] sm:$0xff] }
  0x73   :  { %911 = vmatprep.subr.bf16.mxu0 %v4733_v22  ;;  %952 = vmatprep.subr.bf16.mxu1 %v4740_v48  ;;  %v169_v22 = vld [vmem:[#allocation6 + $0x200] sm:$0xff]  ;;  %v4763_v48 = vcombine.low %v186_v49, %v190_v50  ;;  %v163_v49 = vld [vmem:[#allocation6 + $0x1d0] sm:$0xff]  ;;  %6616 = vst [vmem:[#allocation83_spill] sm:$0xff] %v4787_v26 }
  0x74   :  { %6608 = vst [vmem:[#allocation75_spill] sm:$0xff] %v4758_v17  ;;  %6611 = vst [vmem:[#allocation78_spill] sm:$0xff] %v4768_v32  ;;  %v167_v50 = vld [vmem:[#allocation6 + $0x1f0] sm:$0xff]  ;;  %2640 = vperm.xlu0 %3963, %v2638_v16   ;;  %2895 = vperm.xlu1 %3964, %v2893_v33   ;;  %v4799_v16 = vcombine.high %v164_v1, %v168_v15 }
  0x75   :  { %6609 = vst [vmem:[#allocation76_spill] sm:$0xff] %v4763_v48 }
  0x76   :  { %912 = vmatpush2.bf16.msra.mxu0 %v4744_v57  ;;  %953 = vmatpush2.bf16.msra.mxu1 %v4749_v2  ;;  %v4773_v2 = vcombine.low %v177_v59, %v181_v56  ;;  %v4782_v57 = vcombine.high %v170_v47, %v174_v4  ;;  %v4790_v56 = vcombine.low %v169_v22, %v173_v6  ;;  %v159_v59 = vld [vmem:[#allocation6 + $0x1b0] sm:$0xff] }
  0x77   :  { %913 = vmatprep.subr.bf16.mxu0 %v4751_v34  ;;  %954 = vmatprep.subr.bf16.mxu1 %v4754_v60  ;;  %v4777_v34 = vcombine.low %v178_v39, %v182_v42  ;;  %v4779_v60 = vcombine.high %v169_v22, %v173_v6  ;;  %v155_v42 = vld [vmem:[#allocation6 + $0x190] sm:$0xff]  ;;  %v4794_v39 = vcombine.low %v170_v47, %v174_v4 }
  0x78   :  { %6612 = vst [vmem:[#allocation79_spill] sm:$0xff] %v4773_v2  ;;  %6615 = vst [vmem:[#allocation82_spill] sm:$0xff] %v4782_v57  ;;  %v4803_v22 = vpack.c.bf16 %v4787_v26, %v4787_v26  ;;  %v4806_v6 = vcombine.low %v163_v49, %v167_v50  ;;  %v4810_v4 = vcombine.low %v164_v1, %v168_v15  ;;  %v148_v26 = vld [vmem:[#allocation6 + $0x158] sm:$0xff] }
  0x79   :  { %6613 = vst [vmem:[#allocation80_spill] sm:$0xff] %v4777_v34  ;;  %6614 = vst [vmem:[#allocation81_spill] sm:$0xff] %v4779_v60  ;;  %v4812_v47 = vcombine.high %v155_v42, %v159_v59 }
  0x7a   :  { %914 = vmatpush2.bf16.msra.mxu0 %v4758_v17  ;;  %955 = vmatpush2.bf16.msra.mxu1 %v4763_v48  ;;  %6617 = vst [vmem:[#allocation84_spill] sm:$0xff] %v4790_v56  ;;  %6618 = vst [vmem:[#allocation85_spill] sm:$0xff] %v4794_v39  ;;  %v160_v48 = vld [vmem:[#allocation6 + $0x1b8] sm:$0xff] }
  0x7b   :  { %915 = vmatprep.subr.bf16.mxu0 %v4765_v54  ;;  %956 = vmatprep.subr.bf16.mxu1 %v4768_v32  ;;  %v4796_v32 = vcombine.high %v163_v49, %v167_v50  ;;  %v156_v54 = vld [vmem:[#allocation6 + $0x198] sm:$0xff]  ;;  %6620 = vst [vmem:[#allocation87_spill] sm:$0xff] %v4799_v16  ;;  %6621 = vst [vmem:[#allocation88_spill] sm:$0xff] %v4806_v6  ;;  %v4820_v49 = vcombine.low %v155_v42, %v159_v59 }
  0x7c   :  { %6622 = vst [vmem:[#allocation89_spill] sm:$0xff] %v4810_v4  ;;  %6623 = vst [vmem:[#allocation90_spill] sm:$0xff] %v4812_v47  ;;  %v4815_v33 = vcombine.high %v156_v54, %v160_v48  ;;  %v4824_v50 = vcombine.low %v156_v54, %v160_v48 }
  0x7d   :  { %6619 = vst [vmem:[#allocation86_spill] sm:$0xff] %v4796_v32  ;;  %6625 = vst [vmem:[#allocation92_spill] sm:$0xff] %v4820_v49 }
  0x7e   :  { %916 = vmatpush2.bf16.msra.mxu0 %v4773_v2  ;;  %957 = vmatpush2.bf16.msra.mxu1 %v4777_v34  ;;  %6624 = vst [vmem:[#allocation91_spill] sm:$0xff] %v4815_v33  ;;  %6626 = vst [vmem:[#allocation93_spill] sm:$0xff] %v4824_v50 }
  0x7f   :  { %917 = vmatprep.subr.bf16.mxu0 %v4779_v60  ;;  %958 = vmatprep.subr.bf16.mxu1 %v4782_v57  ;;  %v147_v57 = vld [vmem:[#allocation6 + $0x150] sm:$0xff] }
  0x80   :  { %v151_v60 = vld [vmem:[#allocation6 + $0x170] sm:$0xff] }
  0x81   :  { %v4826_v1 = vcombine.high %v147_v57, %v151_v60  ;;  %v4834_v42 = vcombine.low %v147_v57, %v151_v60 }
  0x82   :  { %918 = vmatpush2.bf16.msra.mxu0 %v4790_v56  ;;  %959 = vmatpush2.bf16.msra.mxu1 %v4794_v39  ;;  %v152_v56 = vld [vmem:[#allocation6 + $0x178] sm:$0xff] }
  0x83   :  { %969 = vmatprep.subr.bf16.mxu0 %v4796_v32  ;;  %1010 = vmatprep.subr.bf16.mxu1 %v4799_v16  ;;  %6627 = vst [vmem:[#allocation94_spill] sm:$0xff] %v4826_v1  ;;  %v4829_v15 = vcombine.high %v148_v26, %v152_v56  ;;  %v139_v16 = vld [vmem:[#allocation6 + $0x110] sm:$0xff]  ;;  %v140_v39 = vld [vmem:[#allocation6 + $0x118] sm:$0xff]  ;;  %6629 = vst [vmem:[#allocation96_spill] sm:$0xff] %v4834_v42  ;;  %v4838_v48 = vcombine.low %v148_v26, %v152_v56 }
  0x84   :  { %v143_v32 = vld [vmem:[#allocation6 + $0x130] sm:$0xff] }
  0x85   :  { %920 = vmatmul.mubr.bf16.vlgmr.msra.gmra.mxu0 %v4803_v22  ;;  %961 = vmatmul.mubr.bf16.vlgmr.msra.gmra.mxu1 %v4803_v22  ;;  %6628 = vst [vmem:[#allocation95_spill] sm:$0xff] %v4829_v15  ;;  %6630 = vst [vmem:[#allocation97_spill] sm:$0xff] %v4838_v48  ;;  %v4840_v54 = vcombine.high %v139_v16, %v143_v32  ;;  %v4846_v57 = vcombine.low %v139_v16, %v143_v32 }
  0x86   :  { %970 = vmatpush1.bf16.msra.mxu0 %v4806_v6  ;;  %1011 = vmatpush1.bf16.msra.mxu1 %v4810_v4  ;;  %v144_v6 = vld [vmem:[#allocation6 + $0x138] sm:$0xff] }
  0x87   :  { %971 = vmatprep.subr.bf16.mxu0 %v4812_v47  ;;  %1012 = vmatprep.subr.bf16.mxu1 %v4815_v33  ;;  %6631 = vst [vmem:[#allocation98_spill] sm:$0xff] %v4840_v54  ;;  %v4843_v59 = vcombine.high %v140_v39, %v144_v6  ;;  %v131_v33 = vld [vmem:[#allocation6 + $0xd0] sm:$0xff]  ;;  %v132_v4 = vld [vmem:[#allocation6 + $0xd8] sm:$0xff]  ;;  %6633 = vst [vmem:[#allocation100_spill] sm:$0xff] %v4846_v57  ;;  %v4850_v60 = vcombine.low %v140_v39, %v144_v6 }
  0x88   :  { %1001 = vmatprep.mubr.bf16.mxu0 %v4661_v58  ;;  %1042 = vmatprep.mubr.bf16.mxu1 %v4661_v58  ;;  %v135_v47 = vld [vmem:[#allocation6 + $0xf0] sm:$0xff]  ;;  %v136_v58 = vld [vmem:[#allocation6 + $0xf8] sm:$0xff] }
  0x89   :  { %6632 = vst [vmem:[#allocation99_spill] sm:$0xff] %v4843_v59  ;;  %6634 = vst [vmem:[#allocation101_spill] sm:$0xff] %v4850_v60  ;;  %v4852_v26 = vcombine.high %v131_v33, %v135_v47  ;;  %v4855_v56 = vcombine.high %v132_v4, %v136_v58  ;;  %v4858_v32 = vcombine.low %v131_v33, %v135_v47 }
  0x8a   :  { %972 = vmatpush1.bf16.msra.mxu0 %v4820_v49  ;;  %1013 = vmatpush1.bf16.msra.mxu1 %v4824_v50  ;;  %v124_v50 = vld [vmem:[#allocation6 + $0x98] sm:$0xff]  ;;  %v4862_v39 = vcombine.low %v132_v4, %v136_v58 }
  0x8b   :  { %973 = vmatprep.subr.bf16.mxu0 %v4826_v1  ;;  %1014 = vmatprep.subr.bf16.mxu1 %v4829_v15  ;;  %6635 = vst [vmem:[#allocation102_spill] sm:$0xff] %v4852_v26  ;;  %6636 = vst [vmem:[#allocation103_spill] sm:$0xff] %v4855_v56  ;;  %v123_v15 = vld [vmem:[#allocation6 + $0x90] sm:$0xff]  ;;  %v128_v49 = vld [vmem:[#allocation6 + $0xb8] sm:$0xff] }
  0x8c   :  { %v127_v1 = vld [vmem:[#allocation6 + $0xb0] sm:$0xff]  ;;  %6637 = vst [vmem:[#allocation104_spill] sm:$0xff] %v4858_v32  ;;  %6638 = vst [vmem:[#allocation105_spill] sm:$0xff] %v4862_v39  ;;  %v4867_v6 = vcombine.high %v124_v50, %v128_v49  ;;  %v4874_v4 = vcombine.low %v124_v50, %v128_v49 }
  0x8d   :  { %v4864_v16 = vcombine.high %v123_v15, %v127_v1  ;;  %v4870_v47 = vcombine.low %v123_v15, %v127_v1 }
  0x8e   :  { %974 = vmatpush1.bf16.msra.mxu0 %v4834_v42  ;;  %1015 = vmatpush1.bf16.msra.mxu1 %v4838_v48  ;;  %6640 = vst [vmem:[#allocation107_spill] sm:$0xff] %v4867_v6  ;;  %v116_v48 = vld [vmem:[#allocation6 + $0x58] sm:$0xff]  ;;  %6642 = vst [vmem:[#allocation109_spill] sm:$0xff] %v4874_v4 }
  0x8f   :  { %975 = vmatprep.subr.bf16.mxu0 %v4840_v54  ;;  %1016 = vmatprep.subr.bf16.mxu1 %v4843_v59  ;;  %6639 = vst [vmem:[#allocation106_spill] sm:$0xff] %v4864_v16  ;;  %v115_v59 = vld [vmem:[#allocation6 + $0x50] sm:$0xff]  ;;  %v120_v42 = vld [vmem:[#allocation6 + $0x78] sm:$0xff]  ;;  %6641 = vst [vmem:[#allocation108_spill] sm:$0xff] %v4870_v47 }
  0x90   :  { %v119_v54 = vld [vmem:[#allocation6 + $0x70] sm:$0xff]  ;;  %v4879_v58 = vcombine.high %v116_v48, %v120_v42  ;;  %v4886_v49 = vcombine.low %v116_v48, %v120_v42 }
  0x91   :  { %v4876_v33 = vcombine.high %v115_v59, %v119_v54  ;;  %v4882_v1 = vcombine.low %v115_v59, %v119_v54 }
  0x92   :  { %976 = vmatpush1.bf16.msra.mxu0 %v4846_v57  ;;  %1017 = vmatpush1.bf16.msra.mxu1 %v4850_v60  ;;  %6644 = vst [vmem:[#allocation111_spill] sm:$0xff] %v4879_v58  ;;  %v108_v60 = vld [vmem:[#allocation6 + $0x18] sm:$0xff]  ;;  %6646 = vst [vmem:[#allocation113_spill] sm:$0xff] %v4886_v49 }
  0x93   :  { %977 = vmatprep.subr.bf16.mxu0 %v4852_v26  ;;  %1018 = vmatprep.subr.bf16.mxu1 %v4855_v56  ;;  %6643 = vst [vmem:[#allocation110_spill] sm:$0xff] %v4876_v33  ;;  %v107_v56 = vld [vmem:[#allocation6 + $0x10] sm:$0xff]  ;;  %v112_v57 = vld [vmem:[#allocation6 + $0x38] sm:$0xff]  ;;  %6645 = vst [vmem:[#allocation112_spill] sm:$0xff] %v4882_v1 }
  0x94   :  { %v111_v26 = vld [vmem:[#allocation6 + $0x30] sm:$0xff]  ;;  %v4891_v15 = vcombine.high %v108_v60, %v112_v57  ;;  %v4898_v42 = vcombine.low %v108_v60, %v112_v57 }
  0x95   :  { %v4888_v50 = vcombine.high %v107_v56, %v111_v26  ;;  %v4894_v54 = vcombine.low %v107_v56, %v111_v26 }
  0x96   :  { %978 = vmatpush1.bf16.msra.mxu0 %v4858_v32  ;;  %1019 = vmatpush1.bf16.msra.mxu1 %v4862_v39  ;;  %6648 = vst [vmem:[#allocation115_spill] sm:$0xff] %v4891_v15  ;;  %v228_v39 = vld [vmem:[#allocation6 + $0x3d8] sm:$0xff]  ;;  %6650 = vst [vmem:[#allocation117_spill] sm:$0xff] %v4898_v42 }
  0x97   :  { %979 = vmatprep.subr.bf16.mxu0 %v4864_v16  ;;  %1020 = vmatprep.subr.bf16.mxu1 %v4867_v6  ;;  %6647 = vst [vmem:[#allocation114_spill] sm:$0xff] %v4888_v50  ;;  %v227_v6 = vld [vmem:[#allocation6 + $0x3d0] sm:$0xff]  ;;  %v232_v32 = vld [vmem:[#allocation6 + $0x3f8] sm:$0xff]  ;;  %6649 = vst [vmem:[#allocation116_spill] sm:$0xff] %v4894_v54 }
  0x98   :  { %v231_v16 = vld [vmem:[#allocation6 + $0x3f0] sm:$0xff]  ;;  %v4903_v59 = vcombine.high %v228_v39, %v232_v32  ;;  %v4910_v57 = vcombine.low %v228_v39, %v232_v32 }
  0x99   :  { %v4900_v48 = vcombine.high %v227_v6, %v231_v16  ;;  %v4906_v26 = vcombine.low %v227_v6, %v231_v16 }
  0x9a   :  { %980 = vmatpush1.bf16.msra.mxu0 %v4870_v47  ;;  %1021 = vmatpush1.bf16.msra.mxu1 %v4874_v4  ;;  %6652 = vst [vmem:[#allocation119_spill] sm:$0xff] %v4903_v59  ;;  %v220_v4 = vld [vmem:[#allocation6 + $0x398] sm:$0xff]  ;;  %6654 = vst [vmem:[#allocation121_spill] sm:$0xff] %v4910_v57 }
  0x9b   :  { %981 = vmatprep.subr.bf16.mxu0 %v4876_v33  ;;  %1022 = vmatprep.subr.bf16.mxu1 %v4879_v58  ;;  %6651 = vst [vmem:[#allocation118_spill] sm:$0xff] %v4900_v48  ;;  %v219_v58 = vld [vmem:[#allocation6 + $0x390] sm:$0xff]  ;;  %v224_v47 = vld [vmem:[#allocation6 + $0x3b8] sm:$0xff]  ;;  %6653 = vst [vmem:[#allocation120_spill] sm:$0xff] %v4906_v26 }
  0x9c   :  { %v223_v33 = vld [vmem:[#allocation6 + $0x3b0] sm:$0xff]  ;;  %v4915_v56 = vcombine.high %v220_v4, %v224_v47  ;;  %v4922_v32 = vcombine.low %v220_v4, %v224_v47 }
  0x9d   :  { %v4912_v60 = vcombine.high %v219_v58, %v223_v33  ;;  %v4918_v16 = vcombine.low %v219_v58, %v223_v33 }
  0x9e   :  { %982 = vmatpush1.bf16.msra.mxu0 %v4882_v1  ;;  %1023 = vmatpush1.bf16.msra.mxu1 %v4886_v49  ;;  %6656 = vst [vmem:[#allocation123_spill] sm:$0xff] %v4915_v56  ;;  %v212_v49 = vld [vmem:[#allocation6 + $0x358] sm:$0xff]  ;;  %6658 = vst [vmem:[#allocation125_spill] sm:$0xff] %v4922_v32 }
  0x9f   :  { %983 = vmatprep.subr.bf16.mxu0 %v4888_v50  ;;  %1024 = vmatprep.subr.bf16.mxu1 %v4891_v15  ;;  %6655 = vst [vmem:[#allocation122_spill] sm:$0xff] %v4912_v60  ;;  %v211_v15 = vld [vmem:[#allocation6 + $0x350] sm:$0xff]  ;;  %v216_v1 = vld [vmem:[#allocation6 + $0x378] sm:$0xff]  ;;  %6657 = vst [vmem:[#allocation124_spill] sm:$0xff] %v4918_v16 }
  0xa0   :  { %v215_v50 = vld [vmem:[#allocation6 + $0x370] sm:$0xff]  ;;  %v4927_v6 = vcombine.high %v212_v49, %v216_v1  ;;  %v4934_v47 = vcombine.low %v212_v49, %v216_v1 }
  0xa1   :  { %v4924_v39 = vcombine.high %v211_v15, %v215_v50  ;;  %v4930_v33 = vcombine.low %v211_v15, %v215_v50 }
  0xa2   :  { %984 = vmatpush1.bf16.msra.mxu0 %v4894_v54  ;;  %1025 = vmatpush1.bf16.msra.mxu1 %v4898_v42  ;;  %6660 = vst [vmem:[#allocation127_spill] sm:$0xff] %v4927_v6  ;;  %v204_v42 = vld [vmem:[#allocation6 + $0x318] sm:$0xff]  ;;  %6662 = vst [vmem:[#allocation129_spill] sm:$0xff] %v4934_v47 }
  0xa3   :  { %985 = vmatprep.subr.bf16.mxu0 %v4900_v48  ;;  %1026 = vmatprep.subr.bf16.mxu1 %v4903_v59  ;;  %6659 = vst [vmem:[#allocation126_spill] sm:$0xff] %v4924_v39  ;;  %v203_v59 = vld [vmem:[#allocation6 + $0x310] sm:$0xff]  ;;  %v208_v54 = vld [vmem:[#allocation6 + $0x338] sm:$0xff]  ;;  %6661 = vst [vmem:[#allocation128_spill] sm:$0xff] %v4930_v33 }
  0xa4   :  { %v207_v48 = vld [vmem:[#allocation6 + $0x330] sm:$0xff]  ;;  %v4939_v58 = vcombine.high %v204_v42, %v208_v54  ;;  %v4946_v1 = vcombine.low %v204_v42, %v208_v54 }
  0xa5   :  { %v4936_v4 = vcombine.high %v203_v59, %v207_v48  ;;  %v4942_v50 = vcombine.low %v203_v59, %v207_v48 }
  0xa6   :  { %986 = vmatpush2.bf16.msra.mxu0 %v4906_v26  ;;  %1027 = vmatpush2.bf16.msra.mxu1 %v4910_v57  ;;  %6664 = vst [vmem:[#allocation131_spill] sm:$0xff] %v4939_v58  ;;  %v196_v57 = vld [vmem:[#allocation6 + $0x2d8] sm:$0xff]  ;;  %6666 = vst [vmem:[#allocation133_spill] sm:$0xff] %v4946_v1 }
  0xa7   :  { %987 = vmatprep.subr.bf16.mxu0 %v4912_v60  ;;  %1028 = vmatprep.subr.bf16.mxu1 %v4915_v56  ;;  %6663 = vst [vmem:[#allocation130_spill] sm:$0xff] %v4936_v4  ;;  %v195_v56 = vld [vmem:[#allocation6 + $0x2d0] sm:$0xff]  ;;  %v200_v26 = vld [vmem:[#allocation6 + $0x2f8] sm:$0xff]  ;;  %6665 = vst [vmem:[#allocation132_spill] sm:$0xff] %v4942_v50 }
  0xa8   :  { %v199_v60 = vld [vmem:[#allocation6 + $0x2f0] sm:$0xff]  ;;  %v4951_v15 = vcombine.high %v196_v57, %v200_v26  ;;  %v4958_v54 = vcombine.low %v196_v57, %v200_v26 }
  0xa9   :  { %v4948_v49 = vcombine.high %v195_v56, %v199_v60  ;;  %v4954_v48 = vcombine.low %v195_v56, %v199_v60 }
  0xaa   :  { %988 = vmatpush2.bf16.msra.mxu0 %v4918_v16  ;;  %1029 = vmatpush2.bf16.msra.mxu1 %v4922_v32  ;;  %6668 = vst [vmem:[#allocation135_spill] sm:$0xff] %v4951_v15  ;;  %v188_v32 = vld [vmem:[#allocation6 + $0x298] sm:$0xff]  ;;  %6670 = vst [vmem:[#allocation137_spill] sm:$0xff] %v4958_v54 }
  0xab   :  { %989 = vmatprep.subr.bf16.mxu0 %v4924_v39  ;;  %1030 = vmatprep.subr.bf16.mxu1 %v4927_v6  ;;  %6667 = vst [vmem:[#allocation134_spill] sm:$0xff] %v4948_v49  ;;  %v187_v6 = vld [vmem:[#allocation6 + $0x290] sm:$0xff]  ;;  %v192_v16 = vld [vmem:[#allocation6 + $0x2b8] sm:$0xff]  ;;  %6669 = vst [vmem:[#allocation136_spill] sm:$0xff] %v4954_v48 }
  0xac   :  { %v191_v39 = vld [vmem:[#allocation6 + $0x2b0] sm:$0xff]  ;;  %v4963_v59 = vcombine.high %v188_v32, %v192_v16  ;;  %v4970_v26 = vcombine.low %v188_v32, %v192_v16 }
  0xad   :  { %v4960_v42 = vcombine.high %v187_v6, %v191_v39  ;;  %v4966_v60 = vcombine.low %v187_v6, %v191_v39 }
  0xae   :  { %990 = vmatpush2.bf16.msra.mxu0 %v4930_v33  ;;  %1031 = vmatpush2.bf16.msra.mxu1 %v4934_v47  ;;  %6672 = vst [vmem:[#allocation139_spill] sm:$0xff] %v4963_v59  ;;  %v180_v47 = vld [vmem:[#allocation6 + $0x258] sm:$0xff]  ;;  %6674 = vst [vmem:[#allocation141_spill] sm:$0xff] %v4970_v26 }
  0xaf   :  { %991 = vmatprep.subr.bf16.mxu0 %v4936_v4  ;;  %1032 = vmatprep.subr.bf16.mxu1 %v4939_v58  ;;  %6671 = vst [vmem:[#allocation138_spill] sm:$0xff] %v4960_v42  ;;  %v179_v58 = vld [vmem:[#allocation6 + $0x250] sm:$0xff]  ;;  %v184_v33 = vld [vmem:[#allocation6 + $0x278] sm:$0xff]  ;;  %6673 = vst [vmem:[#allocation140_spill] sm:$0xff] %v4966_v60 }
  0xb0   :  { %v183_v4 = vld [vmem:[#allocation6 + $0x270] sm:$0xff]  ;;  %v4975_v56 = vcombine.high %v180_v47, %v184_v33  ;;  %v4982_v16 = vcombine.low %v180_v47, %v184_v33  ;;  %v6684_v33 = vld [vmem:[#allocation62_spill] sm:$0xff]  ;;  %v6685_v47 = vld [vmem:[#allocation63_spill] sm:$0xff] }
  0xb1   :  { %v4972_v57 = vcombine.high %v179_v58, %v183_v4  ;;  %v4978_v39 = vcombine.low %v179_v58, %v183_v4  ;;  %v6686_v58 = vld [vmem:[#allocation64_spill] sm:$0xff] }
  0xb2   :  { %992 = vmatpush2.bf16.msra.mxu0 %v4942_v50  ;;  %1033 = vmatpush2.bf16.msra.mxu1 %v4946_v1  ;;  %6676 = vst [vmem:[#allocation143_spill] sm:$0xff] %v4975_v56  ;;  %v172_v1 = vld [vmem:[#allocation6 + $0x218] sm:$0xff]  ;;  %6678 = vst [vmem:[#allocation145_spill] sm:$0xff] %v4982_v16 }
  0xb3   :  { %993 = vmatprep.subr.bf16.mxu0 %v4948_v49  ;;  %1034 = vmatprep.subr.bf16.mxu1 %v4951_v15  ;;  %6675 = vst [vmem:[#allocation142_spill] sm:$0xff] %v4972_v57  ;;  %v171_v15 = vld [vmem:[#allocation6 + $0x210] sm:$0xff]  ;;  %v176_v50 = vld [vmem:[#allocation6 + $0x238] sm:$0xff]  ;;  %6677 = vst [vmem:[#allocation144_spill] sm:$0xff] %v4978_v39 }
  0xb4   :  { %v175_v49 = vld [vmem:[#allocation6 + $0x230] sm:$0xff]  ;;  %v4987_v6 = vcombine.high %v172_v1, %v176_v50  ;;  %v4994_v4 = vcombine.low %v172_v1, %v176_v50  ;;  %v6688_v1 = vld [vmem:[#allocation66_spill] sm:$0xff] }
  0xb5   :  { %v4984_v32 = vcombine.high %v171_v15, %v175_v49  ;;  %v6687_v50 = vld [vmem:[#allocation65_spill] sm:$0xff] }
  0xb6   :  { %994 = vmatpush2.bf16.msra.mxu0 %v4954_v48  ;;  %1035 = vmatpush2.bf16.msra.mxu1 %v4958_v54  ;;  %6680 = vst [vmem:[#allocation147_spill] sm:$0xff] %v4987_v6  ;;  %6682 = vst [vmem:[#allocation149_spill] sm:$0xff] %v4994_v4 }
  0xb7   :  { %995 = vmatprep.subr.bf16.mxu0 %v4960_v42  ;;  %1036 = vmatprep.subr.bf16.mxu1 %v4963_v59  ;;  %6679 = vst [vmem:[#allocation146_spill] sm:$0xff] %v4984_v32  ;;  %v4990_v59 = vcombine.low %v171_v15, %v175_v49  ;;  %v6689_v49 = vld [vmem:[#allocation67_spill] sm:$0xff]  ;;  %v6690_v15 = vld [vmem:[#allocation68_spill] sm:$0xff] }
  0xb9   :  { %6681 = vst [vmem:[#allocation148_spill] sm:$0xff] %v4990_v59 }
  0xba   :  { %996 = vmatpush2.bf16.msra.mxu0 %v4966_v60  ;;  %1037 = vmatpush2.bf16.msra.mxu1 %v4970_v26 }
  0xbb   :  { %997 = vmatprep.subr.bf16.mxu0 %v4972_v57  ;;  %1038 = vmatprep.subr.bf16.mxu1 %v4975_v56 }
  0xbe   :  { %998 = vmatpush2.bf16.msra.mxu0 %v4978_v39  ;;  %1039 = vmatpush2.bf16.msra.mxu1 %v4982_v16 }
  0xbf   :  { %999 = vmatprep.subr.bf16.mxu0 %v4984_v32  ;;  %1040 = vmatprep.subr.bf16.mxu1 %v4987_v6 }
  0xc2   :  { %1000 = vmatpush2.bf16.msra.mxu0 %v4990_v59  ;;  %1041 = vmatpush2.bf16.msra.mxu1 %v4994_v4 }
  0xc3   :  { %1142 = vmatprep.subr.bf16.mxu0 %v4582_v3  ;;  %1183 = vmatprep.subr.bf16.mxu1 %v4586_v8 }
  0xc5   :  { %1002 = vmatmul.mubr.bf16.vlgmr.msra.gmra.mxu0 %v4803_v22  ;;  %1043 = vmatmul.mubr.bf16.vlgmr.msra.gmra.mxu1 %v4803_v22  ;;  %v6683_v22 = vld [vmem:[#allocation61_spill] sm:$0xff] }
  0xc6   :  { %1143 = vmatpush1.bf16.msra.mxu0 %v4584_v5  ;;  %1184 = vmatpush1.bf16.msra.mxu1 %v4588_v9 }
  0xc7   :  { %1144 = vmatprep.subr.bf16.mxu0 %v4590_v10  ;;  %1185 = vmatprep.subr.bf16.mxu1 %v4593_v14 }
  0xca   :  { %1145 = vmatpush1.bf16.msra.mxu0 %v4597_v18  ;;  %1186 = vmatpush1.bf16.msra.mxu1 %v4601_v19 }
  0xcb   :  { %1146 = vmatprep.subr.bf16.mxu0 %v4603_v20  ;;  %1187 = vmatprep.subr.bf16.mxu1 %v4606_v21 }
  0xce   :  { %1147 = vmatpush1.bf16.msra.mxu0 %v4611_v27  ;;  %1188 = vmatpush1.bf16.msra.mxu1 %v4615_v28 }
  0xcf   :  { %1148 = vmatprep.subr.bf16.mxu0 %v4617_v29  ;;  %1189 = vmatprep.subr.bf16.mxu1 %v4620_v30 }
  0xd2   :  { %1149 = vmatpush1.bf16.msra.mxu0 %v4623_v35  ;;  %1190 = vmatpush1.bf16.msra.mxu1 %v4627_v36 }
  0xd3   :  { %1150 = vmatprep.subr.bf16.mxu0 %v4629_v37  ;;  %1191 = vmatprep.subr.bf16.mxu1 %v4632_v38 }
  0xd6   :  { %1151 = vmatpush1.bf16.msra.mxu0 %v4635_v43  ;;  %1192 = vmatpush1.bf16.msra.mxu1 %v4639_v44 }
  0xd7   :  { %1152 = vmatprep.subr.bf16.mxu0 %v4641_v45  ;;  %1193 = vmatprep.subr.bf16.mxu1 %v4644_v46 }
  0xda   :  { %1153 = vmatpush1.bf16.msra.mxu0 %v4647_v51  ;;  %1194 = vmatpush1.bf16.msra.mxu1 %v4651_v52 }
  0xdb   :  { %1154 = vmatprep.subr.bf16.mxu0 %v4653_v53  ;;  %1195 = vmatprep.subr.bf16.mxu1 %v4659_v55 }
  0xde   :  { %1155 = vmatpush1.bf16.msra.mxu0 %v4664_v61  ;;  %1196 = vmatpush1.bf16.msra.mxu1 %v4669_v62 }
  0xdf   :  { %1156 = vmatprep.subr.bf16.mxu0 %v4671_v63  ;;  %1197 = vmatprep.subr.bf16.mxu1 %v4674_v0 }
  0xe2   :  { %1157 = vmatpush1.bf16.msra.mxu0 %v4678_v7  ;;  %1198 = vmatpush1.bf16.msra.mxu1 %v4682_v11 }
  0xe3   :  { %1158 = vmatprep.subr.bf16.mxu0 %v4684_v12  ;;  %1199 = vmatprep.subr.bf16.mxu1 %v4687_v13 }
  0xe6   :  { %1159 = vmatpush2.bf16.msra.mxu0 %v4690_v23  ;;  %1200 = vmatpush2.bf16.msra.mxu1 %v4694_v24  ;;  %v240_v24 = vld [vmem:[#allocation3 + $0x18] sm:$0xff] }
  0xe7   :  { %1160 = vmatprep.subr.bf16.mxu0 %v4696_v25  ;;  %1201 = vmatprep.subr.bf16.mxu1 %v4699_v31  ;;  %v6691_v31 = vld [vmem:[#allocation69_spill] sm:$0xff]  ;;  %v237_v25 = vld [vmem:[#allocation3] sm:$0xff] }
  0xea   :  { %1161 = vmatpush2.bf16.msra.mxu0 %v4702_v40  ;;  %1202 = vmatpush2.bf16.msra.mxu1 %v4706_v41  ;;  %v6692_v40 = vld [vmem:[#allocation70_spill] sm:$0xff]  ;;  %v6693_v41 = vld [vmem:[#allocation71_spill] sm:$0xff] }
  0xeb   :  { %1162 = vmatprep.subr.bf16.mxu0 %v6683_v22  ;;  %1203 = vmatprep.subr.bf16.mxu1 %v6684_v33  ;;  %v6694_v22 = vld [vmem:[#allocation72_spill] sm:$0xff]  ;;  %v6695_v33 = vld [vmem:[#allocation73_spill] sm:$0xff] }
  0xee   :  { %1163 = vmatpush2.bf16.msra.mxu0 %v6685_v47  ;;  %1204 = vmatpush2.bf16.msra.mxu1 %v6686_v58  ;;  %v6696_v47 = vld [vmem:[#allocation74_spill] sm:$0xff] }
  0xef   :  { %1164 = vmatprep.subr.bf16.mxu0 %v6687_v50  ;;  %1205 = vmatprep.subr.bf16.mxu1 %v6688_v1  ;;  %v6697_v50 = vld [vmem:[#allocation76_spill] sm:$0xff]  ;;  %v6698_v1 = vld [vmem:[#allocation77_spill] sm:$0xff] }
  0xf2   :  { %1165 = vmatpush2.bf16.msra.mxu0 %v6689_v49  ;;  %1206 = vmatpush2.bf16.msra.mxu1 %v6690_v15  ;;  %v6699_v49 = vld [vmem:[#allocation78_spill] sm:$0xff] }
  0xf3   :  { %1166 = vmatprep.subr.bf16.mxu0 %v6691_v31  ;;  %1207 = vmatprep.subr.bf16.mxu1 %v6692_v40  ;;  %v6700_v40 = vld [vmem:[#allocation81_spill] sm:$0xff] }
  0xf6   :  { %1167 = vmatpush2.bf16.msra.mxu0 %v6693_v41  ;;  %1208 = vmatpush2.bf16.msra.mxu1 %v6694_v22  ;;  %v6701_v41 = vld [vmem:[#allocation82_spill] sm:$0xff]  ;;  %v6702_v22 = vld [vmem:[#allocation84_spill] sm:$0xff] }
  0xf7   :  { %1168 = vmatprep.subr.bf16.mxu0 %v6695_v33  ;;  %1209 = vmatprep.subr.bf16.mxu1 %v6696_v47  ;;  %v6703_v33 = vld [vmem:[#allocation85_spill] sm:$0xff]  ;;  %v6704_v47 = vld [vmem:[#allocation86_spill] sm:$0xff] }
  0xfa   :  { %1169 = vmatpush2.bf16.msra.mxu0 %v4758_v17  ;;  %1210 = vmatpush2.bf16.msra.mxu1 %v6697_v50  ;;  %v6705_v17 = vld [vmem:[#allocation87_spill] sm:$0xff] }
  0xfb   :  { %1170 = vmatprep.subr.bf16.mxu0 %v6698_v1  ;;  %1211 = vmatprep.subr.bf16.mxu1 %v6699_v49 }
  0xfe   :  { %1171 = vmatpush2.bf16.msra.mxu0 %v4773_v2  ;;  %1212 = vmatpush2.bf16.msra.mxu1 %v4777_v34 }
  0xff   :  { %1172 = vmatprep.subr.bf16.mxu0 %v6700_v40  ;;  %1213 = vmatprep.subr.bf16.mxu1 %v6701_v41  ;;  %v239_v40 = vld [vmem:[#allocation3 + $0x10] sm:$0xff] }
 0x102   :  { %1173 = vmatpush2.bf16.msra.mxu0 %v6702_v22  ;;  %1214 = vmatpush2.bf16.msra.mxu1 %v6703_v33  ;;  %v238_v22 = vld [vmem:[#allocation3 + $0x8] sm:$0xff] }
 0x103   :  { %1224 = vmatprep.subr.bf16.mxu0 %v6704_v47  ;;  %1265 = vmatprep.subr.bf16.mxu1 %v6705_v17 }
 0x145   :  { %v921_v50 = vpop.f32.mrf.mxu0  ;;  %v962_v1 = vpop.f32.mrf.mxu1 }
 0x146   :  { %v1051_v41 = vadd.f32 %v921_v50, %v237_v25  ;;  %v1053_v23 = vadd.f32 %v962_v1, %v239_v40  ;;  %v241_v25 = vld [vmem:[#allocation3 + $0x20] sm:$0xff]  ;;  %v243_v40 = vld [vmem:[#allocation3 + $0x30] sm:$0xff] }
 0x147   :  { %v923_v31 = vpop.f32.mrf.mxu0  ;;  %v964_v49 = vpop.f32.mrf.mxu1 }
 0x148   :  { %v1054_v13 = vadd.f32 %v964_v49, %v240_v24  ;;  %v3754_v33 = vmul.f32 -1.442695, %v1051_v41  ;;  %v1052_v12 = vadd.f32 %v923_v31, %v238_v22  ;;  %v3756_v47 = vmul.f32 -1.442695, %v1053_v23  ;;  %v242_v31 = vld [vmem:[#allocation3 + $0x28] sm:$0xff] }
 0x149   :  { %v925_v15 = vpop.f32.mrf.mxu0  ;;  %v966_v2 = vpop.f32.mrf.mxu1 }
 0x14a   :  { %v3757_v11 = vmul.f32 -1.442695, %v1054_v13  ;;  %4029 = vpow2.f32 %v3754_v33  ;;  %v3755_v17 = vmul.f32 -1.442695, %v1052_v12  ;;  %v244_v12 = vld [vmem:[#allocation3 + $0x38] sm:$0xff] }
 0x14b   :  { %v926_v58 = vpop.f32.mrf.mxu0  ;;  %v967_v34 = vpop.f32.mrf.mxu1  ;;  %4031 = vpow2.f32 %v3756_v47 }
 0x14c   :  { %4033 = vpow2.f32 %v3757_v11 }
 0x14d   :  { %4035 = vpow2.f32 %v3755_v17 }
 0x157   :  { %v4030_v15 = vpop.eup %4029 }
 0x158   :  { %v4032_v2 = vpop.eup %4031  ;;  %v1065_v34 = vadd.f32 1.0, %v4030_v15 }
 0x159   :  { %v4034_v58 = vpop.eup %4033  ;;  %v1077_v0 = vadd.f32 1.0, %v4032_v2 }
 0x15a   :  { %v4036_v7 = vpop.eup %4035  ;;  %v1078_v63 = vadd.f32 1.0, %v4034_v58  ;;  %4037 = vrcp.f32 %v1065_v34  ;;  %v235_v34 = vld [vmem:[#allocation11] sm:$0xff] }
 0x15b   :  { %v1066_v24 = vadd.f32 1.0, %v4036_v7  ;;  %4039 = vrcp.f32 %v1077_v0 }
 0x15c   :  { %4041 = vrcp.f32 %v1078_v63 }
 0x167   :  { %v4038_v0 = vpop.eup %4037 }
 0x168   :  { %v4040_v58 = vpop.eup %4039 }
 0x169   :  { %v4042_v63 = vpop.eup %4041 }
 0x185   :  { %v1003_v41 = vpop.f32.mrf.mxu0  ;;  %v1044_v23 = vpop.f32.mrf.mxu1 }
 0x186   :  { %v1055_v13 = vadd.f32 %v1003_v41, %v241_v25  ;;  %v1057_v11 = vadd.f32 %v1044_v23, %v243_v40  ;;  %v5067_v25 = vpop.permute.xlu0 %1110  ;;  %v236_v41 = vld [vmem:[#allocation11 + $0x8] sm:$0xff] }
 0x187   :  { %v1005_v17 = vpop.f32.mrf.mxu0  ;;  %v1046_v33 = vpop.f32.mrf.mxu1  ;;  %6706 = vst [vmem:[#allocation150_spill] sm:$0xff] %v5067_v25  ;;  %vm1112_vm8 = vcmp.eq.s32.totalorder %v5067_v25, 1  ;;  %v6726_v25 = vld [vmem:[#allocation104_spill] sm:$0xff] }
 0x188   :  { %4043 = vtanh.f32 %v1055_v13  ;;  %v1056_v22 = vadd.f32 %v1005_v17, %v242_v31  ;;  %v3758_v47 = vmul.f32 -1.442695, %v1057_v11  ;;  %v1058_v50 = vadd.f32 %v1046_v33, %v244_v12 }
 0x189   :  { %4045 = vrcp.f32 %v1066_v24  ;;  %v1007_v1 = vpop.f32.mrf.mxu0  ;;  %v1048_v49 = vpop.f32.mrf.mxu1  ;;  %v1097_v24 = vmul.f32 %v4040_v58, %v235_v34  ;;  %v1098_v11 = vmul.f32 %v4042_v63, %v236_v41 }
 0x18a   :  { %4047 = vtanh.f32 %v1056_v22  ;;  %v3759_v7 = vmul.f32 -1.442695, %v1058_v50 }
 0x18b   :  { %4049 = vpow2.f32 %v3758_v47  ;;  %v1008_v15 = vpop.f32.mrf.mxu0  ;;  %v1049_v2 = vpop.f32.mrf.mxu1 }
 0x18c   :  { %4051 = vpow2.f32 %v3759_v7 }
 0x195   :  { %v4044_v40 = vpop.eup %4043 }
 0x196   :  { %v4046_v31 = vpop.eup %4045  ;;  %v1099_v13 = vmul.f32 %v4044_v40, %v4038_v0 }
 0x197   :  { %v4048_v23 = vpop.eup %4047 }
 0x198   :  { %v4050_v12 = vpop.eup %4049  ;;  %v1100_v17 = vmul.f32 %v4048_v23, %v4046_v31  ;;  %v1101_v22 = vadd.f32 %v1099_v13, %v1097_v24  ;;  %v6709_v31 = vld [vmem:[#allocation83_spill] sm:$0xff] }
 0x199   :  { %v1091_v33 = vadd.f32 1.0, %v4050_v12  ;;  %v4052_v47 = vpop.eup %4051  ;;  %v6710_v12 = vld [vmem:[#allocation88_spill] sm:$0xff] }
 0x19a   :  { %v1102_v50 = vadd.f32 %v1100_v17, %v1098_v11  ;;  %4053 = vtanh.f32 %v1101_v22  ;;  %v5072_v1 = vsel %vm1112_vm8, %v1101_v22, %v235_v34  ;;  %v1092_v49 = vadd.f32 1.0, %v4052_v47  ;;  %v6711_v11 = vld [vmem:[#allocation89_spill] sm:$0xff]  ;;  %v6712_v17 = vld [vmem:[#allocation90_spill] sm:$0xff]  ;;  %v6713_v22 = vld [vmem:[#allocation91_spill] sm:$0xff] }
 0x19b   :  { %4055 = vrcp.f32 %v1091_v33  ;;  %v6714_v33 = vld [vmem:[#allocation92_spill] sm:$0xff]  ;;  %v6715_v47 = vld [vmem:[#allocation93_spill] sm:$0xff] }
 0x19c   :  { %4057 = vtanh.f32 %v1102_v50  ;;  %v5076_v7 = vsel %vm1112_vm8, %v1102_v50, %v236_v41  ;;  %v4317_v41 = vld [vmem:[%s6262_s7 + $0x8] sm:$0xff]  ;;  %v6716_v50 = vld [vmem:[#allocation94_spill] sm:$0xff] }
 0x19d   :  { %4059 = vrcp.f32 %v1092_v49  ;;  %v6717_v49 = vld [vmem:[#allocation95_spill] sm:$0xff] }
 0x1a7   :  { %v4054_v15 = vpop.eup %4053 }
 0x1a8   :  { %v4056_v2 = vpop.eup %4055 }
 0x1a9   :  { %v4058_v0 = vpop.eup %4057  ;;  %v5078_v58 = vmul.f32 %v4056_v2, %v4054_v15  ;;  %v6718_v15 = vld [vmem:[#allocation96_spill] sm:$0xff]  ;;  %v6719_v2 = vld [vmem:[#allocation97_spill] sm:$0xff] }
 0x1aa   :  { %v4060_v63 = vpop.eup %4059 }
 0x1ab   :  { %6707 = vst [vmem:[#allocation151_spill] sm:$0xff] %v5078_v58  ;;  %v5080_v40 = vmul.f32 %v4060_v63, %v4058_v0  ;;  %v5086_v34 = vsel %vm1112_vm8, %v5078_v58, %v6709_v31  ;;  %v6720_v0 = vld [vmem:[#allocation98_spill] sm:$0xff]  ;;  %v6721_v63 = vld [vmem:[#allocation99_spill] sm:$0xff]  ;;  %v6722_v31 = vld [vmem:[#allocation100_spill] sm:$0xff] }
 0x1ac   :  { %v5100_v23 = vpack.c.bf16 %v5086_v34, %v5086_v34  ;;  %v6725_v58 = vld [vmem:[#allocation103_spill] sm:$0xff] }
 0x1ad   :  { %6708 = vst [vmem:[#allocation152_spill] sm:$0xff] %v5080_v40  ;;  %v5094_v24 = vsel %vm1112_vm8, %v5080_v40, %v4317_v41  ;;  %v6723_v41 = vld [vmem:[#allocation101_spill] sm:$0xff] }
 0x1ae   :  { %v1141_v13 = vpack.c.bf16 %v5094_v24, %v5094_v24  ;;  %v6727_v40 = vld [vmem:[#allocation105_spill] sm:$0xff] }
 0x1b0   :  { %1174 = vmatprep.mubr.bf16.mxu0 %v1141_v13  ;;  %1215 = vmatprep.mubr.bf16.mxu1 %v1141_v13 }
 0x1b1   :  { %1175 = vmatmul.mubr.bf16.vlgmr.msra.gmra.mxu0 %v5100_v23  ;;  %1216 = vmatmul.mubr.bf16.vlgmr.msra.gmra.mxu1 %v5100_v23 }
 0x1b2   :  { %1225 = vmatpush1.bf16.msra.mxu0 %v6710_v12  ;;  %1266 = vmatpush1.bf16.msra.mxu1 %v6711_v11 }
 0x1b3   :  { %1256 = vmatprep.mubr.bf16.mxu0 %v1141_v13  ;;  %1297 = vmatprep.mubr.bf16.mxu1 %v1141_v13  ;;  %v6724_v13 = vld [vmem:[#allocation102_spill] sm:$0xff] }
 0x1b4   :  { %1226 = vmatprep.subr.bf16.mxu0 %v6712_v17  ;;  %1267 = vmatprep.subr.bf16.mxu1 %v6713_v22 }
 0x1b6   :  { %1227 = vmatpush1.bf16.msra.mxu0 %v6714_v33  ;;  %1268 = vmatpush1.bf16.msra.mxu1 %v6715_v47 }
 0x1b7   :  { %1228 = vmatprep.subr.bf16.mxu0 %v6716_v50  ;;  %1269 = vmatprep.subr.bf16.mxu1 %v6717_v49  ;;  %v6728_v49 = vld [vmem:[#allocation106_spill] sm:$0xff] }
 0x1ba   :  { %1229 = vmatpush1.bf16.msra.mxu0 %v6718_v15  ;;  %1270 = vmatpush1.bf16.msra.mxu1 %v6719_v2  ;;  %v6729_v15 = vld [vmem:[#allocation107_spill] sm:$0xff]  ;;  %v6730_v2 = vld [vmem:[#allocation108_spill] sm:$0xff] }
 0x1bb   :  { %1230 = vmatprep.subr.bf16.mxu0 %v6720_v0  ;;  %1271 = vmatprep.subr.bf16.mxu1 %v6721_v63  ;;  %v6731_v0 = vld [vmem:[#allocation109_spill] sm:$0xff]  ;;  %v6732_v63 = vld [vmem:[#allocation110_spill] sm:$0xff] }
 0x1be   :  { %1231 = vmatpush1.bf16.msra.mxu0 %v6722_v31  ;;  %1272 = vmatpush1.bf16.msra.mxu1 %v6723_v41  ;;  %v6733_v31 = vld [vmem:[#allocation111_spill] sm:$0xff]  ;;  %v6734_v41 = vld [vmem:[#allocation112_spill] sm:$0xff] }
 0x1bf   :  { %1232 = vmatprep.subr.bf16.mxu0 %v6724_v13  ;;  %1273 = vmatprep.subr.bf16.mxu1 %v6725_v58  ;;  %v6735_v13 = vld [vmem:[#allocation113_spill] sm:$0xff]  ;;  %v6736_v58 = vld [vmem:[#allocation114_spill] sm:$0xff] }
 0x1c2   :  { %1233 = vmatpush1.bf16.msra.mxu0 %v6726_v25  ;;  %1274 = vmatpush1.bf16.msra.mxu1 %v6727_v40  ;;  %v6737_v25 = vld [vmem:[#allocation115_spill] sm:$0xff]  ;;  %v6738_v40 = vld [vmem:[#allocation116_spill] sm:$0xff] }
 0x1c3   :  { %1234 = vmatprep.subr.bf16.mxu0 %v6728_v49  ;;  %1275 = vmatprep.subr.bf16.mxu1 %v6729_v15  ;;  %v6739_v49 = vld [vmem:[#allocation117_spill] sm:$0xff]  ;;  %v6740_v15 = vld [vmem:[#allocation118_spill] sm:$0xff] }
 0x1c6   :  { %1235 = vmatpush1.bf16.msra.mxu0 %v6730_v2  ;;  %1276 = vmatpush1.bf16.msra.mxu1 %v6731_v0  ;;  %v6741_v2 = vld [vmem:[#allocation119_spill] sm:$0xff]  ;;  %v6742_v0 = vld [vmem:[#allocation120_spill] sm:$0xff] }
 0x1c7   :  { %1236 = vmatprep.subr.bf16.mxu0 %v6732_v63  ;;  %1277 = vmatprep.subr.bf16.mxu1 %v6733_v31  ;;  %v6743_v63 = vld [vmem:[#allocation121_spill] sm:$0xff]  ;;  %v6744_v31 = vld [vmem:[#allocation122_spill] sm:$0xff] }
 0x1ca   :  { %1237 = vmatpush1.bf16.msra.mxu0 %v6734_v41  ;;  %1278 = vmatpush1.bf16.msra.mxu1 %v6735_v13  ;;  %v6745_v41 = vld [vmem:[#allocation123_spill] sm:$0xff]  ;;  %v6746_v13 = vld [vmem:[#allocation124_spill] sm:$0xff] }
 0x1cb   :  { %1238 = vmatprep.subr.bf16.mxu0 %v6736_v58  ;;  %1279 = vmatprep.subr.bf16.mxu1 %v6737_v25  ;;  %v6747_v58 = vld [vmem:[#allocation125_spill] sm:$0xff]  ;;  %v6748_v25 = vld [vmem:[#allocation126_spill] sm:$0xff] }
 0x1ce   :  { %1239 = vmatpush1.bf16.msra.mxu0 %v6738_v40  ;;  %1280 = vmatpush1.bf16.msra.mxu1 %v6739_v49  ;;  %v6749_v40 = vld [vmem:[#allocation127_spill] sm:$0xff]  ;;  %v6750_v49 = vld [vmem:[#allocation128_spill] sm:$0xff] }
 0x1cf   :  { %1240 = vmatprep.subr.bf16.mxu0 %v6740_v15  ;;  %1281 = vmatprep.subr.bf16.mxu1 %v6741_v2  ;;  %v6751_v15 = vld [vmem:[#allocation129_spill] sm:$0xff]  ;;  %v6752_v2 = vld [vmem:[#allocation130_spill] sm:$0xff] }
 0x1d2   :  { %1241 = vmatpush2.bf16.msra.mxu0 %v6742_v0  ;;  %1282 = vmatpush2.bf16.msra.mxu1 %v6743_v63  ;;  %v6753_v0 = vld [vmem:[#allocation131_spill] sm:$0xff]  ;;  %v6754_v63 = vld [vmem:[#allocation132_spill] sm:$0xff] }
 0x1d3   :  { %1242 = vmatprep.subr.bf16.mxu0 %v6744_v31  ;;  %1283 = vmatprep.subr.bf16.mxu1 %v6745_v41  ;;  %v6755_v31 = vld [vmem:[#allocation133_spill] sm:$0xff]  ;;  %v6756_v41 = vld [vmem:[#allocation134_spill] sm:$0xff] }
 0x1d6   :  { %1243 = vmatpush2.bf16.msra.mxu0 %v6746_v13  ;;  %1284 = vmatpush2.bf16.msra.mxu1 %v6747_v58  ;;  %v6757_v13 = vld [vmem:[#allocation135_spill] sm:$0xff] }
 0x1d7   :  { %1244 = vmatprep.subr.bf16.mxu0 %v6748_v25  ;;  %1285 = vmatprep.subr.bf16.mxu1 %v6749_v40 }
 0x1da   :  { %1245 = vmatpush2.bf16.msra.mxu0 %v6750_v49  ;;  %1286 = vmatpush2.bf16.msra.mxu1 %v6751_v15  ;;  %v6758_v49 = vld [vmem:[#allocation139_spill] sm:$0xff] }
 0x1db   :  { %1246 = vmatprep.subr.bf16.mxu0 %v6752_v2  ;;  %1287 = vmatprep.subr.bf16.mxu1 %v6753_v0 }
 0x1de   :  { %1247 = vmatpush2.bf16.msra.mxu0 %v6754_v63  ;;  %1288 = vmatpush2.bf16.msra.mxu1 %v6755_v31 }
 0x1df   :  { %1248 = vmatprep.subr.bf16.mxu0 %v6756_v41  ;;  %1289 = vmatprep.subr.bf16.mxu1 %v6757_v13 }
 0x1e2   :  { %1249 = vmatpush2.bf16.msra.mxu0 %v4954_v48  ;;  %1290 = vmatpush2.bf16.msra.mxu1 %v4958_v54 }
 0x1e3   :  { %1250 = vmatprep.subr.bf16.mxu0 %v4960_v42  ;;  %1291 = vmatprep.subr.bf16.mxu1 %v6758_v49 }
 0x1e6   :  { %1251 = vmatpush2.bf16.msra.mxu0 %v4966_v60  ;;  %1292 = vmatpush2.bf16.msra.mxu1 %v4970_v26 }
 0x1e7   :  { %1252 = vmatprep.subr.bf16.mxu0 %v4972_v57  ;;  %1293 = vmatprep.subr.bf16.mxu1 %v4975_v56 }
 0x1ea   :  { %1253 = vmatpush2.bf16.msra.mxu0 %v4978_v39  ;;  %1294 = vmatpush2.bf16.msra.mxu1 %v4982_v16 }
 0x1eb   :  { %1254 = vmatprep.subr.bf16.mxu0 %v4984_v32  ;;  %1295 = vmatprep.subr.bf16.mxu1 %v4987_v6 }
 0x1ee   :  { %1255 = vmatpush2.bf16.msra.mxu0 %v4990_v59  ;;  %1296 = vmatpush2.bf16.msra.mxu1 %v4994_v4 }
 0x1ef   :  { %1397 = vmatprep.subr.bf16.mxu0 %v4582_v3  ;;  %1438 = vmatprep.subr.bf16.mxu1 %v4586_v8 }
 0x1f1   :  { %1257 = vmatmul.mubr.bf16.vlgmr.msra.gmra.mxu0 %v5100_v23  ;;  %1298 = vmatmul.mubr.bf16.vlgmr.msra.gmra.mxu1 %v5100_v23  ;;  %v6759_v23 = vld [vmem:[#allocation49_spill] sm:$0xff] }
 0x1f2   :  { %1398 = vmatpush1.bf16.msra.mxu0 %v4584_v5  ;;  %1439 = vmatpush1.bf16.msra.mxu1 %v4588_v9 }
 0x1f3   :  { %1399 = vmatprep.subr.bf16.mxu0 %v4590_v10  ;;  %1440 = vmatprep.subr.bf16.mxu1 %v4593_v14 }
 0x1f6   :  { %1400 = vmatpush1.bf16.msra.mxu0 %v4597_v18  ;;  %1441 = vmatpush1.bf16.msra.mxu1 %v4601_v19 }
 0x1f7   :  { %1401 = vmatprep.subr.bf16.mxu0 %v4603_v20  ;;  %1442 = vmatprep.subr.bf16.mxu1 %v4606_v21 }
 0x1fa   :  { %1402 = vmatpush1.bf16.msra.mxu0 %v4611_v27  ;;  %1443 = vmatpush1.bf16.msra.mxu1 %v4615_v28 }
 0x1fb   :  { %1403 = vmatprep.subr.bf16.mxu0 %v4617_v29  ;;  %1444 = vmatprep.subr.bf16.mxu1 %v4620_v30  ;;  %v1133_v30 = vld [vmem:[#allocation3 + $0x48] sm:$0xff] }
 0x1fe   :  { %1404 = vmatpush1.bf16.msra.mxu0 %v4623_v35  ;;  %1445 = vmatpush1.bf16.msra.mxu1 %v4627_v36  ;;  %v1132_v35 = vld [vmem:[#allocation3 + $0x40] sm:$0xff] }
 0x1ff   :  { %1405 = vmatprep.subr.bf16.mxu0 %v4629_v37  ;;  %1446 = vmatprep.subr.bf16.mxu1 %v4632_v38 }
 0x202   :  { %1406 = vmatpush1.bf16.msra.mxu0 %v4635_v43  ;;  %1447 = vmatpush1.bf16.msra.mxu1 %v4639_v44  ;;  %v6760_v43 = vld [vmem:[#allocation50_spill] sm:$0xff]  ;;  %v6761_v44 = vld [vmem:[#allocation51_spill] sm:$0xff] }
 0x203   :  { %1407 = vmatprep.subr.bf16.mxu0 %v4641_v45  ;;  %1448 = vmatprep.subr.bf16.mxu1 %v4644_v46  ;;  %v6762_v45 = vld [vmem:[#allocation52_spill] sm:$0xff]  ;;  %v6763_v46 = vld [vmem:[#allocation53_spill] sm:$0xff] }
 0x206   :  { %1408 = vmatpush1.bf16.msra.mxu0 %v4647_v51  ;;  %1449 = vmatpush1.bf16.msra.mxu1 %v4651_v52  ;;  %v6764_v51 = vld [vmem:[#allocation54_spill] sm:$0xff]  ;;  %v6765_v52 = vld [vmem:[#allocation55_spill] sm:$0xff] }
 0x207   :  { %1409 = vmatprep.subr.bf16.mxu0 %v4653_v53  ;;  %1450 = vmatprep.subr.bf16.mxu1 %v4659_v55  ;;  %v6766_v53 = vld [vmem:[#allocation56_spill] sm:$0xff]  ;;  %v6767_v55 = vld [vmem:[#allocation57_spill] sm:$0xff] }
 0x20a   :  { %1410 = vmatpush1.bf16.msra.mxu0 %v4664_v61  ;;  %1451 = vmatpush1.bf16.msra.mxu1 %v4669_v62  ;;  %v6768_v61 = vld [vmem:[#allocation58_spill] sm:$0xff]  ;;  %v6769_v62 = vld [vmem:[#allocation59_spill] sm:$0xff] }
 0x20b   :  { %1411 = vmatprep.subr.bf16.mxu0 %v6759_v23  ;;  %1452 = vmatprep.subr.bf16.mxu1 %v6760_v43  ;;  %v6770_v23 = vld [vmem:[#allocation60_spill] sm:$0xff]  ;;  %v6771_v43 = vld [vmem:[#allocation61_spill] sm:$0xff] }
 0x20e   :  { %1412 = vmatpush1.bf16.msra.mxu0 %v6761_v44  ;;  %1453 = vmatpush1.bf16.msra.mxu1 %v6762_v45  ;;  %v6772_v44 = vld [vmem:[#allocation62_spill] sm:$0xff]  ;;  %v6773_v45 = vld [vmem:[#allocation63_spill] sm:$0xff] }
 0x20f   :  { %1413 = vmatprep.subr.bf16.mxu0 %v6763_v46  ;;  %1454 = vmatprep.subr.bf16.mxu1 %v6764_v51  ;;  %v6774_v46 = vld [vmem:[#allocation64_spill] sm:$0xff]  ;;  %v6775_v51 = vld [vmem:[#allocation65_spill] sm:$0xff] }
 0x212   :  { %1414 = vmatpush2.bf16.msra.mxu0 %v6765_v52  ;;  %1455 = vmatpush2.bf16.msra.mxu1 %v6766_v53  ;;  %v6776_v52 = vld [vmem:[#allocation66_spill] sm:$0xff]  ;;  %v6777_v53 = vld [vmem:[#allocation67_spill] sm:$0xff] }
 0x213   :  { %1415 = vmatprep.subr.bf16.mxu0 %v6767_v55  ;;  %1456 = vmatprep.subr.bf16.mxu1 %v6768_v61  ;;  %v6778_v55 = vld [vmem:[#allocation68_spill] sm:$0xff]  ;;  %v6779_v61 = vld [vmem:[#allocation69_spill] sm:$0xff] }
 0x216   :  { %1416 = vmatpush2.bf16.msra.mxu0 %v6769_v62  ;;  %1457 = vmatpush2.bf16.msra.mxu1 %v6770_v23  ;;  %v6780_v62 = vld [vmem:[#allocation70_spill] sm:$0xff]  ;;  %v6781_v23 = vld [vmem:[#allocation71_spill] sm:$0xff] }
 0x217   :  { %1417 = vmatprep.subr.bf16.mxu0 %v6771_v43  ;;  %1458 = vmatprep.subr.bf16.mxu1 %v6772_v44  ;;  %v6782_v43 = vld [vmem:[#allocation72_spill] sm:$0xff]  ;;  %v6783_v44 = vld [vmem:[#allocation73_spill] sm:$0xff] }
 0x21a   :  { %1418 = vmatpush2.bf16.msra.mxu0 %v6773_v45  ;;  %1459 = vmatpush2.bf16.msra.mxu1 %v6774_v46  ;;  %v6784_v45 = vld [vmem:[#allocation74_spill] sm:$0xff]  ;;  %v6785_v46 = vld [vmem:[#allocation75_spill] sm:$0xff] }
 0x21b   :  { %1419 = vmatprep.subr.bf16.mxu0 %v6775_v51  ;;  %1460 = vmatprep.subr.bf16.mxu1 %v6776_v52  ;;  %v6786_v51 = vld [vmem:[#allocation76_spill] sm:$0xff]  ;;  %v6787_v52 = vld [vmem:[#allocation77_spill] sm:$0xff] }
 0x21e   :  { %1420 = vmatpush2.bf16.msra.mxu0 %v6777_v53  ;;  %1461 = vmatpush2.bf16.msra.mxu1 %v6778_v55  ;;  %v6788_v53 = vld [vmem:[#allocation78_spill] sm:$0xff]  ;;  %v6789_v55 = vld [vmem:[#allocation79_spill] sm:$0xff] }
 0x21f   :  { %1421 = vmatprep.subr.bf16.mxu0 %v6779_v61  ;;  %1462 = vmatprep.subr.bf16.mxu1 %v6780_v62  ;;  %v6790_v61 = vld [vmem:[#allocation80_spill] sm:$0xff]  ;;  %v6791_v62 = vld [vmem:[#allocation81_spill] sm:$0xff] }
 0x222   :  { %1422 = vmatpush2.bf16.msra.mxu0 %v6781_v23  ;;  %1463 = vmatpush2.bf16.msra.mxu1 %v6782_v43  ;;  %v6792_v23 = vld [vmem:[#allocation82_spill] sm:$0xff]  ;;  %v6793_v43 = vld [vmem:[#allocation84_spill] sm:$0xff] }
 0x223   :  { %1423 = vmatprep.subr.bf16.mxu0 %v6783_v44  ;;  %1464 = vmatprep.subr.bf16.mxu1 %v6784_v45  ;;  %v6794_v44 = vld [vmem:[#allocation85_spill] sm:$0xff]  ;;  %v6795_v45 = vld [vmem:[#allocation86_spill] sm:$0xff] }
 0x226   :  { %1424 = vmatpush2.bf16.msra.mxu0 %v6785_v46  ;;  %1465 = vmatpush2.bf16.msra.mxu1 %v6786_v51  ;;  %v6796_v46 = vld [vmem:[#allocation87_spill] sm:$0xff] }
 0x227   :  { %1425 = vmatprep.subr.bf16.mxu0 %v6787_v52  ;;  %1466 = vmatprep.subr.bf16.mxu1 %v6788_v53 }
 0x22a   :  { %1426 = vmatpush2.bf16.msra.mxu0 %v6789_v55  ;;  %1467 = vmatpush2.bf16.msra.mxu1 %v6790_v61 }
 0x22b   :  { %1427 = vmatprep.subr.bf16.mxu0 %v6791_v62  ;;  %1468 = vmatprep.subr.bf16.mxu1 %v6792_v23  ;;  %v1134_v62 = vld [vmem:[#allocation3 + $0x50] sm:$0xff] }
 0x22e   :  { %1428 = vmatpush2.bf16.msra.mxu0 %v6793_v43  ;;  %1469 = vmatpush2.bf16.msra.mxu1 %v6794_v44  ;;  %v1135_v43 = vld [vmem:[#allocation3 + $0x58] sm:$0xff] }
 0x22f   :  { %1479 = vmatprep.subr.bf16.mxu0 %v6795_v45  ;;  %1520 = vmatprep.subr.bf16.mxu1 %v6796_v46 }
 0x271   :  { %v1176_v51 = vpop.f32.mrf.mxu0  ;;  %v1217_v52 = vpop.f32.mrf.mxu1 }
 0x272   :  { %v1306_v23 = vadd.f32 %v1176_v51, %v1132_v35  ;;  %v1308_v29 = vadd.f32 %v1217_v52, %v1134_v62  ;;  %v1136_v35 = vld [vmem:[#allocation3 + $0x60] sm:$0xff]  ;;  %v1138_v51 = vld [vmem:[#allocation3 + $0x70] sm:$0xff] }
 0x273   :  { %v1178_v38 = vpop.f32.mrf.mxu0  ;;  %v1219_v53 = vpop.f32.mrf.mxu1 }
 0x274   :  { %v1307_v28 = vadd.f32 %v1178_v38, %v1133_v30  ;;  %v3761_v44 = vmul.f32 -1.442695, %v1306_v23  ;;  %v1309_v27 = vadd.f32 %v1219_v53, %v1135_v43  ;;  %v3763_v45 = vmul.f32 -1.442695, %v1308_v29  ;;  %v1137_v29 = vld [vmem:[#allocation3 + $0x68] sm:$0xff] }
 0x275   :  { %v1180_v37 = vpop.f32.mrf.mxu0  ;;  %v1221_v55 = vpop.f32.mrf.mxu1 }
 0x276   :  { %v3762_v21 = vmul.f32 -1.442695, %v1307_v28  ;;  %4061 = vpow2.f32 %v3761_v44  ;;  %v3764_v46 = vmul.f32 -1.442695, %v1309_v27  ;;  %v1139_v28 = vld [vmem:[#allocation3 + $0x78] sm:$0xff] }
 0x277   :  { %v1181_v36 = vpop.f32.mrf.mxu0  ;;  %v1222_v61 = vpop.f32.mrf.mxu1  ;;  %4063 = vpow2.f32 %v3763_v45 }
 0x278   :  { %4065 = vpow2.f32 %v3762_v21 }
 0x279   :  { %4067 = vpow2.f32 %v3764_v46 }
 0x283   :  { %v4062_v37 = vpop.eup %4061 }
 0x284   :  { %v4064_v55 = vpop.eup %4063  ;;  %v1320_v61 = vadd.f32 1.0, %v4062_v37 }
 0x285   :  { %v4066_v36 = vpop.eup %4065  ;;  %v1332_v19 = vadd.f32 1.0, %v4064_v55 }
 0x286   :  { %v4068_v20 = vpop.eup %4067  ;;  %v1321_v18 = vadd.f32 1.0, %v4066_v36  ;;  %4069 = vrcp.f32 %v1320_v61 }
 0x287   :  { %v1333_v30 = vadd.f32 1.0, %v4068_v20  ;;  %4071 = vrcp.f32 %v1332_v19 }
 0x288   :  { %4073 = vrcp.f32 %v1321_v18 }
 0x293   :  { %v4070_v36 = vpop.eup %4069 }
 0x294   :  { %v4072_v19 = vpop.eup %4071 }
 0x295   :  { %v4074_v61 = vpop.eup %4073 }
 0x2b1   :  { %v1258_v38 = vpop.f32.mrf.mxu0  ;;  %v1299_v43 = vpop.f32.mrf.mxu1 }
 0x2b2   :  { %v1310_v27 = vadd.f32 %v1258_v38, %v1136_v35  ;;  %v1312_v44 = vadd.f32 %v1299_v43, %v1138_v51  ;;  %v1352_v51 = vmul.f32 %v4072_v19, %v5072_v1 }
 0x2b3   :  { %v1260_v21 = vpop.f32.mrf.mxu0  ;;  %v1301_v45 = vpop.f32.mrf.mxu1 }
 0x2b4   :  { %4075 = vtanh.f32 %v1310_v27  ;;  %v3765_v46 = vmul.f32 -1.442695, %v1312_v44  ;;  %v1311_v52 = vadd.f32 %v1260_v21, %v1137_v29  ;;  %v1313_v53 = vadd.f32 %v1301_v45, %v1139_v28  ;;  %v5235_v28 = vpop.permute.xlu0 %1365 }
 0x2b5   :  { %4077 = vrcp.f32 %v1333_v30  ;;  %v1262_v62 = vpop.f32.mrf.mxu0  ;;  %v1303_v23 = vpop.f32.mrf.mxu1  ;;  %6797 = vst [vmem:[#allocation83_spill] sm:$0xff] %v5235_v28  ;;  %vm1367_vm9 = vcmp.eq.s32.totalorder %v5235_v28, 1  ;;  %v6820_v28 = vld [vmem:[#allocation115_spill] sm:$0xff] }
 0x2b6   :  { %4079 = vpow2.f32 %v3765_v46  ;;  %v3766_v37 = vmul.f32 -1.442695, %v1313_v53  ;;  %vm6188_vm15 = vmpackc.low %vm1367_vm9, %vm1112_vm8 }
 0x2b7   :  { %4081 = vtanh.f32 %v1311_v52  ;;  %v1263_v20 = vpop.f32.mrf.mxu0  ;;  %v1304_v55 = vpop.f32.mrf.mxu1 }
 0x2b8   :  { %4083 = vpow2.f32 %v3766_v37 }
 0x2c1   :  { %v4076_v35 = vpop.eup %4075 }
 0x2c2   :  { %v4078_v18 = vpop.eup %4077  ;;  %v1354_v38 = vmul.f32 %v4076_v35, %v4070_v36 }
 0x2c3   :  { %v4080_v43 = vpop.eup %4079  ;;  %v1353_v21 = vmul.f32 %v4078_v18, %v5076_v7  ;;  %v6802_v18 = vld [vmem:[#allocation97_spill] sm:$0xff] }
 0x2c4   :  { %v4082_v29 = vpop.eup %4081  ;;  %v1356_v30 = vadd.f32 %v1354_v38, %v1352_v51  ;;  %v1346_v27 = vadd.f32 1.0, %v4080_v43  ;;  %v6803_v51 = vld [vmem:[#allocation98_spill] sm:$0xff]  ;;  %v6804_v38 = vld [vmem:[#allocation99_spill] sm:$0xff]  ;;  %v6805_v43 = vld [vmem:[#allocation100_spill] sm:$0xff] }
 0x2c5   :  { %v4084_v44 = vpop.eup %4083  ;;  %v1355_v45 = vmul.f32 %v4082_v29, %v4074_v61  ;;  %v6806_v29 = vld [vmem:[#allocation101_spill] sm:$0xff] }
 0x2c6   :  { %4085 = vtanh.f32 %v1356_v30  ;;  %v1347_v46 = vadd.f32 1.0, %v4084_v44  ;;  %v5242_v52 = vsel %vm1367_vm9, %v1356_v30, %v5072_v1  ;;  %v6807_v30 = vld [vmem:[#allocation102_spill] sm:$0xff]  ;;  %v6809_v44 = vld [vmem:[#allocation104_spill] sm:$0xff] }
 0x2c7   :  { %4087 = vrcp.f32 %v1346_v27  ;;  %v1357_v53 = vadd.f32 %v1355_v45, %v1353_v21  ;;  %v6808_v27 = vld [vmem:[#allocation103_spill] sm:$0xff]  ;;  %v6810_v21 = vld [vmem:[#allocation105_spill] sm:$0xff]  ;;  %v6811_v45 = vld [vmem:[#allocation106_spill] sm:$0xff] }
 0x2c8   :  { %4089 = vrcp.f32 %v1347_v46  ;;  %v6812_v46 = vld [vmem:[#allocation107_spill] sm:$0xff] }
 0x2c9   :  { %4091 = vtanh.f32 %v1357_v53  ;;  %v5247_v62 = vsel %vm1367_vm9, %v1357_v53, %v5076_v7  ;;  %v6813_v53 = vld [vmem:[#allocation108_spill] sm:$0xff] }
 0x2d3   :  { %v4086_v23 = vpop.eup %4085 }
 0x2d4   :  { %v4088_v37 = vpop.eup %4087 }
 0x2d5   :  { %v4090_v20 = vpop.eup %4089  ;;  %v5249_v55 = vmul.f32 %v4088_v37, %v4086_v23  ;;  %v6814_v23 = vld [vmem:[#allocation109_spill] sm:$0xff]  ;;  %v6815_v37 = vld [vmem:[#allocation110_spill] sm:$0xff] }
 0x2d6   :  { %v4092_v36 = vpop.eup %4091 }
 0x2d7   :  { %6798 = vst [vmem:[#allocation88_spill] sm:$0xff] %v5249_v55  ;;  %v5251_v19 = vmul.f32 %v4092_v36, %v4090_v20  ;;  %v5257_v1 = vsel %vm1367_vm9, %v5249_v55, %v5086_v34  ;;  %v6800_v34 = vld [vmem:[#allocation95_spill] sm:$0xff]  ;;  %v6817_v36 = vld [vmem:[#allocation112_spill] sm:$0xff]  ;;  %v6819_v55 = vld [vmem:[#allocation114_spill] sm:$0xff] }
 0x2d8   :  { %v5269_v35 = vpack.c.bf16 %v5257_v1, %v5257_v1  ;;  %v6816_v20 = vld [vmem:[#allocation111_spill] sm:$0xff] }
 0x2d9   :  { %6799 = vst [vmem:[#allocation89_spill] sm:$0xff] %v5251_v19  ;;  %v5263_v7 = vsel %vm1367_vm9, %v5251_v19, %v5094_v24  ;;  %v6801_v24 = vld [vmem:[#allocation96_spill] sm:$0xff] }
 0x2da   :  { %v1396_v61 = vpack.c.bf16 %v5263_v7, %v5263_v7  ;;  %v6821_v19 = vld [vmem:[#allocation116_spill] sm:$0xff] }
 0x2dc   :  { %1429 = vmatprep.mubr.bf16.mxu0 %v1396_v61  ;;  %1470 = vmatprep.mubr.bf16.mxu1 %v1396_v61 }
 0x2dd   :  { %1430 = vmatmul.mubr.bf16.vlgmr.msra.gmra.mxu0 %v5269_v35  ;;  %1471 = vmatmul.mubr.bf16.vlgmr.msra.gmra.mxu1 %v5269_v35 }
 0x2de   :  { %1480 = vmatpush1.bf16.msra.mxu0 %v6710_v12  ;;  %1521 = vmatpush1.bf16.msra.mxu1 %v6711_v11 }
 0x2df   :  { %1511 = vmatprep.mubr.bf16.mxu0 %v1396_v61  ;;  %1552 = vmatprep.mubr.bf16.mxu1 %v1396_v61  ;;  %v6818_v61 = vld [vmem:[#allocation113_spill] sm:$0xff] }
 0x2e0   :  { %1481 = vmatprep.subr.bf16.mxu0 %v6712_v17  ;;  %1522 = vmatprep.subr.bf16.mxu1 %v6713_v22 }
 0x2e2   :  { %1482 = vmatpush1.bf16.msra.mxu0 %v6714_v33  ;;  %1523 = vmatpush1.bf16.msra.mxu1 %v6715_v47 }
 0x2e3   :  { %1483 = vmatprep.subr.bf16.mxu0 %v6716_v50  ;;  %1524 = vmatprep.subr.bf16.mxu1 %v6800_v34 }
 0x2e6   :  { %1484 = vmatpush1.bf16.msra.mxu0 %v6801_v24  ;;  %1525 = vmatpush1.bf16.msra.mxu1 %v6802_v18 }
 0x2e7   :  { %1485 = vmatprep.subr.bf16.mxu0 %v6803_v51  ;;  %1526 = vmatprep.subr.bf16.mxu1 %v6804_v38 }
 0x2ea   :  { %1486 = vmatpush1.bf16.msra.mxu0 %v6805_v43  ;;  %1527 = vmatpush1.bf16.msra.mxu1 %v6806_v29 }
 0x2eb   :  { %1487 = vmatprep.subr.bf16.mxu0 %v6807_v30  ;;  %1528 = vmatprep.subr.bf16.mxu1 %v6808_v27 }
 0x2ee   :  { %1488 = vmatpush1.bf16.msra.mxu0 %v6809_v44  ;;  %1529 = vmatpush1.bf16.msra.mxu1 %v6810_v21 }
 0x2ef   :  { %1489 = vmatprep.subr.bf16.mxu0 %v6811_v45  ;;  %1530 = vmatprep.subr.bf16.mxu1 %v6812_v46  ;;  %v6822_v45 = vld [vmem:[#allocation117_spill] sm:$0xff]  ;;  %v6823_v46 = vld [vmem:[#allocation118_spill] sm:$0xff] }
 0x2f2   :  { %1490 = vmatpush1.bf16.msra.mxu0 %v6813_v53  ;;  %1531 = vmatpush1.bf16.msra.mxu1 %v6814_v23  ;;  %v6824_v53 = vld [vmem:[#allocation119_spill] sm:$0xff]  ;;  %v6825_v23 = vld [vmem:[#allocation120_spill] sm:$0xff] }
 0x2f3   :  { %1491 = vmatprep.subr.bf16.mxu0 %v6815_v37  ;;  %1532 = vmatprep.subr.bf16.mxu1 %v6816_v20  ;;  %v6826_v37 = vld [vmem:[#allocation121_spill] sm:$0xff]  ;;  %v6827_v20 = vld [vmem:[#allocation122_spill] sm:$0xff] }
 0x2f6   :  { %1492 = vmatpush1.bf16.msra.mxu0 %v6817_v36  ;;  %1533 = vmatpush1.bf16.msra.mxu1 %v6818_v61  ;;  %v6828_v36 = vld [vmem:[#allocation123_spill] sm:$0xff]  ;;  %v6829_v61 = vld [vmem:[#allocation124_spill] sm:$0xff] }
 0x2f7   :  { %1493 = vmatprep.subr.bf16.mxu0 %v6819_v55  ;;  %1534 = vmatprep.subr.bf16.mxu1 %v6820_v28 }
 0x2fa   :  { %1494 = vmatpush1.bf16.msra.mxu0 %v6821_v19  ;;  %1535 = vmatpush1.bf16.msra.mxu1 %v6822_v45  ;;  %v6830_v45 = vld [vmem:[#allocation128_spill] sm:$0xff] }
 0x2fb   :  { %1495 = vmatprep.subr.bf16.mxu0 %v6823_v46  ;;  %1536 = vmatprep.subr.bf16.mxu1 %v6824_v53 }
 0x2fe   :  { %1496 = vmatpush2.bf16.msra.mxu0 %v6825_v23  ;;  %1537 = vmatpush2.bf16.msra.mxu1 %v6826_v37 }
 0x2ff   :  { %1497 = vmatprep.subr.bf16.mxu0 %v6827_v20  ;;  %1538 = vmatprep.subr.bf16.mxu1 %v6828_v36 }
 0x302   :  { %1498 = vmatpush2.bf16.msra.mxu0 %v6829_v61  ;;  %1539 = vmatpush2.bf16.msra.mxu1 %v6747_v58 }
 0x303   :  { %1499 = vmatprep.subr.bf16.mxu0 %v6748_v25  ;;  %1540 = vmatprep.subr.bf16.mxu1 %v6749_v40 }
 0x306   :  { %1500 = vmatpush2.bf16.msra.mxu0 %v6830_v45  ;;  %1541 = vmatpush2.bf16.msra.mxu1 %v6751_v15 }
 0x307   :  { %1501 = vmatprep.subr.bf16.mxu0 %v6752_v2  ;;  %1542 = vmatprep.subr.bf16.mxu1 %v6753_v0 }
 0x30a   :  { %1502 = vmatpush2.bf16.msra.mxu0 %v6754_v63  ;;  %1543 = vmatpush2.bf16.msra.mxu1 %v6755_v31 }
 0x30b   :  { %1503 = vmatprep.subr.bf16.mxu0 %v6756_v41  ;;  %1544 = vmatprep.subr.bf16.mxu1 %v6757_v13 }
 0x30e   :  { %1504 = vmatpush2.bf16.msra.mxu0 %v4954_v48  ;;  %1545 = vmatpush2.bf16.msra.mxu1 %v4958_v54 }
 0x30f   :  { %1505 = vmatprep.subr.bf16.mxu0 %v4960_v42  ;;  %1546 = vmatprep.subr.bf16.mxu1 %v6758_v49 }
 0x312   :  { %1506 = vmatpush2.bf16.msra.mxu0 %v4966_v60  ;;  %1547 = vmatpush2.bf16.msra.mxu1 %v4970_v26  ;;  %v1388_v26 = vld [vmem:[#allocation3 + $0x88] sm:$0xff] }
 0x313   :  { %1507 = vmatprep.subr.bf16.mxu0 %v4972_v57  ;;  %1548 = vmatprep.subr.bf16.mxu1 %v4975_v56  ;;  %v1387_v57 = vld [vmem:[#allocation3 + $0x80] sm:$0xff] }
 0x316   :  { %1508 = vmatpush2.bf16.msra.mxu0 %v4978_v39  ;;  %1549 = vmatpush2.bf16.msra.mxu1 %v4982_v16 }
 0x317   :  { %1509 = vmatprep.subr.bf16.mxu0 %v4984_v32  ;;  %1550 = vmatprep.subr.bf16.mxu1 %v4987_v6  ;;  %v6831_v6 = vld [vmem:[#allocation27_spill] sm:$0xff]  ;;  %v6836_v32 = vld [vmem:[#allocation32_spill] sm:$0xff] }
 0x31a   :  { %1510 = vmatpush2.bf16.msra.mxu0 %v4990_v59  ;;  %1551 = vmatpush2.bf16.msra.mxu1 %v4994_v4  ;;  %v6832_v59 = vld [vmem:[#allocation28_spill] sm:$0xff]  ;;  %v6833_v4 = vld [vmem:[#allocation29_spill] sm:$0xff] }
 0x31b   :  { %1652 = vmatprep.subr.bf16.mxu0 %v4582_v3  ;;  %1693 = vmatprep.subr.bf16.mxu1 %v4586_v8  ;;  %v6834_v3 = vld [vmem:[#allocation30_spill] sm:$0xff]  ;;  %v6835_v8 = vld [vmem:[#allocation31_spill] sm:$0xff] }
 0x31d   :  { %1512 = vmatmul.mubr.bf16.vlgmr.msra.gmra.mxu0 %v5269_v35  ;;  %1553 = vmatmul.mubr.bf16.vlgmr.msra.gmra.mxu1 %v5269_v35  ;;  %v6837_v35 = vld [vmem:[#allocation33_spill] sm:$0xff] }
 0x31e   :  { %1653 = vmatpush1.bf16.msra.mxu0 %v4584_v5  ;;  %1694 = vmatpush1.bf16.msra.mxu1 %v4588_v9  ;;  %v6838_v5 = vld [vmem:[#allocation34_spill] sm:$0xff]  ;;  %v6839_v9 = vld [vmem:[#allocation35_spill] sm:$0xff] }
 0x31f   :  { %1654 = vmatprep.subr.bf16.mxu0 %v4590_v10  ;;  %1695 = vmatprep.subr.bf16.mxu1 %v4593_v14  ;;  %v6840_v10 = vld [vmem:[#allocation36_spill] sm:$0xff]  ;;  %v6841_v14 = vld [vmem:[#allocation37_spill] sm:$0xff] }
 0x322   :  { %1655 = vmatpush1.bf16.msra.mxu0 %v6831_v6  ;;  %1696 = vmatpush1.bf16.msra.mxu1 %v6832_v59  ;;  %v6842_v6 = vld [vmem:[#allocation38_spill] sm:$0xff]  ;;  %v6843_v59 = vld [vmem:[#allocation39_spill] sm:$0xff] }
 0x323   :  { %1656 = vmatprep.subr.bf16.mxu0 %v6833_v4  ;;  %1697 = vmatprep.subr.bf16.mxu1 %v6834_v3  ;;  %v6844_v4 = vld [vmem:[#allocation40_spill] sm:$0xff]  ;;  %v6845_v3 = vld [vmem:[#allocation41_spill] sm:$0xff] }
 0x326   :  { %1657 = vmatpush1.bf16.msra.mxu0 %v6835_v8  ;;  %1698 = vmatpush1.bf16.msra.mxu1 %v6836_v32  ;;  %v6846_v8 = vld [vmem:[#allocation42_spill] sm:$0xff]  ;;  %v6847_v32 = vld [vmem:[#allocation43_spill] sm:$0xff] }
 0x327   :  { %1658 = vmatprep.subr.bf16.mxu0 %v6837_v35  ;;  %1699 = vmatprep.subr.bf16.mxu1 %v6838_v5  ;;  %v6848_v35 = vld [vmem:[#allocation44_spill] sm:$0xff]  ;;  %v6849_v5 = vld [vmem:[#allocation45_spill] sm:$0xff] }
 0x32a   :  { %1659 = vmatpush1.bf16.msra.mxu0 %v6839_v9  ;;  %1700 = vmatpush1.bf16.msra.mxu1 %v6840_v10  ;;  %v6850_v9 = vld [vmem:[#allocation46_spill] sm:$0xff]  ;;  %v6851_v10 = vld [vmem:[#allocation47_spill] sm:$0xff] }
 0x32b   :  { %1660 = vmatprep.subr.bf16.mxu0 %v6841_v14  ;;  %1701 = vmatprep.subr.bf16.mxu1 %v6842_v6  ;;  %v6852_v14 = vld [vmem:[#allocation48_spill] sm:$0xff]  ;;  %v6853_v6 = vld [vmem:[#allocation49_spill] sm:$0xff] }
 0x32e   :  { %1661 = vmatpush1.bf16.msra.mxu0 %v6843_v59  ;;  %1702 = vmatpush1.bf16.msra.mxu1 %v6844_v4  ;;  %v6854_v59 = vld [vmem:[#allocation50_spill] sm:$0xff]  ;;  %v6855_v4 = vld [vmem:[#allocation51_spill] sm:$0xff] }
 0x32f   :  { %1662 = vmatprep.subr.bf16.mxu0 %v6845_v3  ;;  %1703 = vmatprep.subr.bf16.mxu1 %v6846_v8  ;;  %v6856_v3 = vld [vmem:[#allocation52_spill] sm:$0xff]  ;;  %v6857_v8 = vld [vmem:[#allocation53_spill] sm:$0xff] }
 0x332   :  { %1663 = vmatpush1.bf16.msra.mxu0 %v6847_v32  ;;  %1704 = vmatpush1.bf16.msra.mxu1 %v6848_v35  ;;  %v6858_v32 = vld [vmem:[#allocation54_spill] sm:$0xff]  ;;  %v6859_v35 = vld [vmem:[#allocation55_spill] sm:$0xff] }
 0x333   :  { %1664 = vmatprep.subr.bf16.mxu0 %v6849_v5  ;;  %1705 = vmatprep.subr.bf16.mxu1 %v6850_v9  ;;  %v6860_v5 = vld [vmem:[#allocation56_spill] sm:$0xff]  ;;  %v6861_v9 = vld [vmem:[#allocation57_spill] sm:$0xff] }
 0x336   :  { %1665 = vmatpush1.bf16.msra.mxu0 %v6851_v10  ;;  %1706 = vmatpush1.bf16.msra.mxu1 %v6852_v14  ;;  %v6862_v10 = vld [vmem:[#allocation58_spill] sm:$0xff]  ;;  %v6863_v14 = vld [vmem:[#allocation59_spill] sm:$0xff] }
 0x337   :  { %1666 = vmatprep.subr.bf16.mxu0 %v6853_v6  ;;  %1707 = vmatprep.subr.bf16.mxu1 %v6854_v59  ;;  %v6864_v6 = vld [vmem:[#allocation60_spill] sm:$0xff]  ;;  %v6865_v59 = vld [vmem:[#allocation61_spill] sm:$0xff] }
 0x33a   :  { %1667 = vmatpush1.bf16.msra.mxu0 %v6855_v4  ;;  %1708 = vmatpush1.bf16.msra.mxu1 %v6856_v3  ;;  %v6866_v4 = vld [vmem:[#allocation62_spill] sm:$0xff]  ;;  %v6867_v3 = vld [vmem:[#allocation63_spill] sm:$0xff] }
 0x33b   :  { %1668 = vmatprep.subr.bf16.mxu0 %v6857_v8  ;;  %1709 = vmatprep.subr.bf16.mxu1 %v6858_v32  ;;  %v6868_v8 = vld [vmem:[#allocation64_spill] sm:$0xff]  ;;  %v6869_v32 = vld [vmem:[#allocation65_spill] sm:$0xff] }
 0x33e   :  { %1669 = vmatpush2.bf16.msra.mxu0 %v6859_v35  ;;  %1710 = vmatpush2.bf16.msra.mxu1 %v6860_v5  ;;  %v6870_v35 = vld [vmem:[#allocation66_spill] sm:$0xff]  ;;  %v6871_v5 = vld [vmem:[#allocation67_spill] sm:$0xff] }
 0x33f   :  { %1670 = vmatprep.subr.bf16.mxu0 %v6861_v9  ;;  %1711 = vmatprep.subr.bf16.mxu1 %v6862_v10  ;;  %v6872_v9 = vld [vmem:[#allocation68_spill] sm:$0xff]  ;;  %v6873_v10 = vld [vmem:[#allocation69_spill] sm:$0xff] }
 0x342   :  { %1671 = vmatpush2.bf16.msra.mxu0 %v6863_v14  ;;  %1712 = vmatpush2.bf16.msra.mxu1 %v6864_v6  ;;  %v6874_v14 = vld [vmem:[#allocation70_spill] sm:$0xff]  ;;  %v6875_v6 = vld [vmem:[#allocation71_spill] sm:$0xff] }
 0x343   :  { %1672 = vmatprep.subr.bf16.mxu0 %v6865_v59  ;;  %1713 = vmatprep.subr.bf16.mxu1 %v6866_v4  ;;  %v6876_v59 = vld [vmem:[#allocation72_spill] sm:$0xff]  ;;  %v6877_v4 = vld [vmem:[#allocation73_spill] sm:$0xff] }
 0x346   :  { %1673 = vmatpush2.bf16.msra.mxu0 %v6867_v3  ;;  %1714 = vmatpush2.bf16.msra.mxu1 %v6868_v8  ;;  %v6878_v3 = vld [vmem:[#allocation74_spill] sm:$0xff]  ;;  %v6879_v8 = vld [vmem:[#allocation75_spill] sm:$0xff] }
 0x347   :  { %1674 = vmatprep.subr.bf16.mxu0 %v6869_v32  ;;  %1715 = vmatprep.subr.bf16.mxu1 %v6870_v35  ;;  %v6880_v32 = vld [vmem:[#allocation76_spill] sm:$0xff]  ;;  %v6881_v35 = vld [vmem:[#allocation77_spill] sm:$0xff] }
 0x34a   :  { %1675 = vmatpush2.bf16.msra.mxu0 %v6871_v5  ;;  %1716 = vmatpush2.bf16.msra.mxu1 %v6872_v9  ;;  %v6882_v5 = vld [vmem:[#allocation78_spill] sm:$0xff]  ;;  %v6883_v9 = vld [vmem:[#allocation79_spill] sm:$0xff] }
 0x34b   :  { %1676 = vmatprep.subr.bf16.mxu0 %v6873_v10  ;;  %1717 = vmatprep.subr.bf16.mxu1 %v6874_v14  ;;  %v6884_v10 = vld [vmem:[#allocation80_spill] sm:$0xff]  ;;  %v6885_v14 = vld [vmem:[#allocation81_spill] sm:$0xff] }
 0x34e   :  { %1677 = vmatpush2.bf16.msra.mxu0 %v6875_v6  ;;  %1718 = vmatpush2.bf16.msra.mxu1 %v6876_v59  ;;  %v6886_v6 = vld [vmem:[#allocation82_spill] sm:$0xff]  ;;  %v6887_v59 = vld [vmem:[#allocation84_spill] sm:$0xff] }
 0x34f   :  { %1678 = vmatprep.subr.bf16.mxu0 %v6877_v4  ;;  %1719 = vmatprep.subr.bf16.mxu1 %v6878_v3  ;;  %v6888_v4 = vld [vmem:[#allocation85_spill] sm:$0xff]  ;;  %v6889_v3 = vld [vmem:[#allocation86_spill] sm:$0xff] }
 0x352   :  { %1679 = vmatpush2.bf16.msra.mxu0 %v6879_v8  ;;  %1720 = vmatpush2.bf16.msra.mxu1 %v6880_v32  ;;  %v6890_v8 = vld [vmem:[#allocation87_spill] sm:$0xff] }
 0x353   :  { %1680 = vmatprep.subr.bf16.mxu0 %v6881_v35  ;;  %1721 = vmatprep.subr.bf16.mxu1 %v6882_v5 }
 0x356   :  { %1681 = vmatpush2.bf16.msra.mxu0 %v6883_v9  ;;  %1722 = vmatpush2.bf16.msra.mxu1 %v6884_v10 }
 0x357   :  { %1682 = vmatprep.subr.bf16.mxu0 %v6885_v14  ;;  %1723 = vmatprep.subr.bf16.mxu1 %v6886_v6  ;;  %v1389_v14 = vld [vmem:[#allocation3 + $0x90] sm:$0xff] }
 0x35a   :  { %1683 = vmatpush2.bf16.msra.mxu0 %v6887_v59  ;;  %1724 = vmatpush2.bf16.msra.mxu1 %v6888_v4  ;;  %v1390_v59 = vld [vmem:[#allocation3 + $0x98] sm:$0xff] }
 0x35b   :  { %1734 = vmatprep.subr.bf16.mxu0 %v6889_v3  ;;  %1775 = vmatprep.subr.bf16.mxu1 %v6890_v8 }
 0x39d   :  { %v1431_v32 = vpop.f32.mrf.mxu0  ;;  %v1472_v35 = vpop.f32.mrf.mxu1 }
 0x39e   :  { %v1561_v6 = vadd.f32 %v1431_v32, %v1387_v57  ;;  %v1563_v60 = vadd.f32 %v1472_v35, %v1389_v14  ;;  %v1391_v57 = vld [vmem:[#allocation3 + $0xa0] sm:$0xff]  ;;  %v1393_v14 = vld [vmem:[#allocation3 + $0xb0] sm:$0xff] }
 0x39f   :  { %v1433_v16 = vpop.f32.mrf.mxu0  ;;  %v1474_v5 = vpop.f32.mrf.mxu1 }
 0x3a0   :  { %v1562_v49 = vadd.f32 %v1433_v16, %v1388_v26  ;;  %v3768_v4 = vmul.f32 -1.442695, %v1561_v6  ;;  %v1564_v42 = vadd.f32 %v1474_v5, %v1390_v59  ;;  %v3770_v3 = vmul.f32 -1.442695, %v1563_v60  ;;  %v1392_v59 = vld [vmem:[#allocation3 + $0xa8] sm:$0xff]  ;;  %v1394_v60 = vld [vmem:[#allocation3 + $0xb8] sm:$0xff] }
 0x3a1   :  { %v1435_v39 = vpop.f32.mrf.mxu0  ;;  %v1476_v9 = vpop.f32.mrf.mxu1 }
 0x3a2   :  { %v3769_v54 = vmul.f32 -1.442695, %v1562_v49  ;;  %4093 = vpow2.f32 %v3768_v4  ;;  %v3771_v8 = vmul.f32 -1.442695, %v1564_v42 }
 0x3a3   :  { %v1436_v56 = vpop.f32.mrf.mxu0  ;;  %v1477_v10 = vpop.f32.mrf.mxu1  ;;  %4095 = vpow2.f32 %v3770_v3 }
 0x3a4   :  { %4097 = vpow2.f32 %v3769_v54 }
 0x3a5   :  { %4099 = vpow2.f32 %v3771_v8 }
 0x3af   :  { %v4094_v39 = vpop.eup %4093 }
 0x3b0   :  { %v4096_v9 = vpop.eup %4095  ;;  %v1575_v10 = vadd.f32 1.0, %v4094_v39 }
 0x3b1   :  { %v4098_v56 = vpop.eup %4097  ;;  %v1587_v13 = vadd.f32 1.0, %v4096_v9 }
 0x3b2   :  { %v4100_v48 = vpop.eup %4099  ;;  %v1576_v41 = vadd.f32 1.0, %v4098_v56  ;;  %4101 = vrcp.f32 %v1575_v10 }
 0x3b3   :  { %v1588_v26 = vadd.f32 1.0, %v4100_v48  ;;  %4103 = vrcp.f32 %v1587_v13 }
 0x3b4   :  { %4105 = vrcp.f32 %v1576_v41 }
 0x3bf   :  { %v4102_v56 = vpop.eup %4101 }
 0x3c0   :  { %v4104_v13 = vpop.eup %4103 }
 0x3c1   :  { %v4106_v10 = vpop.eup %4105 }
 0x3dd   :  { %v1513_v16 = vpop.f32.mrf.mxu0  ;;  %v1554_v5 = vpop.f32.mrf.mxu1 }
 0x3de   :  { %v1565_v42 = vadd.f32 %v1513_v16, %v1391_v57  ;;  %v1567_v3 = vadd.f32 %v1554_v5, %v1393_v14  ;;  %v5403_v14 = vpop.permute.xlu1 %1620  ;;  %v1607_v16 = vmul.f32 %v4104_v13, %v5242_v52 }
 0x3df   :  { %v1515_v8 = vpop.f32.mrf.mxu0  ;;  %v1556_v54 = vpop.f32.mrf.mxu1  ;;  %6891 = vst [vmem:[#allocation90_spill] sm:$0xff] %v5403_v14  ;;  %vm1622_vm10 = vcmp.eq.s32.totalorder %v5403_v14, 1  ;;  %v6914_v14 = vld [vmem:[#allocation145_spill] sm:$0xff] }
 0x3e0   :  { %4107 = vtanh.f32 %v1565_v42  ;;  %v3772_v32 = vmul.f32 -1.442695, %v1567_v3  ;;  %v1566_v6 = vadd.f32 %v1515_v8, %v1392_v59  ;;  %v1568_v4 = vadd.f32 %v1556_v54, %v1394_v60 }
 0x3e1   :  { %4109 = vrcp.f32 %v1588_v26  ;;  %v1517_v49 = vpop.f32.mrf.mxu0  ;;  %v1558_v35 = vpop.f32.mrf.mxu1 }
 0x3e2   :  { %4111 = vpow2.f32 %v3772_v32  ;;  %v3773_v39 = vmul.f32 -1.442695, %v1568_v4 }
 0x3e3   :  { %4113 = vtanh.f32 %v1566_v6  ;;  %v1518_v48 = vpop.f32.mrf.mxu0  ;;  %v1559_v9 = vpop.f32.mrf.mxu1 }
 0x3e4   :  { %4115 = vpow2.f32 %v3773_v39 }
 0x3ed   :  { %v4108_v57 = vpop.eup %4107 }
 0x3ee   :  { %v4110_v41 = vpop.eup %4109  ;;  %v1609_v5 = vmul.f32 %v4108_v57, %v4102_v56 }
 0x3ef   :  { %v4112_v59 = vpop.eup %4111  ;;  %v1608_v8 = vmul.f32 %v4110_v41, %v5247_v62  ;;  %v6896_v41 = vld [vmem:[#allocation108_spill] sm:$0xff] }
 0x3f0   :  { %v4114_v26 = vpop.eup %4113  ;;  %v1611_v60 = vadd.f32 %v1609_v5, %v1607_v16  ;;  %v1601_v42 = vadd.f32 1.0, %v4112_v59  ;;  %v6897_v16 = vld [vmem:[#allocation109_spill] sm:$0xff]  ;;  %v6898_v5 = vld [vmem:[#allocation110_spill] sm:$0xff]  ;;  %v6899_v59 = vld [vmem:[#allocation111_spill] sm:$0xff] }
 0x3f1   :  { %v4116_v3 = vpop.eup %4115  ;;  %v1610_v54 = vmul.f32 %v4114_v26, %v4106_v10  ;;  %v6900_v26 = vld [vmem:[#allocation112_spill] sm:$0xff] }
 0x3f2   :  { %4117 = vtanh.f32 %v1611_v60  ;;  %v1602_v32 = vadd.f32 1.0, %v4116_v3  ;;  %v5411_v6 = vsel %vm1622_vm10, %v1611_v60, %v5242_v52  ;;  %v6901_v60 = vld [vmem:[#allocation113_spill] sm:$0xff]  ;;  %v6903_v3 = vld [vmem:[#allocation134_spill] sm:$0xff] }
 0x3f3   :  { %4119 = vrcp.f32 %v1601_v42  ;;  %v1612_v4 = vadd.f32 %v1610_v54, %v1608_v8  ;;  %v6902_v42 = vld [vmem:[#allocation117_spill] sm:$0xff]  ;;  %v6904_v8 = vld [vmem:[#allocation135_spill] sm:$0xff]  ;;  %v6905_v54 = vld [vmem:[#allocation136_spill] sm:$0xff] }
 0x3f4   :  { %4121 = vrcp.f32 %v1602_v32  ;;  %v6906_v32 = vld [vmem:[#allocation137_spill] sm:$0xff] }
 0x3f5   :  { %4123 = vtanh.f32 %v1612_v4  ;;  %v5416_v49 = vsel %vm1622_vm10, %v1612_v4, %v5247_v62  ;;  %v6907_v4 = vld [vmem:[#allocation138_spill] sm:$0xff] }
 0x3ff   :  { %v4118_v35 = vpop.eup %4117 }
 0x400   :  { %v4120_v39 = vpop.eup %4119 }
 0x401   :  { %v4122_v48 = vpop.eup %4121  ;;  %v5418_v9 = vmul.f32 %v4120_v39, %v4118_v35  ;;  %v6908_v35 = vld [vmem:[#allocation139_spill] sm:$0xff]  ;;  %v6909_v39 = vld [vmem:[#allocation140_spill] sm:$0xff] }
 0x402   :  { %v4124_v56 = vpop.eup %4123 }
 0x403   :  { %6892 = vst [vmem:[#allocation91_spill] sm:$0xff] %v5418_v9  ;;  %v5420_v13 = vmul.f32 %v4124_v56, %v4122_v48  ;;  %v5426_v52 = vsel %vm1622_vm10, %v5418_v9, %v5257_v1  ;;  %v6894_v1 = vld [vmem:[#allocation106_spill] sm:$0xff]  ;;  %v6910_v48 = vld [vmem:[#allocation141_spill] sm:$0xff]  ;;  %v6913_v9 = vld [vmem:[#allocation144_spill] sm:$0xff] }
 0x404   :  { %v5438_v57 = vpack.c.bf16 %v5426_v52, %v5426_v52  ;;  %v6911_v56 = vld [vmem:[#allocation142_spill] sm:$0xff] }
 0x405   :  { %6893 = vst [vmem:[#allocation92_spill] sm:$0xff] %v5420_v13  ;;  %v5432_v62 = vsel %vm1622_vm10, %v5420_v13, %v5263_v7  ;;  %v6895_v7 = vld [vmem:[#allocation107_spill] sm:$0xff]  ;;  %v6915_v13 = vld [vmem:[#allocation146_spill] sm:$0xff] }
 0x406   :  { %v1651_v10 = vpack.c.bf16 %v5432_v62, %v5432_v62 }
 0x408   :  { %1684 = vmatprep.mubr.bf16.mxu0 %v1651_v10  ;;  %1725 = vmatprep.mubr.bf16.mxu1 %v1651_v10 }
 0x409   :  { %1685 = vmatmul.mubr.bf16.vlgmr.msra.gmra.mxu0 %v5438_v57  ;;  %1726 = vmatmul.mubr.bf16.vlgmr.msra.gmra.mxu1 %v5438_v57 }
 0x40a   :  { %1735 = vmatpush1.bf16.msra.mxu0 %v6710_v12  ;;  %1776 = vmatpush1.bf16.msra.mxu1 %v6711_v11 }
 0x40b   :  { %1766 = vmatprep.mubr.bf16.mxu0 %v1651_v10  ;;  %1807 = vmatprep.mubr.bf16.mxu1 %v1651_v10  ;;  %v6912_v10 = vld [vmem:[#allocation143_spill] sm:$0xff] }
 0x40c   :  { %1736 = vmatprep.subr.bf16.mxu0 %v6712_v17  ;;  %1777 = vmatprep.subr.bf16.mxu1 %v6713_v22 }
 0x40e   :  { %1737 = vmatpush1.bf16.msra.mxu0 %v6714_v33  ;;  %1778 = vmatpush1.bf16.msra.mxu1 %v6715_v47 }
 0x40f   :  { %1738 = vmatprep.subr.bf16.mxu0 %v6716_v50  ;;  %1779 = vmatprep.subr.bf16.mxu1 %v6800_v34 }
 0x412   :  { %1739 = vmatpush1.bf16.msra.mxu0 %v6801_v24  ;;  %1780 = vmatpush1.bf16.msra.mxu1 %v6802_v18 }
 0x413   :  { %1740 = vmatprep.subr.bf16.mxu0 %v6803_v51  ;;  %1781 = vmatprep.subr.bf16.mxu1 %v6804_v38 }
 0x416   :  { %1741 = vmatpush1.bf16.msra.mxu0 %v6805_v43  ;;  %1782 = vmatpush1.bf16.msra.mxu1 %v6806_v29 }
 0x417   :  { %1742 = vmatprep.subr.bf16.mxu0 %v6807_v30  ;;  %1783 = vmatprep.subr.bf16.mxu1 %v6808_v27 }
 0x41a   :  { %1743 = vmatpush1.bf16.msra.mxu0 %v6809_v44  ;;  %1784 = vmatpush1.bf16.msra.mxu1 %v6810_v21 }
 0x41b   :  { %1744 = vmatprep.subr.bf16.mxu0 %v6894_v1  ;;  %1785 = vmatprep.subr.bf16.mxu1 %v6895_v7 }
 0x41e   :  { %1745 = vmatpush1.bf16.msra.mxu0 %v6896_v41  ;;  %1786 = vmatpush1.bf16.msra.mxu1 %v6897_v16 }
 0x41f   :  { %1746 = vmatprep.subr.bf16.mxu0 %v6898_v5  ;;  %1787 = vmatprep.subr.bf16.mxu1 %v6899_v59 }
 0x422   :  { %1747 = vmatpush1.bf16.msra.mxu0 %v6900_v26  ;;  %1788 = vmatpush1.bf16.msra.mxu1 %v6901_v60 }
 0x423   :  { %1748 = vmatprep.subr.bf16.mxu0 %v6819_v55  ;;  %1789 = vmatprep.subr.bf16.mxu1 %v6820_v28 }
 0x426   :  { %1749 = vmatpush1.bf16.msra.mxu0 %v6821_v19  ;;  %1790 = vmatpush1.bf16.msra.mxu1 %v6902_v42 }
 0x427   :  { %1750 = vmatprep.subr.bf16.mxu0 %v6823_v46  ;;  %1791 = vmatprep.subr.bf16.mxu1 %v6824_v53 }
 0x42a   :  { %1751 = vmatpush2.bf16.msra.mxu0 %v6825_v23  ;;  %1792 = vmatpush2.bf16.msra.mxu1 %v6826_v37 }
 0x42b   :  { %1752 = vmatprep.subr.bf16.mxu0 %v6827_v20  ;;  %1793 = vmatprep.subr.bf16.mxu1 %v6828_v36 }
 0x42e   :  { %1753 = vmatpush2.bf16.msra.mxu0 %v6829_v61  ;;  %1794 = vmatpush2.bf16.msra.mxu1 %v6747_v58 }
 0x42f   :  { %1754 = vmatprep.subr.bf16.mxu0 %v6748_v25  ;;  %1795 = vmatprep.subr.bf16.mxu1 %v6749_v40 }
 0x432   :  { %1755 = vmatpush2.bf16.msra.mxu0 %v6830_v45  ;;  %1796 = vmatpush2.bf16.msra.mxu1 %v6751_v15 }
 0x433   :  { %1756 = vmatprep.subr.bf16.mxu0 %v6752_v2  ;;  %1797 = vmatprep.subr.bf16.mxu1 %v6753_v0 }
 0x436   :  { %1757 = vmatpush2.bf16.msra.mxu0 %v6754_v63  ;;  %1798 = vmatpush2.bf16.msra.mxu1 %v6755_v31  ;;  %v1642_v31 = vld [vmem:[#allocation3 + $0xc0] sm:$0xff]  ;;  %v1643_v63 = vld [vmem:[#allocation3 + $0xc8] sm:$0xff] }
 0x437   :  { %1758 = vmatprep.subr.bf16.mxu0 %v6903_v3  ;;  %1799 = vmatprep.subr.bf16.mxu1 %v6904_v8 }
 0x43a   :  { %1759 = vmatpush2.bf16.msra.mxu0 %v6905_v54  ;;  %1800 = vmatpush2.bf16.msra.mxu1 %v6906_v32  ;;  %v6916_v54 = vld [vmem:[#allocation147_spill] sm:$0xff]  ;;  %v6917_v32 = vld [vmem:[#allocation148_spill] sm:$0xff] }
 0x43b   :  { %1760 = vmatprep.subr.bf16.mxu0 %v6907_v4  ;;  %1801 = vmatprep.subr.bf16.mxu1 %v6908_v35  ;;  %v6918_v4 = vld [vmem:[#allocation149_spill] sm:$0xff] }
 0x43c   :  { %v6919_v35 = vld [vmem:[#allocation21_spill] sm:$0xff] }
 0x43e   :  { %1761 = vmatpush2.bf16.msra.mxu0 %v6909_v39  ;;  %1802 = vmatpush2.bf16.msra.mxu1 %v6910_v48  ;;  %v6920_v39 = vld [vmem:[#allocation23_spill] sm:$0xff] }
 0x43f   :  { %1762 = vmatprep.subr.bf16.mxu0 %v6911_v56  ;;  %1803 = vmatprep.subr.bf16.mxu1 %v6912_v10  ;;  %v6921_v10 = vld [vmem:[#allocation22_spill] sm:$0xff]  ;;  %v6930_v56 = vld [vmem:[#allocation32_spill] sm:$0xff] }
 0x442   :  { %1763 = vmatpush2.bf16.msra.mxu0 %v6913_v9  ;;  %1804 = vmatpush2.bf16.msra.mxu1 %v6914_v14  ;;  %v6922_v9 = vld [vmem:[#allocation24_spill] sm:$0xff]  ;;  %v6923_v14 = vld [vmem:[#allocation25_spill] sm:$0xff] }
 0x443   :  { %1764 = vmatprep.subr.bf16.mxu0 %v6915_v13  ;;  %1805 = vmatprep.subr.bf16.mxu1 %v6916_v54  ;;  %v6924_v13 = vld [vmem:[#allocation26_spill] sm:$0xff]  ;;  %v6925_v54 = vld [vmem:[#allocation27_spill] sm:$0xff] }
 0x446   :  { %1765 = vmatpush2.bf16.msra.mxu0 %v6917_v32  ;;  %1806 = vmatpush2.bf16.msra.mxu1 %v6918_v4  ;;  %v6926_v32 = vld [vmem:[#allocation28_spill] sm:$0xff]  ;;  %v6927_v4 = vld [vmem:[#allocation29_spill] sm:$0xff] }
 0x447   :  { %1907 = vmatprep.subr.bf16.mxu0 %v6919_v35  ;;  %1948 = vmatprep.subr.bf16.mxu1 %v6920_v39  ;;  %v6928_v35 = vld [vmem:[#allocation30_spill] sm:$0xff]  ;;  %v6929_v39 = vld [vmem:[#allocation31_spill] sm:$0xff] }
 0x449   :  { %1767 = vmatmul.mubr.bf16.vlgmr.msra.gmra.mxu0 %v5438_v57  ;;  %1808 = vmatmul.mubr.bf16.vlgmr.msra.gmra.mxu1 %v5438_v57  ;;  %v6931_v57 = vld [vmem:[#allocation33_spill] sm:$0xff] }
 0x44a   :  { %1908 = vmatpush1.bf16.msra.mxu0 %v6921_v10  ;;  %1949 = vmatpush1.bf16.msra.mxu1 %v6922_v9  ;;  %v6932_v10 = vld [vmem:[#allocation34_spill] sm:$0xff]  ;;  %v6933_v9 = vld [vmem:[#allocation35_spill] sm:$0xff] }
 0x44b   :  { %1909 = vmatprep.subr.bf16.mxu0 %v6923_v14  ;;  %1950 = vmatprep.subr.bf16.mxu1 %v6924_v13  ;;  %v6934_v14 = vld [vmem:[#allocation36_spill] sm:$0xff]  ;;  %v6935_v13 = vld [vmem:[#allocation37_spill] sm:$0xff] }
 0x44e   :  { %1910 = vmatpush1.bf16.msra.mxu0 %v6925_v54  ;;  %1951 = vmatpush1.bf16.msra.mxu1 %v6926_v32  ;;  %v6936_v54 = vld [vmem:[#allocation38_spill] sm:$0xff]  ;;  %v6937_v32 = vld [vmem:[#allocation39_spill] sm:$0xff] }
 0x44f   :  { %1911 = vmatprep.subr.bf16.mxu0 %v6927_v4  ;;  %1952 = vmatprep.subr.bf16.mxu1 %v6928_v35  ;;  %v6938_v4 = vld [vmem:[#allocation40_spill] sm:$0xff]  ;;  %v6939_v35 = vld [vmem:[#allocation41_spill] sm:$0xff] }
 0x452   :  { %1912 = vmatpush1.bf16.msra.mxu0 %v6929_v39  ;;  %1953 = vmatpush1.bf16.msra.mxu1 %v6930_v56  ;;  %v6940_v39 = vld [vmem:[#allocation42_spill] sm:$0xff]  ;;  %v6941_v56 = vld [vmem:[#allocation43_spill] sm:$0xff] }
 0x453   :  { %1913 = vmatprep.subr.bf16.mxu0 %v6931_v57  ;;  %1954 = vmatprep.subr.bf16.mxu1 %v6932_v10  ;;  %v6942_v57 = vld [vmem:[#allocation44_spill] sm:$0xff]  ;;  %v6943_v10 = vld [vmem:[#allocation45_spill] sm:$0xff] }
 0x456   :  { %1914 = vmatpush1.bf16.msra.mxu0 %v6933_v9  ;;  %1955 = vmatpush1.bf16.msra.mxu1 %v6934_v14  ;;  %v6944_v9 = vld [vmem:[#allocation46_spill] sm:$0xff]  ;;  %v6945_v14 = vld [vmem:[#allocation47_spill] sm:$0xff] }
 0x457   :  { %1915 = vmatprep.subr.bf16.mxu0 %v6935_v13  ;;  %1956 = vmatprep.subr.bf16.mxu1 %v6936_v54  ;;  %v6946_v13 = vld [vmem:[#allocation48_spill] sm:$0xff]  ;;  %v6947_v54 = vld [vmem:[#allocation49_spill] sm:$0xff] }
 0x45a   :  { %1916 = vmatpush1.bf16.msra.mxu0 %v6937_v32  ;;  %1957 = vmatpush1.bf16.msra.mxu1 %v6938_v4  ;;  %v6948_v32 = vld [vmem:[#allocation50_spill] sm:$0xff]  ;;  %v6949_v4 = vld [vmem:[#allocation51_spill] sm:$0xff] }
 0x45b   :  { %1917 = vmatprep.subr.bf16.mxu0 %v6939_v35  ;;  %1958 = vmatprep.subr.bf16.mxu1 %v6940_v39  ;;  %v6950_v35 = vld [vmem:[#allocation52_spill] sm:$0xff]  ;;  %v6951_v39 = vld [vmem:[#allocation53_spill] sm:$0xff] }
 0x45e   :  { %1918 = vmatpush1.bf16.msra.mxu0 %v6941_v56  ;;  %1959 = vmatpush1.bf16.msra.mxu1 %v6942_v57  ;;  %v6952_v56 = vld [vmem:[#allocation54_spill] sm:$0xff]  ;;  %v6953_v57 = vld [vmem:[#allocation55_spill] sm:$0xff] }
 0x45f   :  { %1919 = vmatprep.subr.bf16.mxu0 %v6943_v10  ;;  %1960 = vmatprep.subr.bf16.mxu1 %v6944_v9  ;;  %v6954_v10 = vld [vmem:[#allocation56_spill] sm:$0xff]  ;;  %v6955_v9 = vld [vmem:[#allocation57_spill] sm:$0xff] }
 0x462   :  { %1920 = vmatpush1.bf16.msra.mxu0 %v6945_v14  ;;  %1961 = vmatpush1.bf16.msra.mxu1 %v6946_v13  ;;  %v6956_v14 = vld [vmem:[#allocation58_spill] sm:$0xff]  ;;  %v6957_v13 = vld [vmem:[#allocation59_spill] sm:$0xff] }
 0x463   :  { %1921 = vmatprep.subr.bf16.mxu0 %v6947_v54  ;;  %1962 = vmatprep.subr.bf16.mxu1 %v6948_v32  ;;  %v6958_v54 = vld [vmem:[#allocation60_spill] sm:$0xff]  ;;  %v6959_v32 = vld [vmem:[#allocation61_spill] sm:$0xff] }
 0x466   :  { %1922 = vmatpush1.bf16.msra.mxu0 %v6949_v4  ;;  %1963 = vmatpush1.bf16.msra.mxu1 %v6950_v35  ;;  %v6960_v4 = vld [vmem:[#allocation62_spill] sm:$0xff]  ;;  %v6961_v35 = vld [vmem:[#allocation63_spill] sm:$0xff] }
 0x467   :  { %1923 = vmatprep.subr.bf16.mxu0 %v6951_v39  ;;  %1964 = vmatprep.subr.bf16.mxu1 %v6952_v56  ;;  %v6962_v39 = vld [vmem:[#allocation64_spill] sm:$0xff]  ;;  %v6963_v56 = vld [vmem:[#allocation65_spill] sm:$0xff] }
 0x46a   :  { %1924 = vmatpush2.bf16.msra.mxu0 %v6953_v57  ;;  %1965 = vmatpush2.bf16.msra.mxu1 %v6954_v10  ;;  %v6964_v57 = vld [vmem:[#allocation66_spill] sm:$0xff]  ;;  %v6965_v10 = vld [vmem:[#allocation67_spill] sm:$0xff] }
 0x46b   :  { %1925 = vmatprep.subr.bf16.mxu0 %v6955_v9  ;;  %1966 = vmatprep.subr.bf16.mxu1 %v6956_v14  ;;  %v6966_v9 = vld [vmem:[#allocation68_spill] sm:$0xff]  ;;  %v6967_v14 = vld [vmem:[#allocation69_spill] sm:$0xff] }
 0x46e   :  { %1926 = vmatpush2.bf16.msra.mxu0 %v6957_v13  ;;  %1967 = vmatpush2.bf16.msra.mxu1 %v6958_v54  ;;  %v6968_v13 = vld [vmem:[#allocation70_spill] sm:$0xff]  ;;  %v6969_v54 = vld [vmem:[#allocation71_spill] sm:$0xff] }
 0x46f   :  { %1927 = vmatprep.subr.bf16.mxu0 %v6959_v32  ;;  %1968 = vmatprep.subr.bf16.mxu1 %v6960_v4  ;;  %v6970_v32 = vld [vmem:[#allocation72_spill] sm:$0xff]  ;;  %v6971_v4 = vld [vmem:[#allocation73_spill] sm:$0xff] }
 0x472   :  { %1928 = vmatpush2.bf16.msra.mxu0 %v6961_v35  ;;  %1969 = vmatpush2.bf16.msra.mxu1 %v6962_v39  ;;  %v6972_v35 = vld [vmem:[#allocation74_spill] sm:$0xff]  ;;  %v6973_v39 = vld [vmem:[#allocation75_spill] sm:$0xff] }
 0x473   :  { %1929 = vmatprep.subr.bf16.mxu0 %v6963_v56  ;;  %1970 = vmatprep.subr.bf16.mxu1 %v6964_v57  ;;  %v6974_v56 = vld [vmem:[#allocation76_spill] sm:$0xff]  ;;  %v6975_v57 = vld [vmem:[#allocation77_spill] sm:$0xff] }
 0x476   :  { %1930 = vmatpush2.bf16.msra.mxu0 %v6965_v10  ;;  %1971 = vmatpush2.bf16.msra.mxu1 %v6966_v9  ;;  %v6976_v10 = vld [vmem:[#allocation78_spill] sm:$0xff]  ;;  %v6977_v9 = vld [vmem:[#allocation79_spill] sm:$0xff] }
 0x477   :  { %1931 = vmatprep.subr.bf16.mxu0 %v6967_v14  ;;  %1972 = vmatprep.subr.bf16.mxu1 %v6968_v13  ;;  %v6978_v14 = vld [vmem:[#allocation80_spill] sm:$0xff]  ;;  %v6979_v13 = vld [vmem:[#allocation81_spill] sm:$0xff] }
 0x47a   :  { %1932 = vmatpush2.bf16.msra.mxu0 %v6969_v54  ;;  %1973 = vmatpush2.bf16.msra.mxu1 %v6970_v32  ;;  %v6980_v54 = vld [vmem:[#allocation82_spill] sm:$0xff]  ;;  %v6981_v32 = vld [vmem:[#allocation84_spill] sm:$0xff] }
 0x47b   :  { %1933 = vmatprep.subr.bf16.mxu0 %v6971_v4  ;;  %1974 = vmatprep.subr.bf16.mxu1 %v6972_v35  ;;  %v6982_v4 = vld [vmem:[#allocation85_spill] sm:$0xff]  ;;  %v6983_v35 = vld [vmem:[#allocation86_spill] sm:$0xff] }
 0x47e   :  { %1934 = vmatpush2.bf16.msra.mxu0 %v6973_v39  ;;  %1975 = vmatpush2.bf16.msra.mxu1 %v6974_v56  ;;  %v6984_v39 = vld [vmem:[#allocation87_spill] sm:$0xff] }
 0x47f   :  { %1935 = vmatprep.subr.bf16.mxu0 %v6975_v57  ;;  %1976 = vmatprep.subr.bf16.mxu1 %v6976_v10 }
 0x482   :  { %1936 = vmatpush2.bf16.msra.mxu0 %v6977_v9  ;;  %1977 = vmatpush2.bf16.msra.mxu1 %v6978_v14 }
 0x483   :  { %1937 = vmatprep.subr.bf16.mxu0 %v6979_v13  ;;  %1978 = vmatprep.subr.bf16.mxu1 %v6980_v54  ;;  %v1644_v13 = vld [vmem:[#allocation3 + $0xd0] sm:$0xff] }
 0x486   :  { %1938 = vmatpush2.bf16.msra.mxu0 %v6981_v32  ;;  %1979 = vmatpush2.bf16.msra.mxu1 %v6982_v4  ;;  %v1645_v32 = vld [vmem:[#allocation3 + $0xd8] sm:$0xff] }
 0x487   :  { %1989 = vmatprep.subr.bf16.mxu0 %v6983_v35  ;;  %2030 = vmatprep.subr.bf16.mxu1 %v6984_v39 }
 0x4c9   :  { %v1686_v56 = vpop.f32.mrf.mxu0  ;;  %v1727_v57 = vpop.f32.mrf.mxu1 }
 0x4ca   :  { %v1816_v54 = vadd.f32 %v1686_v56, %v1642_v31  ;;  %v1818_v0 = vadd.f32 %v1727_v57, %v1644_v13  ;;  %v1646_v31 = vld [vmem:[#allocation3 + $0xe0] sm:$0xff]  ;;  %v1648_v13 = vld [vmem:[#allocation3 + $0xf0] sm:$0xff] }
 0x4cb   :  { %v1688_v48 = vpop.f32.mrf.mxu0  ;;  %v1729_v10 = vpop.f32.mrf.mxu1 }
 0x4cc   :  { %v1817_v2 = vadd.f32 %v1688_v48, %v1643_v63  ;;  %v3775_v4 = vmul.f32 -1.442695, %v1816_v54  ;;  %v1819_v15 = vadd.f32 %v1729_v10, %v1645_v32  ;;  %v3777_v35 = vmul.f32 -1.442695, %v1818_v0  ;;  %v1647_v0 = vld [vmem:[#allocation3 + $0xe8] sm:$0xff] }
 0x4cd   :  { %v1690_v8 = vpop.f32.mrf.mxu0  ;;  %v1731_v9 = vpop.f32.mrf.mxu1 }
 0x4ce   :  { %v3776_v45 = vmul.f32 -1.442695, %v1817_v2  ;;  %4125 = vpow2.f32 %v3775_v4  ;;  %v3778_v39 = vmul.f32 -1.442695, %v1819_v15  ;;  %v1649_v2 = vld [vmem:[#allocation3 + $0xf8] sm:$0xff] }
 0x4cf   :  { %v1691_v3 = vpop.f32.mrf.mxu0  ;;  %v1732_v14 = vpop.f32.mrf.mxu1  ;;  %4127 = vpow2.f32 %v3777_v35 }
 0x4d0   :  { %4129 = vpow2.f32 %v3776_v45 }
 0x4d1   :  { %4131 = vpow2.f32 %v3778_v39 }
 0x4db   :  { %v4126_v8 = vpop.eup %4125 }
 0x4dc   :  { %v4128_v9 = vpop.eup %4127  ;;  %v1830_v14 = vadd.f32 1.0, %v4126_v8 }
 0x4dd   :  { %v4130_v3 = vpop.eup %4129  ;;  %v1842_v25 = vadd.f32 1.0, %v4128_v9 }
 0x4de   :  { %v4132_v40 = vpop.eup %4131  ;;  %v1831_v58 = vadd.f32 1.0, %v4130_v3  ;;  %4133 = vrcp.f32 %v1830_v14 }
 0x4df   :  { %v1843_v63 = vadd.f32 1.0, %v4132_v40  ;;  %4135 = vrcp.f32 %v1842_v25 }
 0x4e0   :  { %4137 = vrcp.f32 %v1831_v58 }
 0x4eb   :  { %v4134_v3 = vpop.eup %4133 }
 0x4ec   :  { %v4136_v25 = vpop.eup %4135 }
 0x4ed   :  { %v4138_v14 = vpop.eup %4137 }
 0x509   :  { %v1768_v54 = vpop.f32.mrf.mxu0  ;;  %v1809_v32 = vpop.f32.mrf.mxu1 }
 0x50a   :  { %v1820_v15 = vadd.f32 %v1768_v54, %v1646_v31  ;;  %v1822_v4 = vadd.f32 %v1809_v32, %v1648_v13  ;;  %v1862_v13 = vmul.f32 %v4136_v25, %v5411_v6 }
 0x50b   :  { %v1770_v45 = vpop.f32.mrf.mxu0  ;;  %v1811_v35 = vpop.f32.mrf.mxu1 }
 0x50c   :  { %4139 = vtanh.f32 %v1820_v15  ;;  %v3779_v39 = vmul.f32 -1.442695, %v1822_v4  ;;  %v1821_v48 = vadd.f32 %v1770_v45, %v1647_v0  ;;  %v1823_v56 = vadd.f32 %v1811_v35, %v1649_v2  ;;  %v5573_v2 = vpop.permute.xlu1 %1875 }
 0x50d   :  { %4141 = vrcp.f32 %v1843_v63  ;;  %v1772_v10 = vpop.f32.mrf.mxu0  ;;  %v1813_v57 = vpop.f32.mrf.mxu1  ;;  %6985 = vst [vmem:[#allocation93_spill] sm:$0xff] %v5573_v2  ;;  %vm1877_vm11 = vcmp.eq.s32.totalorder %v5573_v2, 1  ;;  %v7008_v2 = vld [vmem:[#allocation145_spill] sm:$0xff] }
 0x50e   :  { %4143 = vpow2.f32 %v3779_v39  ;;  %v3780_v8 = vmul.f32 -1.442695, %v1823_v56  ;;  %vm3889_vm0 = vmpackc.low %vm1877_vm11, %vm1622_vm10 }
 0x50f   :  { %4145 = vtanh.f32 %v1821_v48  ;;  %v1773_v40 = vpop.f32.mrf.mxu0  ;;  %v1814_v9 = vpop.f32.mrf.mxu1 }
 0x510   :  { %4147 = vpow2.f32 %v3780_v8 }
 0x519   :  { %v4140_v31 = vpop.eup %4139 }
 0x51a   :  { %v4142_v58 = vpop.eup %4141  ;;  %v1864_v54 = vmul.f32 %v4140_v31, %v4134_v3 }
 0x51b   :  { %v4144_v32 = vpop.eup %4143  ;;  %v1863_v45 = vmul.f32 %v4142_v58, %v5416_v49  ;;  %v6990_v58 = vld [vmem:[#allocation127_spill] sm:$0xff] }
 0x51c   :  { %v4146_v0 = vpop.eup %4145  ;;  %v1866_v63 = vadd.f32 %v1864_v54, %v1862_v13  ;;  %v1856_v15 = vadd.f32 1.0, %v4144_v32  ;;  %v6991_v13 = vld [vmem:[#allocation128_spill] sm:$0xff]  ;;  %v6992_v54 = vld [vmem:[#allocation129_spill] sm:$0xff]  ;;  %v6993_v32 = vld [vmem:[#allocation130_spill] sm:$0xff] }
 0x51d   :  { %v4148_v4 = vpop.eup %4147  ;;  %v1865_v35 = vmul.f32 %v4146_v0, %v4138_v14  ;;  %v6994_v0 = vld [vmem:[#allocation131_spill] sm:$0xff] }
 0x51e   :  { %4149 = vtanh.f32 %v1866_v63  ;;  %v1857_v39 = vadd.f32 1.0, %v4148_v4  ;;  %v5580_v48 = vsel %vm1877_vm11, %v1866_v63, %v5411_v6  ;;  %v6995_v63 = vld [vmem:[#allocation132_spill] sm:$0xff]  ;;  %v6997_v4 = vld [vmem:[#allocation134_spill] sm:$0xff] }
 0x51f   :  { %4151 = vrcp.f32 %v1856_v15  ;;  %v1867_v56 = vadd.f32 %v1865_v35, %v1863_v45  ;;  %v6996_v15 = vld [vmem:[#allocation133_spill] sm:$0xff]  ;;  %v6998_v45 = vld [vmem:[#allocation135_spill] sm:$0xff]  ;;  %v6999_v35 = vld [vmem:[#allocation136_spill] sm:$0xff] }
 0x520   :  { %4153 = vrcp.f32 %v1857_v39  ;;  %v7000_v39 = vld [vmem:[#allocation137_spill] sm:$0xff] }
 0x521   :  { %4155 = vtanh.f32 %v1867_v56  ;;  %v5585_v10 = vsel %vm1877_vm11, %v1867_v56, %v5416_v49  ;;  %v7001_v56 = vld [vmem:[#allocation138_spill] sm:$0xff] }
 0x52b   :  { %v4150_v57 = vpop.eup %4149 }
 0x52c   :  { %v4152_v8 = vpop.eup %4151 }
 0x52d   :  { %v4154_v40 = vpop.eup %4153  ;;  %v5587_v9 = vmul.f32 %v4152_v8, %v4150_v57  ;;  %v7002_v57 = vld [vmem:[#allocation139_spill] sm:$0xff]  ;;  %v7003_v8 = vld [vmem:[#allocation140_spill] sm:$0xff] }
 0x52e   :  { %v4156_v3 = vpop.eup %4155 }
 0x52f   :  { %6986 = vst [vmem:[#allocation94_spill] sm:$0xff] %v5587_v9  ;;  %v5589_v25 = vmul.f32 %v4156_v3, %v4154_v40  ;;  %v5595_v6 = vsel %vm1877_vm11, %v5587_v9, %v5426_v52  ;;  %v6988_v52 = vld [vmem:[#allocation125_spill] sm:$0xff]  ;;  %v7005_v3 = vld [vmem:[#allocation142_spill] sm:$0xff]  ;;  %v7007_v9 = vld [vmem:[#allocation144_spill] sm:$0xff] }
 0x530   :  { %v5607_v31 = vpack.c.bf16 %v5595_v6, %v5595_v6  ;;  %v7004_v40 = vld [vmem:[#allocation141_spill] sm:$0xff] }
 0x531   :  { %6987 = vst [vmem:[#allocation95_spill] sm:$0xff] %v5589_v25  ;;  %v5601_v49 = vsel %vm1877_vm11, %v5589_v25, %v5432_v62  ;;  %v6989_v62 = vld [vmem:[#allocation126_spill] sm:$0xff] }
 0x532   :  { %v1906_v14 = vpack.c.bf16 %v5601_v49, %v5601_v49  ;;  %v7009_v25 = vld [vmem:[#allocation146_spill] sm:$0xff] }
 0x534   :  { %1939 = vmatprep.mubr.bf16.mxu0 %v1906_v14  ;;  %1980 = vmatprep.mubr.bf16.mxu1 %v1906_v14 }
 0x535   :  { %1940 = vmatmul.mubr.bf16.vlgmr.msra.gmra.mxu0 %v5607_v31  ;;  %1981 = vmatmul.mubr.bf16.vlgmr.msra.gmra.mxu1 %v5607_v31 }
 0x536   :  { %1990 = vmatpush1.bf16.msra.mxu0 %v6710_v12  ;;  %2031 = vmatpush1.bf16.msra.mxu1 %v6711_v11 }
 0x537   :  { %2021 = vmatprep.mubr.bf16.mxu0 %v1906_v14  ;;  %2062 = vmatprep.mubr.bf16.mxu1 %v1906_v14  ;;  %v7006_v14 = vld [vmem:[#allocation143_spill] sm:$0xff] }
 0x538   :  { %1991 = vmatprep.subr.bf16.mxu0 %v6712_v17  ;;  %2032 = vmatprep.subr.bf16.mxu1 %v6713_v22 }
 0x53a   :  { %1992 = vmatpush1.bf16.msra.mxu0 %v6714_v33  ;;  %2033 = vmatpush1.bf16.msra.mxu1 %v6715_v47 }
 0x53b   :  { %1993 = vmatprep.subr.bf16.mxu0 %v6716_v50  ;;  %2034 = vmatprep.subr.bf16.mxu1 %v6800_v34 }
 0x53e   :  { %1994 = vmatpush1.bf16.msra.mxu0 %v6801_v24  ;;  %2035 = vmatpush1.bf16.msra.mxu1 %v6802_v18 }
 0x53f   :  { %1995 = vmatprep.subr.bf16.mxu0 %v6803_v51  ;;  %2036 = vmatprep.subr.bf16.mxu1 %v6804_v38 }
 0x542   :  { %1996 = vmatpush1.bf16.msra.mxu0 %v6805_v43  ;;  %2037 = vmatpush1.bf16.msra.mxu1 %v6806_v29 }
 0x543   :  { %1997 = vmatprep.subr.bf16.mxu0 %v6807_v30  ;;  %2038 = vmatprep.subr.bf16.mxu1 %v6808_v27 }
 0x546   :  { %1998 = vmatpush1.bf16.msra.mxu0 %v6809_v44  ;;  %2039 = vmatpush1.bf16.msra.mxu1 %v6810_v21 }
 0x547   :  { %1999 = vmatprep.subr.bf16.mxu0 %v6894_v1  ;;  %2040 = vmatprep.subr.bf16.mxu1 %v6895_v7 }
 0x54a   :  { %2000 = vmatpush1.bf16.msra.mxu0 %v6896_v41  ;;  %2041 = vmatpush1.bf16.msra.mxu1 %v6897_v16 }
 0x54b   :  { %2001 = vmatprep.subr.bf16.mxu0 %v6898_v5  ;;  %2042 = vmatprep.subr.bf16.mxu1 %v6899_v59 }
 0x54e   :  { %2002 = vmatpush1.bf16.msra.mxu0 %v6900_v26  ;;  %2043 = vmatpush1.bf16.msra.mxu1 %v6901_v60 }
 0x54f   :  { %2003 = vmatprep.subr.bf16.mxu0 %v6819_v55  ;;  %2044 = vmatprep.subr.bf16.mxu1 %v6820_v28 }
 0x552   :  { %2004 = vmatpush1.bf16.msra.mxu0 %v6821_v19  ;;  %2045 = vmatpush1.bf16.msra.mxu1 %v6902_v42 }
 0x553   :  { %2005 = vmatprep.subr.bf16.mxu0 %v6823_v46  ;;  %2046 = vmatprep.subr.bf16.mxu1 %v6824_v53 }
 0x556   :  { %2006 = vmatpush2.bf16.msra.mxu0 %v6825_v23  ;;  %2047 = vmatpush2.bf16.msra.mxu1 %v6826_v37 }
 0x557   :  { %2007 = vmatprep.subr.bf16.mxu0 %v6827_v20  ;;  %2048 = vmatprep.subr.bf16.mxu1 %v6828_v36 }
 0x55a   :  { %2008 = vmatpush2.bf16.msra.mxu0 %v6829_v61  ;;  %2049 = vmatpush2.bf16.msra.mxu1 %v6988_v52 }
 0x55b   :  { %2009 = vmatprep.subr.bf16.mxu0 %v6989_v62  ;;  %2050 = vmatprep.subr.bf16.mxu1 %v6990_v58 }
 0x55e   :  { %2010 = vmatpush2.bf16.msra.mxu0 %v6991_v13  ;;  %2051 = vmatpush2.bf16.msra.mxu1 %v6992_v54 }
 0x55f   :  { %2011 = vmatprep.subr.bf16.mxu0 %v6993_v32  ;;  %2052 = vmatprep.subr.bf16.mxu1 %v6994_v0 }
 0x562   :  { %2012 = vmatpush2.bf16.msra.mxu0 %v6995_v63  ;;  %2053 = vmatpush2.bf16.msra.mxu1 %v6996_v15  ;;  %v1897_v15 = vld [vmem:[#allocation3 + $0x100] sm:$0xff]  ;;  %v1898_v63 = vld [vmem:[#allocation3 + $0x108] sm:$0xff] }
 0x563   :  { %2013 = vmatprep.subr.bf16.mxu0 %v6997_v4  ;;  %2054 = vmatprep.subr.bf16.mxu1 %v6998_v45 }
 0x566   :  { %2014 = vmatpush2.bf16.msra.mxu0 %v6999_v35  ;;  %2055 = vmatpush2.bf16.msra.mxu1 %v7000_v39  ;;  %v7010_v35 = vld [vmem:[#allocation147_spill] sm:$0xff]  ;;  %v7011_v39 = vld [vmem:[#allocation148_spill] sm:$0xff] }
 0x567   :  { %2015 = vmatprep.subr.bf16.mxu0 %v7001_v56  ;;  %2056 = vmatprep.subr.bf16.mxu1 %v7002_v57  ;;  %v7012_v56 = vld [vmem:[#allocation149_spill] sm:$0xff] }
 0x568   :  { %v7013_v57 = vld [vmem:[#allocation21_spill] sm:$0xff] }
 0x56a   :  { %2016 = vmatpush2.bf16.msra.mxu0 %v7003_v8  ;;  %2057 = vmatpush2.bf16.msra.mxu1 %v7004_v40  ;;  %v7014_v8 = vld [vmem:[#allocation23_spill] sm:$0xff] }
 0x56b   :  { %2017 = vmatprep.subr.bf16.mxu0 %v7005_v3  ;;  %2058 = vmatprep.subr.bf16.mxu1 %v7006_v14  ;;  %v7015_v14 = vld [vmem:[#allocation22_spill] sm:$0xff]  ;;  %v7024_v3 = vld [vmem:[#allocation32_spill] sm:$0xff] }
 0x56e   :  { %2018 = vmatpush2.bf16.msra.mxu0 %v7007_v9  ;;  %2059 = vmatpush2.bf16.msra.mxu1 %v7008_v2  ;;  %v7016_v9 = vld [vmem:[#allocation24_spill] sm:$0xff]  ;;  %v7017_v2 = vld [vmem:[#allocation25_spill] sm:$0xff] }
 0x56f   :  { %2019 = vmatprep.subr.bf16.mxu0 %v7009_v25  ;;  %2060 = vmatprep.subr.bf16.mxu1 %v7010_v35  ;;  %v7018_v25 = vld [vmem:[#allocation26_spill] sm:$0xff]  ;;  %v7019_v35 = vld [vmem:[#allocation27_spill] sm:$0xff] }
 0x572   :  { %2020 = vmatpush2.bf16.msra.mxu0 %v7011_v39  ;;  %2061 = vmatpush2.bf16.msra.mxu1 %v7012_v56  ;;  %v7020_v39 = vld [vmem:[#allocation28_spill] sm:$0xff]  ;;  %v7021_v56 = vld [vmem:[#allocation29_spill] sm:$0xff] }
 0x573   :  { %2162 = vmatprep.subr.bf16.mxu0 %v7013_v57  ;;  %2203 = vmatprep.subr.bf16.mxu1 %v7014_v8  ;;  %v7022_v57 = vld [vmem:[#allocation30_spill] sm:$0xff]  ;;  %v7023_v8 = vld [vmem:[#allocation31_spill] sm:$0xff] }
 0x575   :  { %2022 = vmatmul.mubr.bf16.vlgmr.msra.gmra.mxu0 %v5607_v31  ;;  %2063 = vmatmul.mubr.bf16.vlgmr.msra.gmra.mxu1 %v5607_v31  ;;  %v7025_v31 = vld [vmem:[#allocation33_spill] sm:$0xff] }
 0x576   :  { %2163 = vmatpush1.bf16.msra.mxu0 %v7015_v14  ;;  %2204 = vmatpush1.bf16.msra.mxu1 %v7016_v9  ;;  %v7026_v14 = vld [vmem:[#allocation34_spill] sm:$0xff]  ;;  %v7027_v9 = vld [vmem:[#allocation35_spill] sm:$0xff] }
 0x577   :  { %2164 = vmatprep.subr.bf16.mxu0 %v7017_v2  ;;  %2205 = vmatprep.subr.bf16.mxu1 %v7018_v25  ;;  %v7028_v2 = vld [vmem:[#allocation36_spill] sm:$0xff]  ;;  %v7029_v25 = vld [vmem:[#allocation37_spill] sm:$0xff] }
 0x57a   :  { %2165 = vmatpush1.bf16.msra.mxu0 %v7019_v35  ;;  %2206 = vmatpush1.bf16.msra.mxu1 %v7020_v39  ;;  %v7030_v35 = vld [vmem:[#allocation38_spill] sm:$0xff]  ;;  %v7031_v39 = vld [vmem:[#allocation39_spill] sm:$0xff] }
 0x57b   :  { %2166 = vmatprep.subr.bf16.mxu0 %v7021_v56  ;;  %2207 = vmatprep.subr.bf16.mxu1 %v7022_v57  ;;  %v7032_v56 = vld [vmem:[#allocation40_spill] sm:$0xff]  ;;  %v7033_v57 = vld [vmem:[#allocation41_spill] sm:$0xff] }
 0x57e   :  { %2167 = vmatpush1.bf16.msra.mxu0 %v7023_v8  ;;  %2208 = vmatpush1.bf16.msra.mxu1 %v7024_v3  ;;  %v7034_v8 = vld [vmem:[#allocation42_spill] sm:$0xff]  ;;  %v7035_v3 = vld [vmem:[#allocation43_spill] sm:$0xff] }
 0x57f   :  { %2168 = vmatprep.subr.bf16.mxu0 %v7025_v31  ;;  %2209 = vmatprep.subr.bf16.mxu1 %v7026_v14  ;;  %v7036_v31 = vld [vmem:[#allocation44_spill] sm:$0xff]  ;;  %v7037_v14 = vld [vmem:[#allocation45_spill] sm:$0xff] }
 0x582   :  { %2169 = vmatpush1.bf16.msra.mxu0 %v7027_v9  ;;  %2210 = vmatpush1.bf16.msra.mxu1 %v7028_v2  ;;  %v7038_v9 = vld [vmem:[#allocation46_spill] sm:$0xff]  ;;  %v7039_v2 = vld [vmem:[#allocation47_spill] sm:$0xff] }
 0x583   :  { %2170 = vmatprep.subr.bf16.mxu0 %v7029_v25  ;;  %2211 = vmatprep.subr.bf16.mxu1 %v7030_v35  ;;  %v7040_v25 = vld [vmem:[#allocation48_spill] sm:$0xff]  ;;  %v7041_v35 = vld [vmem:[#allocation49_spill] sm:$0xff] }
 0x586   :  { %2171 = vmatpush1.bf16.msra.mxu0 %v7031_v39  ;;  %2212 = vmatpush1.bf16.msra.mxu1 %v7032_v56  ;;  %v7042_v39 = vld [vmem:[#allocation50_spill] sm:$0xff]  ;;  %v7043_v56 = vld [vmem:[#allocation51_spill] sm:$0xff] }
 0x587   :  { %2172 = vmatprep.subr.bf16.mxu0 %v7033_v57  ;;  %2213 = vmatprep.subr.bf16.mxu1 %v7034_v8  ;;  %v7044_v57 = vld [vmem:[#allocation52_spill] sm:$0xff]  ;;  %v7045_v8 = vld [vmem:[#allocation53_spill] sm:$0xff] }
 0x58a   :  { %2173 = vmatpush1.bf16.msra.mxu0 %v7035_v3  ;;  %2214 = vmatpush1.bf16.msra.mxu1 %v7036_v31  ;;  %v7046_v3 = vld [vmem:[#allocation54_spill] sm:$0xff]  ;;  %v7047_v31 = vld [vmem:[#allocation55_spill] sm:$0xff] }
 0x58b   :  { %2174 = vmatprep.subr.bf16.mxu0 %v7037_v14  ;;  %2215 = vmatprep.subr.bf16.mxu1 %v7038_v9  ;;  %v7048_v14 = vld [vmem:[#allocation56_spill] sm:$0xff]  ;;  %v7049_v9 = vld [vmem:[#allocation57_spill] sm:$0xff] }
 0x58e   :  { %2175 = vmatpush1.bf16.msra.mxu0 %v7039_v2  ;;  %2216 = vmatpush1.bf16.msra.mxu1 %v7040_v25  ;;  %v7050_v2 = vld [vmem:[#allocation58_spill] sm:$0xff]  ;;  %v7051_v25 = vld [vmem:[#allocation59_spill] sm:$0xff] }
 0x58f   :  { %2176 = vmatprep.subr.bf16.mxu0 %v7041_v35  ;;  %2217 = vmatprep.subr.bf16.mxu1 %v7042_v39  ;;  %v7052_v35 = vld [vmem:[#allocation60_spill] sm:$0xff]  ;;  %v7053_v39 = vld [vmem:[#allocation61_spill] sm:$0xff] }
 0x592   :  { %2177 = vmatpush1.bf16.msra.mxu0 %v7043_v56  ;;  %2218 = vmatpush1.bf16.msra.mxu1 %v7044_v57  ;;  %v7054_v56 = vld [vmem:[#allocation62_spill] sm:$0xff]  ;;  %v7055_v57 = vld [vmem:[#allocation63_spill] sm:$0xff] }
 0x593   :  { %2178 = vmatprep.subr.bf16.mxu0 %v7045_v8  ;;  %2219 = vmatprep.subr.bf16.mxu1 %v7046_v3  ;;  %v7056_v8 = vld [vmem:[#allocation64_spill] sm:$0xff]  ;;  %v7057_v3 = vld [vmem:[#allocation65_spill] sm:$0xff] }
 0x596   :  { %2179 = vmatpush2.bf16.msra.mxu0 %v7047_v31  ;;  %2220 = vmatpush2.bf16.msra.mxu1 %v7048_v14  ;;  %v7058_v31 = vld [vmem:[#allocation66_spill] sm:$0xff]  ;;  %v7059_v14 = vld [vmem:[#allocation67_spill] sm:$0xff] }
 0x597   :  { %2180 = vmatprep.subr.bf16.mxu0 %v7049_v9  ;;  %2221 = vmatprep.subr.bf16.mxu1 %v7050_v2  ;;  %v7060_v9 = vld [vmem:[#allocation68_spill] sm:$0xff]  ;;  %v7061_v2 = vld [vmem:[#allocation69_spill] sm:$0xff] }
 0x59a   :  { %2181 = vmatpush2.bf16.msra.mxu0 %v7051_v25  ;;  %2222 = vmatpush2.bf16.msra.mxu1 %v7052_v35  ;;  %v7062_v25 = vld [vmem:[#allocation70_spill] sm:$0xff]  ;;  %v7063_v35 = vld [vmem:[#allocation71_spill] sm:$0xff] }
 0x59b   :  { %2182 = vmatprep.subr.bf16.mxu0 %v7053_v39  ;;  %2223 = vmatprep.subr.bf16.mxu1 %v7054_v56  ;;  %v7064_v39 = vld [vmem:[#allocation72_spill] sm:$0xff]  ;;  %v7065_v56 = vld [vmem:[#allocation73_spill] sm:$0xff] }
 0x59e   :  { %2183 = vmatpush2.bf16.msra.mxu0 %v7055_v57  ;;  %2224 = vmatpush2.bf16.msra.mxu1 %v7056_v8  ;;  %v7066_v57 = vld [vmem:[#allocation74_spill] sm:$0xff]  ;;  %v7067_v8 = vld [vmem:[#allocation75_spill] sm:$0xff] }
 0x59f   :  { %2184 = vmatprep.subr.bf16.mxu0 %v7057_v3  ;;  %2225 = vmatprep.subr.bf16.mxu1 %v7058_v31  ;;  %v7068_v3 = vld [vmem:[#allocation76_spill] sm:$0xff]  ;;  %v7069_v31 = vld [vmem:[#allocation77_spill] sm:$0xff] }
 0x5a2   :  { %2185 = vmatpush2.bf16.msra.mxu0 %v7059_v14  ;;  %2226 = vmatpush2.bf16.msra.mxu1 %v7060_v9  ;;  %v7070_v14 = vld [vmem:[#allocation78_spill] sm:$0xff]  ;;  %v7071_v9 = vld [vmem:[#allocation79_spill] sm:$0xff] }
 0x5a3   :  { %2186 = vmatprep.subr.bf16.mxu0 %v7061_v2  ;;  %2227 = vmatprep.subr.bf16.mxu1 %v7062_v25  ;;  %v7072_v2 = vld [vmem:[#allocation80_spill] sm:$0xff]  ;;  %v7073_v25 = vld [vmem:[#allocation81_spill] sm:$0xff] }
 0x5a6   :  { %2187 = vmatpush2.bf16.msra.mxu0 %v7063_v35  ;;  %2228 = vmatpush2.bf16.msra.mxu1 %v7064_v39  ;;  %v7074_v35 = vld [vmem:[#allocation82_spill] sm:$0xff]  ;;  %v7075_v39 = vld [vmem:[#allocation84_spill] sm:$0xff] }
 0x5a7   :  { %2188 = vmatprep.subr.bf16.mxu0 %v7065_v56  ;;  %2229 = vmatprep.subr.bf16.mxu1 %v7066_v57  ;;  %v7076_v56 = vld [vmem:[#allocation85_spill] sm:$0xff]  ;;  %v7077_v57 = vld [vmem:[#allocation86_spill] sm:$0xff] }
 0x5aa   :  { %2189 = vmatpush2.bf16.msra.mxu0 %v7067_v8  ;;  %2230 = vmatpush2.bf16.msra.mxu1 %v7068_v3  ;;  %v7078_v8 = vld [vmem:[#allocation87_spill] sm:$0xff] }
 0x5ab   :  { %2190 = vmatprep.subr.bf16.mxu0 %v7069_v31  ;;  %2231 = vmatprep.subr.bf16.mxu1 %v7070_v14 }
 0x5ae   :  { %2191 = vmatpush2.bf16.msra.mxu0 %v7071_v9  ;;  %2232 = vmatpush2.bf16.msra.mxu1 %v7072_v2 }
 0x5af   :  { %2192 = vmatprep.subr.bf16.mxu0 %v7073_v25  ;;  %2233 = vmatprep.subr.bf16.mxu1 %v7074_v35  ;;  %v1899_v25 = vld [vmem:[#allocation3 + $0x110] sm:$0xff] }
 0x5b2   :  { %2193 = vmatpush2.bf16.msra.mxu0 %v7075_v39  ;;  %2234 = vmatpush2.bf16.msra.mxu1 %v7076_v56  ;;  %v1900_v39 = vld [vmem:[#allocation3 + $0x118] sm:$0xff] }
 0x5b3   :  { %2244 = vmatprep.subr.bf16.mxu0 %v7077_v57  ;;  %2285 = vmatprep.subr.bf16.mxu1 %v7078_v8 }
 0x5f5   :  { %v1941_v3 = vpop.f32.mrf.mxu0  ;;  %v1982_v31 = vpop.f32.mrf.mxu1 }
 0x5f6   :  { %v2071_v35 = vadd.f32 %v1941_v3, %v1897_v15  ;;  %v2073_v0 = vadd.f32 %v1982_v31, %v1899_v25  ;;  %v1901_v15 = vld [vmem:[#allocation3 + $0x120] sm:$0xff]  ;;  %v1903_v25 = vld [vmem:[#allocation3 + $0x130] sm:$0xff] }
 0x5f7   :  { %v1943_v40 = vpop.f32.mrf.mxu0  ;;  %v1984_v14 = vpop.f32.mrf.mxu1 }
 0x5f8   :  { %v2072_v32 = vadd.f32 %v1943_v40, %v1898_v63  ;;  %v3782_v56 = vmul.f32 -1.442695, %v2071_v35  ;;  %v2074_v54 = vadd.f32 %v1984_v14, %v1900_v39  ;;  %v3784_v57 = vmul.f32 -1.442695, %v2073_v0  ;;  %v1902_v0 = vld [vmem:[#allocation3 + $0x128] sm:$0xff] }
 0x5f9   :  { %v1945_v45 = vpop.f32.mrf.mxu0  ;;  %v1986_v9 = vpop.f32.mrf.mxu1 }
 0x5fa   :  { %v3783_v13 = vmul.f32 -1.442695, %v2072_v32  ;;  %4157 = vpow2.f32 %v3782_v56  ;;  %v3785_v8 = vmul.f32 -1.442695, %v2074_v54  ;;  %v1904_v32 = vld [vmem:[#allocation3 + $0x138] sm:$0xff] }
 0x5fb   :  { %v1946_v4 = vpop.f32.mrf.mxu0  ;;  %v1987_v2 = vpop.f32.mrf.mxu1  ;;  %4159 = vpow2.f32 %v3784_v57 }
 0x5fc   :  { %4161 = vpow2.f32 %v3783_v13 }
 0x5fd   :  { %4163 = vpow2.f32 %v3785_v8 }
 0x607   :  { %v4158_v45 = vpop.eup %4157 }
 0x608   :  { %v4160_v9 = vpop.eup %4159  ;;  %v2085_v2 = vadd.f32 1.0, %v4158_v45 }
 0x609   :  { %v4162_v4 = vpop.eup %4161  ;;  %v2097_v62 = vadd.f32 1.0, %v4160_v9 }
 0x60a   :  { %v4164_v58 = vpop.eup %4163  ;;  %v2086_v52 = vadd.f32 1.0, %v4162_v4  ;;  %4165 = vrcp.f32 %v2085_v2 }
 0x60b   :  { %v2098_v63 = vadd.f32 1.0, %v4164_v58  ;;  %4167 = vrcp.f32 %v2097_v62 }
 0x60c   :  { %4169 = vrcp.f32 %v2086_v52 }
 0x617   :  { %v4166_v4 = vpop.eup %4165 }
 0x618   :  { %v4168_v62 = vpop.eup %4167 }
 0x619   :  { %v4170_v2 = vpop.eup %4169 }
 0x635   :  { %v2023_v35 = vpop.f32.mrf.mxu0  ;;  %v2064_v39 = vpop.f32.mrf.mxu1 }
 0x636   :  { %v2075_v54 = vadd.f32 %v2023_v35, %v1901_v15  ;;  %v2077_v56 = vadd.f32 %v2064_v39, %v1903_v25  ;;  %v2117_v25 = vmul.f32 %v4168_v62, %v5580_v48 }
 0x637   :  { %v2025_v13 = vpop.f32.mrf.mxu0  ;;  %v2066_v57 = vpop.f32.mrf.mxu1 }
 0x638   :  { %4171 = vtanh.f32 %v2075_v54  ;;  %v3786_v8 = vmul.f32 -1.442695, %v2077_v56  ;;  %v2076_v40 = vadd.f32 %v2025_v13, %v1902_v0  ;;  %v2078_v3 = vadd.f32 %v2066_v57, %v1904_v32  ;;  %v5742_v32 = vpop.permute.xlu0 %2130 }
 0x639   :  { %4173 = vrcp.f32 %v2098_v63  ;;  %v2027_v14 = vpop.f32.mrf.mxu0  ;;  %v2068_v31 = vpop.f32.mrf.mxu1  ;;  %7079 = vst [vmem:[#allocation96_spill] sm:$0xff] %v5742_v32  ;;  %vm2132_vm12 = vcmp.eq.s32.totalorder %v5742_v32, 1  ;;  %v7102_v32 = vld [vmem:[#allocation145_spill] sm:$0xff] }
 0x63a   :  { %4175 = vpow2.f32 %v3786_v8  ;;  %v3787_v45 = vmul.f32 -1.442695, %v2078_v3 }
 0x63b   :  { %4177 = vtanh.f32 %v2076_v40  ;;  %v2028_v58 = vpop.f32.mrf.mxu0  ;;  %v2069_v9 = vpop.f32.mrf.mxu1 }
 0x63c   :  { %4179 = vpow2.f32 %v3787_v45 }
 0x645   :  { %v4172_v15 = vpop.eup %4171 }
 0x646   :  { %v4174_v52 = vpop.eup %4173  ;;  %v2119_v35 = vmul.f32 %v4172_v15, %v4166_v4 }
 0x647   :  { %v4176_v39 = vpop.eup %4175  ;;  %v2118_v13 = vmul.f32 %v4174_v52, %v5585_v10  ;;  %v7084_v52 = vld [vmem:[#allocation127_spill] sm:$0xff] }
 0x648   :  { %v4178_v0 = vpop.eup %4177  ;;  %v2121_v63 = vadd.f32 %v2119_v35, %v2117_v25  ;;  %v2111_v54 = vadd.f32 1.0, %v4176_v39  ;;  %v7085_v25 = vld [vmem:[#allocation128_spill] sm:$0xff]  ;;  %v7086_v35 = vld [vmem:[#allocation129_spill] sm:$0xff]  ;;  %v7087_v39 = vld [vmem:[#allocation130_spill] sm:$0xff] }
 0x649   :  { %v4180_v56 = vpop.eup %4179  ;;  %v2120_v57 = vmul.f32 %v4178_v0, %v4170_v2  ;;  %v7088_v0 = vld [vmem:[#allocation131_spill] sm:$0xff] }
 0x64a   :  { %4181 = vtanh.f32 %v2121_v63  ;;  %v2112_v8 = vadd.f32 1.0, %v4180_v56  ;;  %v5749_v40 = vsel %vm2132_vm12, %v2121_v63, %v5580_v48  ;;  %v7089_v63 = vld [vmem:[#allocation132_spill] sm:$0xff]  ;;  %v7091_v56 = vld [vmem:[#allocation134_spill] sm:$0xff] }
 0x64b   :  { %4183 = vrcp.f32 %v2111_v54  ;;  %v2122_v3 = vadd.f32 %v2120_v57, %v2118_v13  ;;  %v7090_v54 = vld [vmem:[#allocation133_spill] sm:$0xff]  ;;  %v7092_v13 = vld [vmem:[#allocation135_spill] sm:$0xff]  ;;  %v7093_v57 = vld [vmem:[#allocation136_spill] sm:$0xff] }
 0x64c   :  { %4185 = vrcp.f32 %v2112_v8  ;;  %v7094_v8 = vld [vmem:[#allocation137_spill] sm:$0xff] }
 0x64d   :  { %4187 = vtanh.f32 %v2122_v3  ;;  %v5754_v14 = vsel %vm2132_vm12, %v2122_v3, %v5585_v10  ;;  %v7095_v3 = vld [vmem:[#allocation138_spill] sm:$0xff] }
 0x657   :  { %v4182_v31 = vpop.eup %4181 }
 0x658   :  { %v4184_v45 = vpop.eup %4183 }
 0x659   :  { %v4186_v58 = vpop.eup %4185  ;;  %v5756_v9 = vmul.f32 %v4184_v45, %v4182_v31  ;;  %v7096_v31 = vld [vmem:[#allocation139_spill] sm:$0xff]  ;;  %v7097_v45 = vld [vmem:[#allocation140_spill] sm:$0xff] }
 0x65a   :  { %v4188_v4 = vpop.eup %4187 }
 0x65b   :  { %7080 = vst [vmem:[#allocation97_spill] sm:$0xff] %v5756_v9  ;;  %v5758_v62 = vmul.f32 %v4188_v4, %v4186_v58  ;;  %v5764_v48 = vsel %vm2132_vm12, %v5756_v9, %v5595_v6  ;;  %v7082_v6 = vld [vmem:[#allocation125_spill] sm:$0xff]  ;;  %v7099_v4 = vld [vmem:[#allocation142_spill] sm:$0xff]  ;;  %v7101_v9 = vld [vmem:[#allocation144_spill] sm:$0xff] }
 0x65c   :  { %v5776_v15 = vpack.c.bf16 %v5764_v48, %v5764_v48  ;;  %v7098_v58 = vld [vmem:[#allocation141_spill] sm:$0xff] }
 0x65d   :  { %7081 = vst [vmem:[#allocation98_spill] sm:$0xff] %v5758_v62  ;;  %v5770_v10 = vsel %vm2132_vm12, %v5758_v62, %v5601_v49  ;;  %v7083_v49 = vld [vmem:[#allocation126_spill] sm:$0xff] }
 0x65e   :  { %v2161_v2 = vpack.c.bf16 %v5770_v10, %v5770_v10  ;;  %v7103_v62 = vld [vmem:[#allocation146_spill] sm:$0xff] }
 0x660   :  { %2194 = vmatprep.mubr.bf16.mxu0 %v2161_v2  ;;  %2235 = vmatprep.mubr.bf16.mxu1 %v2161_v2 }
 0x661   :  { %2195 = vmatmul.mubr.bf16.vlgmr.msra.gmra.mxu0 %v5776_v15  ;;  %2236 = vmatmul.mubr.bf16.vlgmr.msra.gmra.mxu1 %v5776_v15 }
 0x662   :  { %2245 = vmatpush1.bf16.msra.mxu0 %v6710_v12  ;;  %2286 = vmatpush1.bf16.msra.mxu1 %v6711_v11 }
 0x663   :  { %2276 = vmatprep.mubr.bf16.mxu0 %v2161_v2  ;;  %2317 = vmatprep.mubr.bf16.mxu1 %v2161_v2  ;;  %v7100_v2 = vld [vmem:[#allocation143_spill] sm:$0xff] }
 0x664   :  { %2246 = vmatprep.subr.bf16.mxu0 %v6712_v17  ;;  %2287 = vmatprep.subr.bf16.mxu1 %v6713_v22 }
 0x666   :  { %2247 = vmatpush1.bf16.msra.mxu0 %v6714_v33  ;;  %2288 = vmatpush1.bf16.msra.mxu1 %v6715_v47 }
 0x667   :  { %2248 = vmatprep.subr.bf16.mxu0 %v6716_v50  ;;  %2289 = vmatprep.subr.bf16.mxu1 %v6800_v34 }
 0x66a   :  { %2249 = vmatpush1.bf16.msra.mxu0 %v6801_v24  ;;  %2290 = vmatpush1.bf16.msra.mxu1 %v6802_v18 }
 0x66b   :  { %2250 = vmatprep.subr.bf16.mxu0 %v6803_v51  ;;  %2291 = vmatprep.subr.bf16.mxu1 %v6804_v38 }
 0x66e   :  { %2251 = vmatpush1.bf16.msra.mxu0 %v6805_v43  ;;  %2292 = vmatpush1.bf16.msra.mxu1 %v6806_v29 }
 0x66f   :  { %2252 = vmatprep.subr.bf16.mxu0 %v6807_v30  ;;  %2293 = vmatprep.subr.bf16.mxu1 %v6808_v27 }
 0x672   :  { %2253 = vmatpush1.bf16.msra.mxu0 %v6809_v44  ;;  %2294 = vmatpush1.bf16.msra.mxu1 %v6810_v21 }
 0x673   :  { %2254 = vmatprep.subr.bf16.mxu0 %v6894_v1  ;;  %2295 = vmatprep.subr.bf16.mxu1 %v6895_v7 }
 0x676   :  { %2255 = vmatpush1.bf16.msra.mxu0 %v6896_v41  ;;  %2296 = vmatpush1.bf16.msra.mxu1 %v6897_v16 }
 0x677   :  { %2256 = vmatprep.subr.bf16.mxu0 %v6898_v5  ;;  %2297 = vmatprep.subr.bf16.mxu1 %v6899_v59 }
 0x67a   :  { %2257 = vmatpush1.bf16.msra.mxu0 %v6900_v26  ;;  %2298 = vmatpush1.bf16.msra.mxu1 %v6901_v60 }
 0x67b   :  { %2258 = vmatprep.subr.bf16.mxu0 %v6819_v55  ;;  %2299 = vmatprep.subr.bf16.mxu1 %v6820_v28 }
 0x67e   :  { %2259 = vmatpush1.bf16.msra.mxu0 %v6821_v19  ;;  %2300 = vmatpush1.bf16.msra.mxu1 %v6902_v42 }
 0x67f   :  { %2260 = vmatprep.subr.bf16.mxu0 %v6823_v46  ;;  %2301 = vmatprep.subr.bf16.mxu1 %v6824_v53 }
 0x682   :  { %2261 = vmatpush2.bf16.msra.mxu0 %v6825_v23  ;;  %2302 = vmatpush2.bf16.msra.mxu1 %v6826_v37 }
 0x683   :  { %2262 = vmatprep.subr.bf16.mxu0 %v6827_v20  ;;  %2303 = vmatprep.subr.bf16.mxu1 %v6828_v36 }
 0x686   :  { %2263 = vmatpush2.bf16.msra.mxu0 %v6829_v61  ;;  %2304 = vmatpush2.bf16.msra.mxu1 %v7082_v6 }
 0x687   :  { %2264 = vmatprep.subr.bf16.mxu0 %v7083_v49  ;;  %2305 = vmatprep.subr.bf16.mxu1 %v7084_v52 }
 0x68a   :  { %2265 = vmatpush2.bf16.msra.mxu0 %v7085_v25  ;;  %2306 = vmatpush2.bf16.msra.mxu1 %v7086_v35 }
 0x68b   :  { %2266 = vmatprep.subr.bf16.mxu0 %v7087_v39  ;;  %2307 = vmatprep.subr.bf16.mxu1 %v7088_v0 }
 0x68e   :  { %2267 = vmatpush2.bf16.msra.mxu0 %v7089_v63  ;;  %2308 = vmatpush2.bf16.msra.mxu1 %v7090_v54  ;;  %v2152_v54 = vld [vmem:[#allocation3 + $0x140] sm:$0xff]  ;;  %v2153_v63 = vld [vmem:[#allocation3 + $0x148] sm:$0xff] }
 0x68f   :  { %2268 = vmatprep.subr.bf16.mxu0 %v7091_v56  ;;  %2309 = vmatprep.subr.bf16.mxu1 %v7092_v13 }
 0x692   :  { %2269 = vmatpush2.bf16.msra.mxu0 %v7093_v57  ;;  %2310 = vmatpush2.bf16.msra.mxu1 %v7094_v8  ;;  %v7104_v57 = vld [vmem:[#allocation147_spill] sm:$0xff]  ;;  %v7105_v8 = vld [vmem:[#allocation148_spill] sm:$0xff] }
 0x693   :  { %2270 = vmatprep.subr.bf16.mxu0 %v7095_v3  ;;  %2311 = vmatprep.subr.bf16.mxu1 %v7096_v31  ;;  %v7106_v3 = vld [vmem:[#allocation149_spill] sm:$0xff] }
 0x694   :  { %v7107_v31 = vld [vmem:[#allocation21_spill] sm:$0xff] }
 0x696   :  { %2271 = vmatpush2.bf16.msra.mxu0 %v7097_v45  ;;  %2312 = vmatpush2.bf16.msra.mxu1 %v7098_v58  ;;  %v7108_v45 = vld [vmem:[#allocation23_spill] sm:$0xff] }
 0x697   :  { %2272 = vmatprep.subr.bf16.mxu0 %v7099_v4  ;;  %2313 = vmatprep.subr.bf16.mxu1 %v7100_v2  ;;  %v7109_v2 = vld [vmem:[#allocation22_spill] sm:$0xff]  ;;  %v7118_v4 = vld [vmem:[#allocation32_spill] sm:$0xff] }
 0x69a   :  { %2273 = vmatpush2.bf16.msra.mxu0 %v7101_v9  ;;  %2314 = vmatpush2.bf16.msra.mxu1 %v7102_v32  ;;  %v7110_v9 = vld [vmem:[#allocation24_spill] sm:$0xff]  ;;  %v7111_v32 = vld [vmem:[#allocation25_spill] sm:$0xff] }
 0x69b   :  { %2274 = vmatprep.subr.bf16.mxu0 %v7103_v62  ;;  %2315 = vmatprep.subr.bf16.mxu1 %v7104_v57  ;;  %v7112_v62 = vld [vmem:[#allocation26_spill] sm:$0xff]  ;;  %v7113_v57 = vld [vmem:[#allocation27_spill] sm:$0xff] }
 0x69e   :  { %2275 = vmatpush2.bf16.msra.mxu0 %v7105_v8  ;;  %2316 = vmatpush2.bf16.msra.mxu1 %v7106_v3  ;;  %v7114_v8 = vld [vmem:[#allocation28_spill] sm:$0xff]  ;;  %v7115_v3 = vld [vmem:[#allocation29_spill] sm:$0xff] }
 0x69f   :  { %2417 = vmatprep.subr.bf16.mxu0 %v7107_v31  ;;  %2458 = vmatprep.subr.bf16.mxu1 %v7108_v45  ;;  %v7116_v31 = vld [vmem:[#allocation30_spill] sm:$0xff]  ;;  %v7117_v45 = vld [vmem:[#allocation31_spill] sm:$0xff] }
 0x6a1   :  { %2277 = vmatmul.mubr.bf16.vlgmr.msra.gmra.mxu0 %v5776_v15  ;;  %2318 = vmatmul.mubr.bf16.vlgmr.msra.gmra.mxu1 %v5776_v15  ;;  %v7119_v15 = vld [vmem:[#allocation33_spill] sm:$0xff] }
 0x6a2   :  { %2418 = vmatpush1.bf16.msra.mxu0 %v7109_v2  ;;  %2459 = vmatpush1.bf16.msra.mxu1 %v7110_v9  ;;  %v7120_v2 = vld [vmem:[#allocation34_spill] sm:$0xff]  ;;  %v7121_v9 = vld [vmem:[#allocation35_spill] sm:$0xff] }
 0x6a3   :  { %2419 = vmatprep.subr.bf16.mxu0 %v7111_v32  ;;  %2460 = vmatprep.subr.bf16.mxu1 %v7112_v62  ;;  %v7122_v32 = vld [vmem:[#allocation36_spill] sm:$0xff]  ;;  %v7123_v62 = vld [vmem:[#allocation37_spill] sm:$0xff] }
 0x6a6   :  { %2420 = vmatpush1.bf16.msra.mxu0 %v7113_v57  ;;  %2461 = vmatpush1.bf16.msra.mxu1 %v7114_v8  ;;  %v7124_v57 = vld [vmem:[#allocation38_spill] sm:$0xff]  ;;  %v7125_v8 = vld [vmem:[#allocation39_spill] sm:$0xff] }
 0x6a7   :  { %2421 = vmatprep.subr.bf16.mxu0 %v7115_v3  ;;  %2462 = vmatprep.subr.bf16.mxu1 %v7116_v31  ;;  %v7126_v3 = vld [vmem:[#allocation40_spill] sm:$0xff]  ;;  %v7127_v31 = vld [vmem:[#allocation41_spill] sm:$0xff] }
 0x6aa   :  { %2422 = vmatpush1.bf16.msra.mxu0 %v7117_v45  ;;  %2463 = vmatpush1.bf16.msra.mxu1 %v7118_v4  ;;  %v7128_v45 = vld [vmem:[#allocation42_spill] sm:$0xff]  ;;  %v7129_v4 = vld [vmem:[#allocation43_spill] sm:$0xff] }
 0x6ab   :  { %2423 = vmatprep.subr.bf16.mxu0 %v7119_v15  ;;  %2464 = vmatprep.subr.bf16.mxu1 %v7120_v2  ;;  %v7130_v15 = vld [vmem:[#allocation44_spill] sm:$0xff]  ;;  %v7131_v2 = vld [vmem:[#allocation45_spill] sm:$0xff] }
 0x6ae   :  { %2424 = vmatpush1.bf16.msra.mxu0 %v7121_v9  ;;  %2465 = vmatpush1.bf16.msra.mxu1 %v7122_v32  ;;  %v7132_v9 = vld [vmem:[#allocation46_spill] sm:$0xff]  ;;  %v7133_v32 = vld [vmem:[#allocation47_spill] sm:$0xff] }
 0x6af   :  { %2425 = vmatprep.subr.bf16.mxu0 %v7123_v62  ;;  %2466 = vmatprep.subr.bf16.mxu1 %v7124_v57  ;;  %v7134_v62 = vld [vmem:[#allocation48_spill] sm:$0xff]  ;;  %v7135_v57 = vld [vmem:[#allocation49_spill] sm:$0xff] }
 0x6b2   :  { %2426 = vmatpush1.bf16.msra.mxu0 %v7125_v8  ;;  %2467 = vmatpush1.bf16.msra.mxu1 %v7126_v3  ;;  %v7136_v8 = vld [vmem:[#allocation50_spill] sm:$0xff]  ;;  %v7137_v3 = vld [vmem:[#allocation51_spill] sm:$0xff] }
 0x6b3   :  { %2427 = vmatprep.subr.bf16.mxu0 %v7127_v31  ;;  %2468 = vmatprep.subr.bf16.mxu1 %v7128_v45  ;;  %v7138_v31 = vld [vmem:[#allocation52_spill] sm:$0xff]  ;;  %v7139_v45 = vld [vmem:[#allocation53_spill] sm:$0xff] }
 0x6b6   :  { %2428 = vmatpush1.bf16.msra.mxu0 %v7129_v4  ;;  %2469 = vmatpush1.bf16.msra.mxu1 %v7130_v15  ;;  %v7140_v4 = vld [vmem:[#allocation54_spill] sm:$0xff]  ;;  %v7141_v15 = vld [vmem:[#allocation55_spill] sm:$0xff] }
 0x6b7   :  { %2429 = vmatprep.subr.bf16.mxu0 %v7131_v2  ;;  %2470 = vmatprep.subr.bf16.mxu1 %v7132_v9  ;;  %v7142_v2 = vld [vmem:[#allocation56_spill] sm:$0xff]  ;;  %v7143_v9 = vld [vmem:[#allocation57_spill] sm:$0xff] }
 0x6ba   :  { %2430 = vmatpush1.bf16.msra.mxu0 %v7133_v32  ;;  %2471 = vmatpush1.bf16.msra.mxu1 %v7134_v62  ;;  %v7144_v32 = vld [vmem:[#allocation58_spill] sm:$0xff]  ;;  %v7145_v62 = vld [vmem:[#allocation59_spill] sm:$0xff] }
 0x6bb   :  { %2431 = vmatprep.subr.bf16.mxu0 %v7135_v57  ;;  %2472 = vmatprep.subr.bf16.mxu1 %v7136_v8  ;;  %v7146_v57 = vld [vmem:[#allocation60_spill] sm:$0xff]  ;;  %v7147_v8 = vld [vmem:[#allocation61_spill] sm:$0xff] }
 0x6be   :  { %2432 = vmatpush1.bf16.msra.mxu0 %v7137_v3  ;;  %2473 = vmatpush1.bf16.msra.mxu1 %v7138_v31  ;;  %v7148_v3 = vld [vmem:[#allocation62_spill] sm:$0xff]  ;;  %v7149_v31 = vld [vmem:[#allocation63_spill] sm:$0xff] }
 0x6bf   :  { %2433 = vmatprep.subr.bf16.mxu0 %v7139_v45  ;;  %2474 = vmatprep.subr.bf16.mxu1 %v7140_v4  ;;  %v7150_v45 = vld [vmem:[#allocation64_spill] sm:$0xff]  ;;  %v7151_v4 = vld [vmem:[#allocation65_spill] sm:$0xff] }
 0x6c2   :  { %2434 = vmatpush2.bf16.msra.mxu0 %v7141_v15  ;;  %2475 = vmatpush2.bf16.msra.mxu1 %v7142_v2  ;;  %v7152_v15 = vld [vmem:[#allocation66_spill] sm:$0xff]  ;;  %v7153_v2 = vld [vmem:[#allocation67_spill] sm:$0xff] }
 0x6c3   :  { %2435 = vmatprep.subr.bf16.mxu0 %v7143_v9  ;;  %2476 = vmatprep.subr.bf16.mxu1 %v7144_v32  ;;  %v7154_v9 = vld [vmem:[#allocation68_spill] sm:$0xff]  ;;  %v7155_v32 = vld [vmem:[#allocation69_spill] sm:$0xff] }
 0x6c6   :  { %2436 = vmatpush2.bf16.msra.mxu0 %v7145_v62  ;;  %2477 = vmatpush2.bf16.msra.mxu1 %v7146_v57  ;;  %v7156_v62 = vld [vmem:[#allocation70_spill] sm:$0xff]  ;;  %v7157_v57 = vld [vmem:[#allocation71_spill] sm:$0xff] }
 0x6c7   :  { %2437 = vmatprep.subr.bf16.mxu0 %v7147_v8  ;;  %2478 = vmatprep.subr.bf16.mxu1 %v7148_v3  ;;  %v7158_v8 = vld [vmem:[#allocation72_spill] sm:$0xff]  ;;  %v7159_v3 = vld [vmem:[#allocation73_spill] sm:$0xff] }
 0x6ca   :  { %2438 = vmatpush2.bf16.msra.mxu0 %v7149_v31  ;;  %2479 = vmatpush2.bf16.msra.mxu1 %v7150_v45  ;;  %v7160_v31 = vld [vmem:[#allocation74_spill] sm:$0xff]  ;;  %v7161_v45 = vld [vmem:[#allocation75_spill] sm:$0xff] }
 0x6cb   :  { %2439 = vmatprep.subr.bf16.mxu0 %v7151_v4  ;;  %2480 = vmatprep.subr.bf16.mxu1 %v7152_v15  ;;  %v7162_v4 = vld [vmem:[#allocation76_spill] sm:$0xff]  ;;  %v7163_v15 = vld [vmem:[#allocation77_spill] sm:$0xff] }
 0x6ce   :  { %2440 = vmatpush2.bf16.msra.mxu0 %v7153_v2  ;;  %2481 = vmatpush2.bf16.msra.mxu1 %v7154_v9  ;;  %v7164_v2 = vld [vmem:[#allocation78_spill] sm:$0xff]  ;;  %v7165_v9 = vld [vmem:[#allocation79_spill] sm:$0xff] }
 0x6cf   :  { %2441 = vmatprep.subr.bf16.mxu0 %v7155_v32  ;;  %2482 = vmatprep.subr.bf16.mxu1 %v7156_v62  ;;  %v7166_v32 = vld [vmem:[#allocation80_spill] sm:$0xff]  ;;  %v7167_v62 = vld [vmem:[#allocation81_spill] sm:$0xff] }
 0x6d2   :  { %2442 = vmatpush2.bf16.msra.mxu0 %v7157_v57  ;;  %2483 = vmatpush2.bf16.msra.mxu1 %v7158_v8  ;;  %v7168_v57 = vld [vmem:[#allocation82_spill] sm:$0xff]  ;;  %v7169_v8 = vld [vmem:[#allocation84_spill] sm:$0xff] }
 0x6d3   :  { %2443 = vmatprep.subr.bf16.mxu0 %v7159_v3  ;;  %2484 = vmatprep.subr.bf16.mxu1 %v7160_v31  ;;  %v7170_v3 = vld [vmem:[#allocation85_spill] sm:$0xff]  ;;  %v7171_v31 = vld [vmem:[#allocation86_spill] sm:$0xff] }
 0x6d6   :  { %2444 = vmatpush2.bf16.msra.mxu0 %v7161_v45  ;;  %2485 = vmatpush2.bf16.msra.mxu1 %v7162_v4  ;;  %v7172_v45 = vld [vmem:[#allocation87_spill] sm:$0xff] }
 0x6d7   :  { %2445 = vmatprep.subr.bf16.mxu0 %v7163_v15  ;;  %2486 = vmatprep.subr.bf16.mxu1 %v7164_v2 }
 0x6da   :  { %2446 = vmatpush2.bf16.msra.mxu0 %v7165_v9  ;;  %2487 = vmatpush2.bf16.msra.mxu1 %v7166_v32 }
 0x6db   :  { %2447 = vmatprep.subr.bf16.mxu0 %v7167_v62  ;;  %2488 = vmatprep.subr.bf16.mxu1 %v7168_v57  ;;  %v2154_v62 = vld [vmem:[#allocation3 + $0x150] sm:$0xff] }
 0x6de   :  { %2448 = vmatpush2.bf16.msra.mxu0 %v7169_v8  ;;  %2489 = vmatpush2.bf16.msra.mxu1 %v7170_v3  ;;  %v2155_v8 = vld [vmem:[#allocation3 + $0x158] sm:$0xff] }
 0x6df   :  { %2499 = vmatprep.subr.bf16.mxu0 %v7171_v31  ;;  %2540 = vmatprep.subr.bf16.mxu1 %v7172_v45 }
 0x721   :  { %v2196_v4 = vpop.f32.mrf.mxu0  ;;  %v2237_v15 = vpop.f32.mrf.mxu1 }
 0x722   :  { %v2326_v57 = vadd.f32 %v2196_v4, %v2152_v54  ;;  %v2328_v0 = vadd.f32 %v2237_v15, %v2154_v62  ;;  %v2156_v54 = vld [vmem:[#allocation3 + $0x160] sm:$0xff]  ;;  %v2158_v62 = vld [vmem:[#allocation3 + $0x170] sm:$0xff] }
 0x723   :  { %v2198_v58 = vpop.f32.mrf.mxu0  ;;  %v2239_v2 = vpop.f32.mrf.mxu1 }
 0x724   :  { %v2327_v39 = vadd.f32 %v2198_v58, %v2153_v63  ;;  %v3789_v3 = vmul.f32 -1.442695, %v2326_v57  ;;  %v2329_v35 = vadd.f32 %v2239_v2, %v2155_v8  ;;  %v3791_v31 = vmul.f32 -1.442695, %v2328_v0  ;;  %v2157_v0 = vld [vmem:[#allocation3 + $0x168] sm:$0xff] }
 0x725   :  { %v2200_v13 = vpop.f32.mrf.mxu0  ;;  %v2241_v9 = vpop.f32.mrf.mxu1 }
 0x726   :  { %v3790_v25 = vmul.f32 -1.442695, %v2327_v39  ;;  %4189 = vpow2.f32 %v3789_v3  ;;  %v3792_v45 = vmul.f32 -1.442695, %v2329_v35  ;;  %v2159_v39 = vld [vmem:[#allocation3 + $0x178] sm:$0xff] }
 0x727   :  { %v2201_v56 = vpop.f32.mrf.mxu0  ;;  %v2242_v32 = vpop.f32.mrf.mxu1  ;;  %4191 = vpow2.f32 %v3791_v31 }
 0x728   :  { %4193 = vpow2.f32 %v3790_v25 }
 0x729   :  { %4195 = vpow2.f32 %v3792_v45 }
 0x733   :  { %v4190_v13 = vpop.eup %4189 }
 0x734   :  { %v4192_v9 = vpop.eup %4191  ;;  %v2340_v32 = vadd.f32 1.0, %v4190_v13 }
 0x735   :  { %v4194_v56 = vpop.eup %4193  ;;  %v2352_v49 = vadd.f32 1.0, %v4192_v9 }
 0x736   :  { %v4196_v52 = vpop.eup %4195  ;;  %v2341_v6 = vadd.f32 1.0, %v4194_v56  ;;  %4197 = vrcp.f32 %v2340_v32 }
 0x737   :  { %v2353_v63 = vadd.f32 1.0, %v4196_v52  ;;  %4199 = vrcp.f32 %v2352_v49 }
 0x738   :  { %4201 = vrcp.f32 %v2341_v6 }
 0x743   :  { %v4198_v56 = vpop.eup %4197 }
 0x744   :  { %v4200_v49 = vpop.eup %4199 }
 0x745   :  { %v4202_v32 = vpop.eup %4201 }
 0x761   :  { %v2278_v57 = vpop.f32.mrf.mxu0  ;;  %v2319_v8 = vpop.f32.mrf.mxu1 }
 0x762   :  { %v2330_v35 = vadd.f32 %v2278_v57, %v2156_v54  ;;  %v2332_v3 = vadd.f32 %v2319_v8, %v2158_v62  ;;  %v2372_v62 = vmul.f32 %v4200_v49, %v5749_v40 }
 0x763   :  { %v2280_v25 = vpop.f32.mrf.mxu0  ;;  %v2321_v31 = vpop.f32.mrf.mxu1 }
 0x764   :  { %4203 = vtanh.f32 %v2330_v35  ;;  %v3793_v45 = vmul.f32 -1.442695, %v2332_v3  ;;  %v2331_v58 = vadd.f32 %v2280_v25, %v2157_v0  ;;  %v2333_v4 = vadd.f32 %v2321_v31, %v2159_v39  ;;  %v5911_v39 = vpop.permute.xlu1 %2385 }
 0x765   :  { %4205 = vrcp.f32 %v2353_v63  ;;  %v2282_v2 = vpop.f32.mrf.mxu0  ;;  %v2323_v15 = vpop.f32.mrf.mxu1  ;;  %7173 = vst [vmem:[#allocation99_spill] sm:$0xff] %v5911_v39  ;;  %vm2387_vm13 = vcmp.eq.s32.totalorder %v5911_v39, 1  ;;  %v7196_v39 = vld [vmem:[#allocation145_spill] sm:$0xff] }
 0x766   :  { %4207 = vpow2.f32 %v3793_v45  ;;  %v3794_v13 = vmul.f32 -1.442695, %v2333_v4  ;;  %vm3895_vm1 = vmpackc.low %vm2387_vm13, %vm2132_vm12 }
 0x767   :  { %4209 = vtanh.f32 %v2331_v58  ;;  %v2283_v52 = vpop.f32.mrf.mxu0  ;;  %v2324_v9 = vpop.f32.mrf.mxu1 }
 0x768   :  { %4211 = vpow2.f32 %v3794_v13 }
 0x771   :  { %v4204_v54 = vpop.eup %4203 }
 0x772   :  { %v4206_v6 = vpop.eup %4205  ;;  %v2374_v57 = vmul.f32 %v4204_v54, %v4198_v56 }
 0x773   :  { %v4208_v8 = vpop.eup %4207  ;;  %v2373_v25 = vmul.f32 %v4206_v6, %v5754_v14  ;;  %v7178_v6 = vld [vmem:[#allocation127_spill] sm:$0xff] }
 0x774   :  { %v4210_v0 = vpop.eup %4209  ;;  %v2376_v63 = vadd.f32 %v2374_v57, %v2372_v62  ;;  %v2366_v35 = vadd.f32 1.0, %v4208_v8  ;;  %v7179_v62 = vld [vmem:[#allocation128_spill] sm:$0xff]  ;;  %v7180_v57 = vld [vmem:[#allocation129_spill] sm:$0xff]  ;;  %v7181_v8 = vld [vmem:[#allocation130_spill] sm:$0xff] }
 0x775   :  { %v4212_v3 = vpop.eup %4211  ;;  %v2375_v31 = vmul.f32 %v4210_v0, %v4202_v32  ;;  %v7182_v0 = vld [vmem:[#allocation131_spill] sm:$0xff] }
 0x776   :  { %4213 = vtanh.f32 %v2376_v63  ;;  %v2367_v45 = vadd.f32 1.0, %v4212_v3  ;;  %v5918_v58 = vsel %vm2387_vm13, %v2376_v63, %v5749_v40  ;;  %v7183_v63 = vld [vmem:[#allocation132_spill] sm:$0xff]  ;;  %v7185_v3 = vld [vmem:[#allocation134_spill] sm:$0xff] }
 0x777   :  { %4215 = vrcp.f32 %v2366_v35  ;;  %v2377_v4 = vadd.f32 %v2375_v31, %v2373_v25  ;;  %v7184_v35 = vld [vmem:[#allocation133_spill] sm:$0xff]  ;;  %v7186_v25 = vld [vmem:[#allocation135_spill] sm:$0xff]  ;;  %v7187_v31 = vld [vmem:[#allocation136_spill] sm:$0xff] }
 0x778   :  { %4217 = vrcp.f32 %v2367_v45  ;;  %v7188_v45 = vld [vmem:[#allocation137_spill] sm:$0xff] }
 0x779   :  { %4219 = vtanh.f32 %v2377_v4  ;;  %v5923_v2 = vsel %vm2387_vm13, %v2377_v4, %v5754_v14  ;;  %v7189_v4 = vld [vmem:[#allocation138_spill] sm:$0xff] }
 0x783   :  { %v4214_v15 = vpop.eup %4213 }
 0x784   :  { %v4216_v13 = vpop.eup %4215 }
 0x785   :  { %v4218_v52 = vpop.eup %4217  ;;  %v5925_v9 = vmul.f32 %v4216_v13, %v4214_v15  ;;  %v7190_v15 = vld [vmem:[#allocation139_spill] sm:$0xff]  ;;  %v7191_v13 = vld [vmem:[#allocation140_spill] sm:$0xff] }
 0x786   :  { %v4220_v56 = vpop.eup %4219 }
 0x787   :  { %7174 = vst [vmem:[#allocation100_spill] sm:$0xff] %v5925_v9  ;;  %v5927_v49 = vmul.f32 %v4220_v56, %v4218_v52  ;;  %v5933_v40 = vsel %vm2387_vm13, %v5925_v9, %v5764_v48  ;;  %v7176_v48 = vld [vmem:[#allocation125_spill] sm:$0xff]  ;;  %v7193_v56 = vld [vmem:[#allocation142_spill] sm:$0xff]  ;;  %v7195_v9 = vld [vmem:[#allocation144_spill] sm:$0xff] }
 0x788   :  { %v5945_v54 = vpack.c.bf16 %v5933_v40, %v5933_v40  ;;  %v7192_v52 = vld [vmem:[#allocation141_spill] sm:$0xff] }
 0x789   :  { %7175 = vst [vmem:[#allocation101_spill] sm:$0xff] %v5927_v49  ;;  %v5939_v14 = vsel %vm2387_vm13, %v5927_v49, %v5770_v10  ;;  %v7177_v10 = vld [vmem:[#allocation126_spill] sm:$0xff] }
 0x78a   :  { %v2416_v32 = vpack.c.bf16 %v5939_v14, %v5939_v14  ;;  %v7197_v49 = vld [vmem:[#allocation146_spill] sm:$0xff] }
 0x78c   :  { %2449 = vmatprep.mubr.bf16.mxu0 %v2416_v32  ;;  %2490 = vmatprep.mubr.bf16.mxu1 %v2416_v32 }
 0x78d   :  { %2450 = vmatmul.mubr.bf16.vlgmr.msra.gmra.mxu0 %v5945_v54  ;;  %2491 = vmatmul.mubr.bf16.vlgmr.msra.gmra.mxu1 %v5945_v54 }
 0x78e   :  { %2500 = vmatpush1.bf16.msra.mxu0 %v6710_v12  ;;  %2541 = vmatpush1.bf16.msra.mxu1 %v6711_v11 }
 0x78f   :  { %2531 = vmatprep.mubr.bf16.mxu0 %v2416_v32  ;;  %2572 = vmatprep.mubr.bf16.mxu1 %v2416_v32  ;;  %v7194_v32 = vld [vmem:[#allocation143_spill] sm:$0xff] }
 0x790   :  { %2501 = vmatprep.subr.bf16.mxu0 %v6712_v17  ;;  %2542 = vmatprep.subr.bf16.mxu1 %v6713_v22 }
 0x792   :  { %2502 = vmatpush1.bf16.msra.mxu0 %v6714_v33  ;;  %2543 = vmatpush1.bf16.msra.mxu1 %v6715_v47 }
 0x793   :  { %2503 = vmatprep.subr.bf16.mxu0 %v6716_v50  ;;  %2544 = vmatprep.subr.bf16.mxu1 %v6800_v34 }
 0x796   :  { %2504 = vmatpush1.bf16.msra.mxu0 %v6801_v24  ;;  %2545 = vmatpush1.bf16.msra.mxu1 %v6802_v18 }
 0x797   :  { %2505 = vmatprep.subr.bf16.mxu0 %v6803_v51  ;;  %2546 = vmatprep.subr.bf16.mxu1 %v6804_v38 }
 0x79a   :  { %2506 = vmatpush1.bf16.msra.mxu0 %v6805_v43  ;;  %2547 = vmatpush1.bf16.msra.mxu1 %v6806_v29 }
 0x79b   :  { %2507 = vmatprep.subr.bf16.mxu0 %v6807_v30  ;;  %2548 = vmatprep.subr.bf16.mxu1 %v6808_v27 }
 0x79e   :  { %2508 = vmatpush1.bf16.msra.mxu0 %v6809_v44  ;;  %2549 = vmatpush1.bf16.msra.mxu1 %v6810_v21 }
 0x79f   :  { %2509 = vmatprep.subr.bf16.mxu0 %v6894_v1  ;;  %2550 = vmatprep.subr.bf16.mxu1 %v6895_v7 }
 0x7a2   :  { %2510 = vmatpush1.bf16.msra.mxu0 %v6896_v41  ;;  %2551 = vmatpush1.bf16.msra.mxu1 %v6897_v16 }
 0x7a3   :  { %2511 = vmatprep.subr.bf16.mxu0 %v6898_v5  ;;  %2552 = vmatprep.subr.bf16.mxu1 %v6899_v59 }
 0x7a6   :  { %2512 = vmatpush1.bf16.msra.mxu0 %v6900_v26  ;;  %2553 = vmatpush1.bf16.msra.mxu1 %v6901_v60 }
 0x7a7   :  { %2513 = vmatprep.subr.bf16.mxu0 %v6819_v55  ;;  %2554 = vmatprep.subr.bf16.mxu1 %v6820_v28 }
 0x7aa   :  { %2514 = vmatpush1.bf16.msra.mxu0 %v6821_v19  ;;  %2555 = vmatpush1.bf16.msra.mxu1 %v6902_v42 }
 0x7ab   :  { %2515 = vmatprep.subr.bf16.mxu0 %v6823_v46  ;;  %2556 = vmatprep.subr.bf16.mxu1 %v6824_v53 }
 0x7ae   :  { %2516 = vmatpush2.bf16.msra.mxu0 %v6825_v23  ;;  %2557 = vmatpush2.bf16.msra.mxu1 %v6826_v37 }
 0x7af   :  { %2517 = vmatprep.subr.bf16.mxu0 %v6827_v20  ;;  %2558 = vmatprep.subr.bf16.mxu1 %v6828_v36 }
 0x7b2   :  { %2518 = vmatpush2.bf16.msra.mxu0 %v6829_v61  ;;  %2559 = vmatpush2.bf16.msra.mxu1 %v7176_v48 }
 0x7b3   :  { %2519 = vmatprep.subr.bf16.mxu0 %v7177_v10  ;;  %2560 = vmatprep.subr.bf16.mxu1 %v7178_v6 }
 0x7b6   :  { %2520 = vmatpush2.bf16.msra.mxu0 %v7179_v62  ;;  %2561 = vmatpush2.bf16.msra.mxu1 %v7180_v57 }
 0x7b7   :  { %2521 = vmatprep.subr.bf16.mxu0 %v7181_v8  ;;  %2562 = vmatprep.subr.bf16.mxu1 %v7182_v0 }
 0x7ba   :  { %2522 = vmatpush2.bf16.msra.mxu0 %v7183_v63  ;;  %2563 = vmatpush2.bf16.msra.mxu1 %v7184_v35  ;;  %v2407_v35 = vld [vmem:[#allocation3 + $0x180] sm:$0xff]  ;;  %v2408_v63 = vld [vmem:[#allocation3 + $0x188] sm:$0xff] }
 0x7bb   :  { %2523 = vmatprep.subr.bf16.mxu0 %v7185_v3  ;;  %2564 = vmatprep.subr.bf16.mxu1 %v7186_v25 }
 0x7be   :  { %2524 = vmatpush2.bf16.msra.mxu0 %v7187_v31  ;;  %2565 = vmatpush2.bf16.msra.mxu1 %v7188_v45  ;;  %v7198_v31 = vld [vmem:[#allocation147_spill] sm:$0xff]  ;;  %v7199_v45 = vld [vmem:[#allocation148_spill] sm:$0xff] }
 0x7bf   :  { %2525 = vmatprep.subr.bf16.mxu0 %v7189_v4  ;;  %2566 = vmatprep.subr.bf16.mxu1 %v7190_v15  ;;  %v7200_v4 = vld [vmem:[#allocation149_spill] sm:$0xff] }
 0x7c0   :  { %v7201_v15 = vld [vmem:[#allocation21_spill] sm:$0xff] }
 0x7c2   :  { %2526 = vmatpush2.bf16.msra.mxu0 %v7191_v13  ;;  %2567 = vmatpush2.bf16.msra.mxu1 %v7192_v52  ;;  %v7202_v13 = vld [vmem:[#allocation23_spill] sm:$0xff] }
 0x7c3   :  { %2527 = vmatprep.subr.bf16.mxu0 %v7193_v56  ;;  %2568 = vmatprep.subr.bf16.mxu1 %v7194_v32  ;;  %v7203_v32 = vld [vmem:[#allocation22_spill] sm:$0xff]  ;;  %v7212_v56 = vld [vmem:[#allocation32_spill] sm:$0xff] }
 0x7c6   :  { %2528 = vmatpush2.bf16.msra.mxu0 %v7195_v9  ;;  %2569 = vmatpush2.bf16.msra.mxu1 %v7196_v39  ;;  %v7204_v9 = vld [vmem:[#allocation24_spill] sm:$0xff]  ;;  %v7205_v39 = vld [vmem:[#allocation25_spill] sm:$0xff] }
 0x7c7   :  { %2529 = vmatprep.subr.bf16.mxu0 %v7197_v49  ;;  %2570 = vmatprep.subr.bf16.mxu1 %v7198_v31  ;;  %v7206_v49 = vld [vmem:[#allocation26_spill] sm:$0xff]  ;;  %v7207_v31 = vld [vmem:[#allocation27_spill] sm:$0xff] }
 0x7ca   :  { %2530 = vmatpush2.bf16.msra.mxu0 %v7199_v45  ;;  %2571 = vmatpush2.bf16.msra.mxu1 %v7200_v4  ;;  %v7208_v45 = vld [vmem:[#allocation28_spill] sm:$0xff]  ;;  %v7209_v4 = vld [vmem:[#allocation29_spill] sm:$0xff] }
 0x7cb   :  { %2672 = vmatprep.subr.bf16.mxu0 %v7201_v15  ;;  %2713 = vmatprep.subr.bf16.mxu1 %v7202_v13  ;;  %v7210_v15 = vld [vmem:[#allocation30_spill] sm:$0xff]  ;;  %v7211_v13 = vld [vmem:[#allocation31_spill] sm:$0xff] }
 0x7cd   :  { %2532 = vmatmul.mubr.bf16.vlgmr.msra.gmra.mxu0 %v5945_v54  ;;  %2573 = vmatmul.mubr.bf16.vlgmr.msra.gmra.mxu1 %v5945_v54  ;;  %v7213_v54 = vld [vmem:[#allocation33_spill] sm:$0xff] }
 0x7ce   :  { %2673 = vmatpush1.bf16.msra.mxu0 %v7203_v32  ;;  %2714 = vmatpush1.bf16.msra.mxu1 %v7204_v9  ;;  %v7214_v32 = vld [vmem:[#allocation34_spill] sm:$0xff]  ;;  %v7215_v9 = vld [vmem:[#allocation35_spill] sm:$0xff] }
 0x7cf   :  { %2674 = vmatprep.subr.bf16.mxu0 %v7205_v39  ;;  %2715 = vmatprep.subr.bf16.mxu1 %v7206_v49  ;;  %v7216_v39 = vld [vmem:[#allocation36_spill] sm:$0xff]  ;;  %v7217_v49 = vld [vmem:[#allocation37_spill] sm:$0xff] }
 0x7d2   :  { %2675 = vmatpush1.bf16.msra.mxu0 %v7207_v31  ;;  %2716 = vmatpush1.bf16.msra.mxu1 %v7208_v45  ;;  %v7218_v31 = vld [vmem:[#allocation38_spill] sm:$0xff]  ;;  %v7219_v45 = vld [vmem:[#allocation39_spill] sm:$0xff] }
 0x7d3   :  { %2676 = vmatprep.subr.bf16.mxu0 %v7209_v4  ;;  %2717 = vmatprep.subr.bf16.mxu1 %v7210_v15  ;;  %v7220_v4 = vld [vmem:[#allocation40_spill] sm:$0xff]  ;;  %v7221_v15 = vld [vmem:[#allocation41_spill] sm:$0xff] }
 0x7d6   :  { %2677 = vmatpush1.bf16.msra.mxu0 %v7211_v13  ;;  %2718 = vmatpush1.bf16.msra.mxu1 %v7212_v56  ;;  %v7222_v13 = vld [vmem:[#allocation42_spill] sm:$0xff]  ;;  %v7223_v56 = vld [vmem:[#allocation43_spill] sm:$0xff] }
 0x7d7   :  { %2678 = vmatprep.subr.bf16.mxu0 %v7213_v54  ;;  %2719 = vmatprep.subr.bf16.mxu1 %v7214_v32  ;;  %v7224_v54 = vld [vmem:[#allocation44_spill] sm:$0xff]  ;;  %v7225_v32 = vld [vmem:[#allocation45_spill] sm:$0xff] }
 0x7da   :  { %2679 = vmatpush1.bf16.msra.mxu0 %v7215_v9  ;;  %2720 = vmatpush1.bf16.msra.mxu1 %v7216_v39  ;;  %v7226_v9 = vld [vmem:[#allocation46_spill] sm:$0xff]  ;;  %v7227_v39 = vld [vmem:[#allocation47_spill] sm:$0xff] }
 0x7db   :  { %2680 = vmatprep.subr.bf16.mxu0 %v7217_v49  ;;  %2721 = vmatprep.subr.bf16.mxu1 %v7218_v31  ;;  %v7228_v49 = vld [vmem:[#allocation48_spill] sm:$0xff]  ;;  %v7229_v31 = vld [vmem:[#allocation49_spill] sm:$0xff] }
 0x7de   :  { %2681 = vmatpush1.bf16.msra.mxu0 %v7219_v45  ;;  %2722 = vmatpush1.bf16.msra.mxu1 %v7220_v4  ;;  %v7230_v45 = vld [vmem:[#allocation50_spill] sm:$0xff]  ;;  %v7231_v4 = vld [vmem:[#allocation51_spill] sm:$0xff] }
 0x7df   :  { %2682 = vmatprep.subr.bf16.mxu0 %v7221_v15  ;;  %2723 = vmatprep.subr.bf16.mxu1 %v7222_v13  ;;  %v7232_v15 = vld [vmem:[#allocation52_spill] sm:$0xff]  ;;  %v7233_v13 = vld [vmem:[#allocation53_spill] sm:$0xff] }
 0x7e2   :  { %2683 = vmatpush1.bf16.msra.mxu0 %v7223_v56  ;;  %2724 = vmatpush1.bf16.msra.mxu1 %v7224_v54  ;;  %v7234_v56 = vld [vmem:[#allocation54_spill] sm:$0xff]  ;;  %v7235_v54 = vld [vmem:[#allocation55_spill] sm:$0xff] }
 0x7e3   :  { %2684 = vmatprep.subr.bf16.mxu0 %v7225_v32  ;;  %2725 = vmatprep.subr.bf16.mxu1 %v7226_v9  ;;  %v7236_v32 = vld [vmem:[#allocation56_spill] sm:$0xff]  ;;  %v7237_v9 = vld [vmem:[#allocation57_spill] sm:$0xff] }
 0x7e6   :  { %2685 = vmatpush1.bf16.msra.mxu0 %v7227_v39  ;;  %2726 = vmatpush1.bf16.msra.mxu1 %v7228_v49  ;;  %v7238_v39 = vld [vmem:[#allocation58_spill] sm:$0xff]  ;;  %v7239_v49 = vld [vmem:[#allocation59_spill] sm:$0xff] }
 0x7e7   :  { %2686 = vmatprep.subr.bf16.mxu0 %v7229_v31  ;;  %2727 = vmatprep.subr.bf16.mxu1 %v7230_v45  ;;  %v7240_v31 = vld [vmem:[#allocation60_spill] sm:$0xff]  ;;  %v7241_v45 = vld [vmem:[#allocation61_spill] sm:$0xff] }
 0x7ea   :  { %2687 = vmatpush1.bf16.msra.mxu0 %v7231_v4  ;;  %2728 = vmatpush1.bf16.msra.mxu1 %v7232_v15  ;;  %v7242_v4 = vld [vmem:[#allocation62_spill] sm:$0xff]  ;;  %v7243_v15 = vld [vmem:[#allocation63_spill] sm:$0xff] }
 0x7eb   :  { %2688 = vmatprep.subr.bf16.mxu0 %v7233_v13  ;;  %2729 = vmatprep.subr.bf16.mxu1 %v7234_v56  ;;  %v7244_v13 = vld [vmem:[#allocation64_spill] sm:$0xff]  ;;  %v7245_v56 = vld [vmem:[#allocation65_spill] sm:$0xff] }
 0x7ee   :  { %2689 = vmatpush2.bf16.msra.mxu0 %v7235_v54  ;;  %2730 = vmatpush2.bf16.msra.mxu1 %v7236_v32  ;;  %v7246_v54 = vld [vmem:[#allocation66_spill] sm:$0xff]  ;;  %v7247_v32 = vld [vmem:[#allocation67_spill] sm:$0xff] }
 0x7ef   :  { %2690 = vmatprep.subr.bf16.mxu0 %v7237_v9  ;;  %2731 = vmatprep.subr.bf16.mxu1 %v7238_v39  ;;  %v7248_v9 = vld [vmem:[#allocation68_spill] sm:$0xff]  ;;  %v7249_v39 = vld [vmem:[#allocation69_spill] sm:$0xff] }
 0x7f2   :  { %2691 = vmatpush2.bf16.msra.mxu0 %v7239_v49  ;;  %2732 = vmatpush2.bf16.msra.mxu1 %v7240_v31  ;;  %v7250_v49 = vld [vmem:[#allocation70_spill] sm:$0xff]  ;;  %v7251_v31 = vld [vmem:[#allocation71_spill] sm:$0xff] }
 0x7f3   :  { %2692 = vmatprep.subr.bf16.mxu0 %v7241_v45  ;;  %2733 = vmatprep.subr.bf16.mxu1 %v7242_v4  ;;  %v7252_v45 = vld [vmem:[#allocation72_spill] sm:$0xff]  ;;  %v7253_v4 = vld [vmem:[#allocation73_spill] sm:$0xff] }
 0x7f6   :  { %2693 = vmatpush2.bf16.msra.mxu0 %v7243_v15  ;;  %2734 = vmatpush2.bf16.msra.mxu1 %v7244_v13  ;;  %v7254_v15 = vld [vmem:[#allocation74_spill] sm:$0xff]  ;;  %v7255_v13 = vld [vmem:[#allocation75_spill] sm:$0xff] }
 0x7f7   :  { %2694 = vmatprep.subr.bf16.mxu0 %v7245_v56  ;;  %2735 = vmatprep.subr.bf16.mxu1 %v7246_v54  ;;  %v7256_v56 = vld [vmem:[#allocation76_spill] sm:$0xff]  ;;  %v7257_v54 = vld [vmem:[#allocation77_spill] sm:$0xff] }
 0x7fa   :  { %2695 = vmatpush2.bf16.msra.mxu0 %v7247_v32  ;;  %2736 = vmatpush2.bf16.msra.mxu1 %v7248_v9  ;;  %v7258_v32 = vld [vmem:[#allocation78_spill] sm:$0xff]  ;;  %v7259_v9 = vld [vmem:[#allocation79_spill] sm:$0xff] }
 0x7fb   :  { %2696 = vmatprep.subr.bf16.mxu0 %v7249_v39  ;;  %2737 = vmatprep.subr.bf16.mxu1 %v7250_v49  ;;  %v7260_v39 = vld [vmem:[#allocation80_spill] sm:$0xff]  ;;  %v7261_v49 = vld [vmem:[#allocation81_spill] sm:$0xff] }
 0x7fe   :  { %2697 = vmatpush2.bf16.msra.mxu0 %v7251_v31  ;;  %2738 = vmatpush2.bf16.msra.mxu1 %v7252_v45  ;;  %v7262_v31 = vld [vmem:[#allocation82_spill] sm:$0xff]  ;;  %v7263_v45 = vld [vmem:[#allocation84_spill] sm:$0xff] }
 0x7ff   :  { %2698 = vmatprep.subr.bf16.mxu0 %v7253_v4  ;;  %2739 = vmatprep.subr.bf16.mxu1 %v7254_v15  ;;  %v7264_v4 = vld [vmem:[#allocation85_spill] sm:$0xff]  ;;  %v7265_v15 = vld [vmem:[#allocation86_spill] sm:$0xff] }
 0x802   :  { %2699 = vmatpush2.bf16.msra.mxu0 %v7255_v13  ;;  %2740 = vmatpush2.bf16.msra.mxu1 %v7256_v56  ;;  %v7266_v13 = vld [vmem:[#allocation87_spill] sm:$0xff] }
 0x803   :  { %2700 = vmatprep.subr.bf16.mxu0 %v7257_v54  ;;  %2741 = vmatprep.subr.bf16.mxu1 %v7258_v32 }
 0x806   :  { %2701 = vmatpush2.bf16.msra.mxu0 %v7259_v9  ;;  %2742 = vmatpush2.bf16.msra.mxu1 %v7260_v39 }
 0x807   :  { %2702 = vmatprep.subr.bf16.mxu0 %v7261_v49  ;;  %2743 = vmatprep.subr.bf16.mxu1 %v7262_v31  ;;  %v2409_v49 = vld [vmem:[#allocation3 + $0x190] sm:$0xff] }
 0x80a   :  { %2703 = vmatpush2.bf16.msra.mxu0 %v7263_v45  ;;  %2744 = vmatpush2.bf16.msra.mxu1 %v7264_v4  ;;  %v2410_v45 = vld [vmem:[#allocation3 + $0x198] sm:$0xff] }
 0x80b   :  { %2754 = vmatprep.subr.bf16.mxu0 %v7265_v15  ;;  %2795 = vmatprep.subr.bf16.mxu1 %v7266_v13 }
 0x84d   :  { %v2451_v56 = vpop.f32.mrf.mxu0  ;;  %v2492_v54 = vpop.f32.mrf.mxu1 }
 0x84e   :  { %v2581_v31 = vadd.f32 %v2451_v56, %v2407_v35  ;;  %v2583_v0 = vadd.f32 %v2492_v54, %v2409_v49  ;;  %v2411_v35 = vld [vmem:[#allocation3 + $0x1a0] sm:$0xff]  ;;  %v2413_v56 = vld [vmem:[#allocation3 + $0x1b0] sm:$0xff] }
 0x84f   :  { %v2453_v52 = vpop.f32.mrf.mxu0  ;;  %v2494_v32 = vpop.f32.mrf.mxu1 }
 0x850   :  { %v2582_v8 = vadd.f32 %v2453_v52, %v2408_v63  ;;  %v3796_v4 = vmul.f32 -1.442695, %v2581_v31  ;;  %v2584_v57 = vadd.f32 %v2494_v32, %v2410_v45  ;;  %v3798_v15 = vmul.f32 -1.442695, %v2583_v0  ;;  %v2412_v0 = vld [vmem:[#allocation3 + $0x1a8] sm:$0xff] }
 0x851   :  { %v2455_v25 = vpop.f32.mrf.mxu0  ;;  %v2496_v9 = vpop.f32.mrf.mxu1 }
 0x852   :  { %v3797_v62 = vmul.f32 -1.442695, %v2582_v8  ;;  %4221 = vpow2.f32 %v3796_v4  ;;  %v3799_v13 = vmul.f32 -1.442695, %v2584_v57  ;;  %v2414_v8 = vld [vmem:[#allocation3 + $0x1b8] sm:$0xff] }
 0x853   :  { %v2456_v3 = vpop.f32.mrf.mxu0  ;;  %v2497_v39 = vpop.f32.mrf.mxu1  ;;  %4223 = vpow2.f32 %v3798_v15 }
 0x854   :  { %4225 = vpow2.f32 %v3797_v62 }
 0x855   :  { %4227 = vpow2.f32 %v3799_v13 }
 0x85f   :  { %v4222_v25 = vpop.eup %4221 }
 0x860   :  { %v4224_v9 = vpop.eup %4223  ;;  %v2595_v39 = vadd.f32 1.0, %v4222_v25 }
 0x861   :  { %v4226_v3 = vpop.eup %4225  ;;  %v2607_v10 = vadd.f32 1.0, %v4224_v9 }
 0x862   :  { %v4228_v6 = vpop.eup %4227  ;;  %v2596_v48 = vadd.f32 1.0, %v4226_v3  ;;  %4229 = vrcp.f32 %v2595_v39 }
 0x863   :  { %v2608_v63 = vadd.f32 1.0, %v4228_v6  ;;  %4231 = vrcp.f32 %v2607_v10 }
 0x864   :  { %4233 = vrcp.f32 %v2596_v48 }
 0x86f   :  { %v4230_v3 = vpop.eup %4229 }
 0x870   :  { %v4232_v10 = vpop.eup %4231 }
 0x871   :  { %v4234_v39 = vpop.eup %4233 }
 0x88d   :  { %v2533_v52 = vpop.f32.mrf.mxu0  ;;  %v2574_v54 = vpop.f32.mrf.mxu1 }
 0x88e   :  { %v2585_v57 = vadd.f32 %v2533_v52, %v2411_v35  ;;  %v2587_v32 = vadd.f32 %v2574_v54, %v2413_v56  ;;  %v6079_v56 = vpop.permute.xlu0 %2640  ;;  %v2627_v52 = vmul.f32 %v4232_v10, %v5918_v58 }
 0x88f   :  { %v2535_v62 = vpop.f32.mrf.mxu0  ;;  %v2576_v49 = vpop.f32.mrf.mxu1  ;;  %vm2642_vm14 = vcmp.eq.s32.totalorder %v6079_v56, 1 }
 0x890   :  { %4235 = vtanh.f32 %v2585_v57  ;;  %v3800_v31 = vmul.f32 -1.442695, %v2587_v32  ;;  %v2586_v45 = vadd.f32 %v2535_v62, %v2412_v0  ;;  %v2588_v4 = vadd.f32 %v2576_v49, %v2414_v8 }
 0x891   :  { %4237 = vrcp.f32 %v2608_v63  ;;  %v2537_v15 = vpop.f32.mrf.mxu0  ;;  %v2578_v13 = vpop.f32.mrf.mxu1 }
 0x892   :  { %4239 = vpow2.f32 %v3800_v31  ;;  %v3801_v25 = vmul.f32 -1.442695, %v2588_v4 }
 0x893   :  { %4241 = vtanh.f32 %v2586_v45  ;;  %v2538_v6 = vpop.f32.mrf.mxu0  ;;  %v2579_v9 = vpop.f32.mrf.mxu1 }
 0x894   :  { %4243 = vpow2.f32 %v3801_v25 }
 0x89d   :  { %v4236_v35 = vpop.eup %4235 }
 0x89e   :  { %v4238_v48 = vpop.eup %4237  ;;  %v2629_v54 = vmul.f32 %v4236_v35, %v4230_v3 }
 0x89f   :  { %v4240_v0 = vpop.eup %4239  ;;  %v2628_v62 = vmul.f32 %v4238_v48, %v5923_v2  ;;  %v3979_v48 = vld [vmem:[#allocation8 + $0x34] ss:$8 sps:$4 sm:$0xff]  }
 0x8a0   :  { %v4242_v63 = vpop.eup %4241  ;;  %v2631_v8 = vadd.f32 %v2629_v54, %v2627_v52  ;;  %v2621_v57 = vadd.f32 1.0, %v4240_v0  ;;  %v3977_v52 = vld [vmem:[#allocation8 + $0x30] ss:$8 sps:$4 sm:$0xff]   ;;  %v3982_v54 = vld [vmem:[#allocation8 + $0x24] ss:$8 sps:$4 sm:$0xff]  }
 0x8a1   :  { %v4244_v32 = vpop.eup %4243  ;;  %v2630_v49 = vmul.f32 %v4242_v63, %v4234_v39  ;;  %v3980_v0 = vld [vmem:[#allocation8 + $0x20] ss:$8 sps:$4 sm:$0xff]   ;;  %v3985_v63 = vld [vmem:[#allocation8 + $0x14] ss:$8 sps:$4 sm:$0xff]  }
 0x8a2   :  { %4245 = vtanh.f32 %v2631_v8  ;;  %v2622_v31 = vadd.f32 1.0, %v4244_v32  ;;  %v6087_v45 = vsel %vm2642_vm14, %v2631_v8, %v5918_v58  ;;  %v3983_v8 = vld [vmem:[#allocation8 + $0x10] ss:$8 sps:$4 sm:$0xff]   ;;  %v3986_v32 = vld [vmem:[#allocation8] ss:$8 sps:$4 sm:$0xff]  }
 0x8a3   :  { %4247 = vrcp.f32 %v2621_v57  ;;  %v2632_v4 = vadd.f32 %v2630_v49, %v2628_v62  ;;  %v3988_v57 = vld [vmem:[#allocation8 + $0x4] ss:$8 sps:$4 sm:$0xff]   ;;  %v3991_v62 = vld [vmem:[#allocation8 + $0xf4] ss:$8 sps:$4 sm:$0xff]   ;;  %v3989_v49 = vld [vmem:[#allocation8 + $0xf0] ss:$8 sps:$4 sm:$0xff]  }
 0x8a4   :  { %4249 = vrcp.f32 %v2622_v31  ;;  %v3994_v31 = vld [vmem:[#allocation8 + $0xe4] ss:$8 sps:$4 sm:$0xff]  }
 0x8a5   :  { %4251 = vtanh.f32 %v2632_v4  ;;  %v6092_v15 = vsel %vm2642_vm14, %v2632_v4, %v5923_v2  ;;  %v3992_v4 = vld [vmem:[#allocation8 + $0xe0] ss:$8 sps:$4 sm:$0xff]  }
 0x8af   :  { %v4246_v13 = vpop.eup %4245 }
 0x8b0   :  { %v4248_v25 = vpop.eup %4247 }
 0x8b1   :  { %v4250_v6 = vpop.eup %4249  ;;  %v6094_v9 = vmul.f32 %v4248_v25, %v4246_v13  ;;  %v3997_v13 = vld [vmem:[#allocation8 + $0xd4] ss:$8 sps:$4 sm:$0xff]   ;;  %v3995_v25 = vld [vmem:[#allocation8 + $0xd0] ss:$8 sps:$4 sm:$0xff]  }
 0x8b2   :  { %v4252_v3 = vpop.eup %4251 }
 0x8b3   :  { %v6096_v10 = vmul.f32 %v4252_v3, %v4250_v6  ;;  %v6102_v58 = vsel %vm2642_vm14, %v6094_v9, %v5933_v40  ;;  %v3976_v40 = vld [vmem:[#allocation8 + $0x44] ss:$8 sps:$4 sm:$0xff]   ;;  %v3998_v3 = vld [vmem:[#allocation8 + $0xc0] ss:$8 sps:$4 sm:$0xff]  }
 0x8b4   :  { %v6114_v35 = vpack.c.bf16 %v6102_v58, %v6102_v58  ;;  %v4000_v6 = vld [vmem:[#allocation8 + $0xc4] ss:$8 sps:$4 sm:$0xff]  }
 0x8b5   :  { %v6108_v2 = vsel %vm2642_vm14, %v6096_v10, %v5939_v14  ;;  %v3974_v14 = vld [vmem:[#allocation8 + $0x40] ss:$8 sps:$4 sm:$0xff]  }
 0x8b6   :  { %v2671_v39 = vpack.c.bf16 %v6108_v2, %v6108_v2 }
 0x8b8   :  { %2704 = vmatprep.mubr.bf16.mxu0 %v2671_v39  ;;  %2745 = vmatprep.mubr.bf16.mxu1 %v2671_v39 }
 0x8b9   :  { %2705 = vmatmul.mubr.bf16.vlgmr.msra.gmra.mxu0 %v6114_v35  ;;  %2746 = vmatmul.mubr.bf16.vlgmr.msra.gmra.mxu1 %v6114_v35 }
 0x8ba   :  { %2755 = vmatpush1.bf16.msra.mxu0 %v6710_v12  ;;  %2796 = vmatpush1.bf16.msra.mxu1 %v6711_v11  ;;  %v7267_v12 = vld [vmem:[#allocation125_spill] sm:$0xff]  ;;  %v7268_v11 = vld [vmem:[#allocation126_spill] sm:$0xff] }
 0x8bb   :  { %2786 = vmatprep.mubr.bf16.mxu0 %v2671_v39  ;;  %2827 = vmatprep.mubr.bf16.mxu1 %v2671_v39  ;;  %v4003_v39 = vld [vmem:[#allocation8 + $0xb4] ss:$8 sps:$4 sm:$0xff]  }
 0x8bc   :  { %2756 = vmatprep.subr.bf16.mxu0 %v6712_v17  ;;  %2797 = vmatprep.subr.bf16.mxu1 %v6713_v22  ;;  %v7269_v17 = vld [vmem:[#allocation127_spill] sm:$0xff]  ;;  %v7270_v22 = vld [vmem:[#allocation128_spill] sm:$0xff] }
 0x8be   :  { %2757 = vmatpush1.bf16.msra.mxu0 %v6714_v33  ;;  %2798 = vmatpush1.bf16.msra.mxu1 %v6715_v47  ;;  %v7271_v33 = vld [vmem:[#allocation129_spill] sm:$0xff]  ;;  %v7272_v47 = vld [vmem:[#allocation130_spill] sm:$0xff] }
 0x8bf   :  { %2758 = vmatprep.subr.bf16.mxu0 %v6716_v50  ;;  %2799 = vmatprep.subr.bf16.mxu1 %v6800_v34  ;;  %v7273_v50 = vld [vmem:[#allocation131_spill] sm:$0xff] }
 0x8c0   :  { %v7277_v34 = vld [vmem:[#allocation135_spill] sm:$0xff] }
 0x8c2   :  { %2759 = vmatpush1.bf16.msra.mxu0 %v6801_v24  ;;  %2800 = vmatpush1.bf16.msra.mxu1 %v6802_v18  ;;  %v7278_v24 = vld [vmem:[#allocation136_spill] sm:$0xff]  ;;  %v7279_v18 = vld [vmem:[#allocation137_spill] sm:$0xff] }
 0x8c3   :  { %2760 = vmatprep.subr.bf16.mxu0 %v6803_v51  ;;  %2801 = vmatprep.subr.bf16.mxu1 %v6804_v38  ;;  %v7280_v51 = vld [vmem:[#allocation138_spill] sm:$0xff]  ;;  %v7281_v38 = vld [vmem:[#allocation139_spill] sm:$0xff] }
 0x8c6   :  { %2761 = vmatpush1.bf16.msra.mxu0 %v6805_v43  ;;  %2802 = vmatpush1.bf16.msra.mxu1 %v6806_v29  ;;  %v7282_v43 = vld [vmem:[#allocation140_spill] sm:$0xff]  ;;  %v7283_v29 = vld [vmem:[#allocation141_spill] sm:$0xff] }
 0x8c7   :  { %2762 = vmatprep.subr.bf16.mxu0 %v6807_v30  ;;  %2803 = vmatprep.subr.bf16.mxu1 %v6808_v27  ;;  %v7284_v30 = vld [vmem:[#allocation142_spill] sm:$0xff]  ;;  %v7285_v27 = vld [vmem:[#allocation143_spill] sm:$0xff] }
 0x8ca   :  { %2763 = vmatpush1.bf16.msra.mxu0 %v6809_v44  ;;  %2804 = vmatpush1.bf16.msra.mxu1 %v6810_v21  ;;  %v7286_v44 = vld [vmem:[#allocation144_spill] sm:$0xff]  ;;  %v7287_v21 = vld [vmem:[#allocation145_spill] sm:$0xff] }
 0x8cb   :  { %2764 = vmatprep.subr.bf16.mxu0 %v6894_v1  ;;  %2805 = vmatprep.subr.bf16.mxu1 %v6895_v7  ;;  %v7292_v1 = vld [vmem:[#allocation152_spill] sm:$0xff]  ;;  %v7293_v7 = vld [vmem:[#allocation89_spill] sm:$0xff] }
 0x8ce   :  { %2765 = vmatpush1.bf16.msra.mxu0 %v6896_v41  ;;  %2806 = vmatpush1.bf16.msra.mxu1 %v6897_v16  ;;  %v3884_v41 = vpack.c.bf16 %v7293_v7, %v7292_v1  ;;  %v4016_v1 = vld [vmem:[#allocation9 + $0x30] sm:$0xff]   ;;  %v4017_v7 = vld [vmem:[#allocation9 + $0x68] sm:$0xff]   ;;  %v4019_v16 = vld [vmem:[#allocation9 + $0x60] sm:$0xff]  }
 0x8cf   :  { %2766 = vmatprep.subr.bf16.mxu0 %v6898_v5  ;;  %2807 = vmatprep.subr.bf16.mxu1 %v6899_v59  ;;  %v4020_v5 = vld [vmem:[#allocation9 + $0x20] sm:$0xff]   ;;  %v4021_v59 = vld [vmem:[#allocation9 + $0x58] sm:$0xff]  }
 0x8d2   :  { %2767 = vmatpush1.bf16.msra.mxu0 %v6900_v26  ;;  %2808 = vmatpush1.bf16.msra.mxu1 %v6901_v60  ;;  %v3968_v26 = vld [vmem:[#allocation8 + $0x60] ss:$8 sps:$4 sm:$0xff]   ;;  %v3973_v60 = vld [vmem:[#allocation8 + $0x54] ss:$8 sps:$4 sm:$0xff]  }
 0x8d3   :  { %2768 = vmatprep.subr.bf16.mxu0 %v6819_v55  ;;  %2809 = vmatprep.subr.bf16.mxu1 %v6820_v28  ;;  %v7274_v28 = vld [vmem:[#allocation132_spill] sm:$0xff]  ;;  %v7275_v55 = vld [vmem:[#allocation133_spill] sm:$0xff] }
 0x8d6   :  { %2769 = vmatpush1.bf16.msra.mxu0 %v6821_v19  ;;  %2810 = vmatpush1.bf16.msra.mxu1 %v6902_v42  ;;  %v7276_v19 = vld [vmem:[#allocation134_spill] sm:$0xff] }
 0x8d7   :  { %2770 = vmatprep.subr.bf16.mxu0 %v6823_v46  ;;  %2811 = vmatprep.subr.bf16.mxu1 %v6824_v53  ;;  %v7288_v46 = vld [vmem:[#allocation146_spill] sm:$0xff]  ;;  %v7289_v53 = vld [vmem:[#allocation147_spill] sm:$0xff] }
 0x8d8   :  { %v3971_v42 = vld [vmem:[#allocation8 + $0x50] ss:$8 sps:$4 sm:$0xff]  }
 0x8da   :  { %2771 = vmatpush2.bf16.msra.mxu0 %v6825_v23  ;;  %2812 = vmatpush2.bf16.msra.mxu1 %v6826_v37  ;;  %v3967_v23 = vld [vmem:[#allocation8 + $0x74] ss:$8 sps:$4 sm:$0xff]   ;;  %v7290_v37 = vld [vmem:[#allocation148_spill] sm:$0xff] }
 0x8db   :  { %2772 = vmatprep.subr.bf16.mxu0 %v6827_v20  ;;  %2813 = vmatprep.subr.bf16.mxu1 %v6828_v36  ;;  %v7291_v20 = vld [vmem:[#allocation149_spill] sm:$0xff] }
 0x8dc   :  { %v3965_v36 = vld [vmem:[#allocation8 + $0x70] ss:$8 sps:$4 sm:$0xff]  }
 0x8de   :  { %2773 = vmatpush2.bf16.msra.mxu0 %v6829_v61  ;;  %2814 = vmatpush2.bf16.msra.mxu1 %v7267_v12  ;;  %v3970_v61 = vld [vmem:[#allocation8 + $0x64] ss:$8 sps:$4 sm:$0xff]  }
 0x8df   :  { %2774 = vmatprep.subr.bf16.mxu0 %v7268_v11  ;;  %2815 = vmatprep.subr.bf16.mxu1 %v7269_v17  ;;  %v4006_v12 = vld [vmem:[#allocation8 + $0xa4] ss:$8 sps:$4 sm:$0xff]   ;;  %v4004_v11 = vld [vmem:[#allocation8 + $0xa0] ss:$8 sps:$4 sm:$0xff]   ;;  %v4009_v17 = vld [vmem:[#allocation8 + $0x94] ss:$8 sps:$4 sm:$0xff]  }
 0x8e2   :  { %2775 = vmatpush2.bf16.msra.mxu0 %v7270_v22  ;;  %2816 = vmatpush2.bf16.msra.mxu1 %v7271_v33  ;;  %v4007_v22 = vld [vmem:[#allocation8 + $0x90] ss:$8 sps:$4 sm:$0xff]   ;;  %v4012_v33 = vld [vmem:[#allocation8 + $0x84] ss:$8 sps:$4 sm:$0xff]  }
 0x8e3   :  { %2776 = vmatprep.subr.bf16.mxu0 %v7272_v47  ;;  %2817 = vmatprep.subr.bf16.mxu1 %v7273_v50  ;;  %v4010_v47 = vld [vmem:[#allocation8 + $0x80] ss:$8 sps:$4 sm:$0xff]  }
 0x8e4   :  { %v7298_v50 = vld [vmem:[#allocation151_spill] sm:$0xff] }
 0x8e6   :  { %2777 = vmatpush2.bf16.msra.mxu0 %v7274_v28  ;;  %2818 = vmatpush2.bf16.msra.mxu1 %v7275_v55  ;;  %v7299_v28 = vld [vmem:[#allocation88_spill] sm:$0xff] }
 0x8e7   :  { %2778 = vmatprep.subr.bf16.mxu0 %v7276_v19  ;;  %2819 = vmatprep.subr.bf16.mxu1 %v7277_v34  ;;  %v3887_v55 = vpack.c.bf16 %v7299_v28, %v7298_v50  ;;  %v7300_v19 = vld [vmem:[#allocation92_spill] sm:$0xff]  ;;  %v7301_v34 = vld [vmem:[#allocation95_spill] sm:$0xff] }
 0x8ea   :  { %2779 = vmatpush2.bf16.msra.mxu0 %v7278_v24  ;;  %2820 = vmatpush2.bf16.msra.mxu1 %v7279_v18  ;;  %v3890_v24 = vpack.c.bf16 %v7301_v34, %v7300_v19  ;;  %v2668_v18 = vld [vmem:[#allocation3 + $0x1f0] sm:$0xff] }
 0x8eb   :  { %2780 = vmatprep.subr.bf16.mxu0 %v7280_v51  ;;  %2821 = vmatprep.subr.bf16.mxu1 %v7281_v38  ;;  %v7304_v38 = vld [vmem:[#allocation91_spill] sm:$0xff] }
 0x8ee   :  { %2781 = vmatpush2.bf16.msra.mxu0 %v7282_v43  ;;  %2822 = vmatpush2.bf16.msra.mxu1 %v7283_v29  ;;  %v7305_v43 = vld [vmem:[#allocation94_spill] sm:$0xff] }
 0x8ef   :  { %2782 = vmatprep.subr.bf16.mxu0 %v7284_v30  ;;  %2823 = vmatprep.subr.bf16.mxu1 %v7285_v27  ;;  %v3893_v29 = vpack.c.bf16 %v7305_v43, %v7304_v38  ;;  %v7306_v30 = vld [vmem:[#allocation98_spill] sm:$0xff]  ;;  %v7307_v27 = vld [vmem:[#allocation101_spill] sm:$0xff] }
 0x8f2   :  { %2783 = vmatpush2.bf16.msra.mxu0 %v7286_v44  ;;  %2824 = vmatpush2.bf16.msra.mxu1 %v7287_v21  ;;  %v3896_v44 = vpack.c.bf16 %v7307_v27, %v7306_v30  ;;  %v2669_v30 = vld [vmem:[#allocation3 + $0x1f8] sm:$0xff] }
 0x8f3   :  { %2784 = vmatprep.subr.bf16.mxu0 %v7288_v46  ;;  %2825 = vmatprep.subr.bf16.mxu1 %v7289_v53  ;;  %v7310_v53 = vld [vmem:[#allocation97_spill] sm:$0xff] }
 0x8f6   :  { %2785 = vmatpush2.bf16.msra.mxu0 %v7290_v37  ;;  %2826 = vmatpush2.bf16.msra.mxu1 %v7291_v20  ;;  %v4013_v20 = vld [vmem:[#allocation9 + $0x78] sm:$0xff]  }
 0x8f7   :  { %3172 = vmatprep.subr.bf16.mxu0 %v3967_v23  ;;  %v7311_v23 = vld [vmem:[#allocation100_spill] sm:$0xff]  ;;  %3907 = vmatprep.subr.bf16.mxu1 %v4013_v20 }
 0x8f8   :  { %v3899_v37 = vpack.c.bf16 %v7311_v23, %v7310_v53 }
 0x8f9   :  { %2787 = vmatmul.mubr.bf16.vlgmr.msra.gmra.mxu0 %v6114_v35  ;;  %2828 = vmatmul.mubr.bf16.vlgmr.msra.gmra.mxu1 %v6114_v35  ;;  %v4001_v35 = vld [vmem:[#allocation8 + $0xb0] ss:$8 sps:$4 sm:$0xff]  }
 0x8fa   :  { %3173 = vmatpush1.bf16.msra.mxu0 %v3965_v36  ;;  %3885 = vmatprep.mubr.msk.bf16.mxu0 %vm6188_vm15, %v3884_v41  ;;  %v4014_v36 = vld [vmem:[#allocation9 + $0x38] sm:$0xff]   ;;  %v4018_v41 = vld [vmem:[#allocation9 + $0x28] sm:$0xff]  }
 0x8fb   :  { %3174 = vmatprep.subr.bf16.mxu0 %v3970_v61  ;;  %v4015_v61 = vld [vmem:[#allocation9 + $0x70] sm:$0xff]   ;;  %3908 = vmatpush3.bf16.msra.mxu1 %v4014_v36 }
 0x8fc   :  { %3909 = vmatprep.subr.bf16.mxu1 %v4015_v61 }
 0x8fe   :  { %3175 = vmatpush1.bf16.msra.mxu0 %v3968_v26  ;;  %v4022_v26 = vld [vmem:[#allocation9 + $0x18] sm:$0xff]  }
 0x8ff   :  { %3176 = vmatprep.subr.bf16.mxu0 %v3973_v60  ;;  %3910 = vmatpush3.bf16.msra.mxu1 %v4016_v1 }
 0x900   :  { %3911 = vmatprep.subr.bf16.mxu1 %v4017_v7 }
 0x902   :  { %3177 = vmatpush1.bf16.msra.mxu0 %v3971_v42 }
 0x903   :  { %3178 = vmatprep.subr.bf16.mxu0 %v3976_v40  ;;  %3912 = vmatpush3.bf16.msra.mxu1 %v4018_v41  ;;  %v4023_v40 = vld [vmem:[#allocation9 + $0x50] sm:$0xff]  }
 0x904   :  { %3913 = vmatprep.subr.bf16.mxu1 %v4019_v16 }
 0x906   :  { %3179 = vmatpush1.bf16.msra.mxu0 %v3974_v14 }
 0x907   :  { %3180 = vmatprep.subr.bf16.mxu0 %v3979_v48  ;;  %3914 = vmatpush3.bf16.msra.mxu1 %v4020_v5 }
 0x908   :  { %3915 = vmatprep.subr.bf16.mxu1 %v4021_v59 }
 0x90a   :  { %3181 = vmatpush1.bf16.msra.mxu0 %v3977_v52  ;;  %v4024_v52 = vld [vmem:[#allocation9 + $0x10] sm:$0xff]  }
 0x90b   :  { %3182 = vmatprep.subr.bf16.mxu0 %v3982_v54  ;;  %3916 = vmatpush3.bf16.msra.mxu1 %v4022_v26 }
 0x90c   :  { %3917 = vmatprep.subr.bf16.mxu1 %v4023_v40 }
 0x90e   :  { %3183 = vmatpush1.bf16.msra.mxu0 %v3980_v0 }
 0x90f   :  { %3184 = vmatprep.subr.bf16.mxu0 %v3985_v63  ;;  %3918 = vmatpush3.bf16.msra.mxu1 %v4024_v52  ;;  %v4025_v63 = vld [vmem:[#allocation9 + $0x48] sm:$0xff]  }
 0x910   :  { %3919 = vmatprep.subr.bf16.mxu1 %v4025_v63 }
 0x912   :  { %3185 = vmatpush1.bf16.msra.mxu0 %v3983_v8 }
 0x913   :  { %3186 = vmatprep.subr.bf16.mxu0 %v3988_v57 }
 0x916   :  { %3187 = vmatpush1.bf16.msra.mxu0 %v3986_v32  ;;  %v4026_v32 = vld [vmem:[#allocation9 + $0x8] sm:$0xff]  }
 0x917   :  { %3188 = vmatprep.subr.bf16.mxu0 %v3991_v62  ;;  %3920 = vmatpush3.bf16.msra.mxu1 %v4026_v32  ;;  %v4027_v62 = vld [vmem:[#allocation9 + $0x40] sm:$0xff]  }
 0x918   :  { %3921 = vmatprep.subr.bf16.mxu1 %v4027_v62 }
 0x91a   :  { %3189 = vmatpush2.bf16.msra.mxu0 %v3989_v49  ;;  %v4028_v49 = vld [vmem:[#allocation9] sm:$0xff]  }
 0x91b   :  { %3190 = vmatprep.subr.bf16.mxu0 %v3994_v31  ;;  %3922 = vmatpush3.bf16.msra.mxu1 %v4028_v49  ;;  %v2662_v31 = vld [vmem:[#allocation3 + $0x1c0] sm:$0xff] }
 0x91e   :  { %3191 = vmatpush2.bf16.msra.mxu0 %v3992_v4  ;;  %v2664_v4 = vld [vmem:[#allocation3 + $0x1d0] sm:$0xff] }
 0x91f   :  { %3192 = vmatprep.subr.bf16.mxu0 %v3997_v13  ;;  %v2663_v13 = vld [vmem:[#allocation3 + $0x1c8] sm:$0xff] }
 0x922   :  { %3193 = vmatpush2.bf16.msra.mxu0 %v3995_v25 }
 0x923   :  { %3194 = vmatprep.subr.bf16.mxu0 %v4000_v6 }
 0x926   :  { %3195 = vmatpush2.bf16.msra.mxu0 %v3998_v3  ;;  %v2665_v3 = vld [vmem:[#allocation3 + $0x1d8] sm:$0xff] }
 0x927   :  { %3196 = vmatprep.subr.bf16.mxu0 %v4003_v39 }
 0x92a   :  { %3197 = vmatpush2.bf16.msra.mxu0 %v4001_v35 }
 0x92b   :  { %3198 = vmatprep.subr.bf16.mxu0 %v4006_v12 }
 0x92e   :  { %3199 = vmatpush2.bf16.msra.mxu0 %v4004_v11 }
 0x92f   :  { %3200 = vmatprep.subr.bf16.mxu0 %v4009_v17 }
 0x932   :  { %3201 = vmatpush2.bf16.msra.mxu0 %v4007_v22 }
 0x933   :  { %3202 = vmatprep.subr.bf16.mxu0 %v4012_v33 }
 0x936   :  { %3203 = vmatpush2.bf16.msra.mxu0 %v4010_v47 }
 0x939   :  { %3888 = vmatmul.mubr.msk.bf16.vlgmr.msra.gmra.mxu0 %vm6188_vm15, %v3887_v55 }
 0x93a   :  { %3891 = vmatprep.mubr.msk.bf16.mxu0 %vm3889_vm0, %v3890_v24  ;;  %v2666_v24 = vld [vmem:[#allocation3 + $0x1e0] sm:$0xff] }
 0x941   :  { %3894 = vmatmul.mubr.msk.bf16.gmra.mxu0 %vm3889_vm0, %v3893_v29  ;;  %v2667_v29 = vld [vmem:[#allocation3 + $0x1e8] sm:$0xff] }
 0x942   :  { %3897 = vmatprep.mubr.msk.bf16.mxu0 %vm3895_vm1, %v3896_v44 }
 0x949   :  { %3900 = vmatmul.mubr.msk.bf16.gmra.mxu0 %vm3895_vm1, %v3899_v37 }
 0x979   :  { %v2706_v60 = vpop.f32.mrf.mxu0  ;;  %v2747_v42 = vpop.f32.mrf.mxu1 }
 0x97a   :  { %v2836_v25 = vadd.f32 %v2706_v60, %v2662_v31  ;;  %v2838_v6 = vadd.f32 %v2747_v42, %v2664_v4  ;;  %v2896_v60 = vpop.permute.xlu1 %2895 }
 0x97b   :  { %v2708_v14 = vpop.f32.mrf.mxu0  ;;  %v2749_v48 = vpop.f32.mrf.mxu1  ;;  %vm2897_vm2 = vcmp.eq.s32.totalorder %v2896_v60, 1 }
 0x97c   :  { %v2837_v39 = vadd.f32 %v2708_v14, %v2663_v13  ;;  %v3803_v35 = vmul.f32 -1.442695, %v2836_v25  ;;  %v2839_v12 = vadd.f32 %v2749_v48, %v2665_v3  ;;  %v3805_v11 = vmul.f32 -1.442695, %v2838_v6  ;;  %vm3901_vm3 = vmpackc.low %vm2897_vm2, %vm2642_vm14 }
 0x97d   :  { %v2710_v54 = vpop.f32.mrf.mxu0  ;;  %v2751_v0 = vpop.f32.mrf.mxu1 }
 0x97e   :  { %v3804_v17 = vmul.f32 -1.442695, %v2837_v39  ;;  %4253 = vpow2.f32 %v3803_v35  ;;  %v3806_v22 = vmul.f32 -1.442695, %v2839_v12  ;;  %v2962_v12 = vlaneseq }
 0x97f   :  { %v2711_v8 = vpop.f32.mrf.mxu0  ;;  %v2752_v57 = vpop.f32.mrf.mxu1  ;;  %4255 = vpow2.f32 %v3805_v11 }
 0x980   :  { %4257 = vpow2.f32 %v3804_v17  ;;  %v2963_v11 = vshrl.u32 %v2962_v12, 7 }
 0x981   :  { %4259 = vpow2.f32 %v3806_v22 }
 0x982   :  { %v2968_v17 = vsub.s32 1, %v2963_v11  ;;  %v2964_v22 = vsub.s32 0, %v2963_v11  ;;  %v3850_v11 = vld [vmem:[%s6261_s6] ss:$0 sm:$0xff]  ;;  %s4501_s6 = smov [#allocation13]  }
 0x983   :  { %s3591_s14 = sshll.u32 %s4501_s6, 4  ;;  %s3592_s14 = int_to_ptr.vmem [resolvable:$true] %s3591_s14 }
 0x984   :  { %s4418_s15 = scalar_lea.vmem %s3592_s14, 256  ;;  %p4423_p12 = scmp.lt.s32.totalorder %s3592_s14, %s3592_s14 }
 0x985   :  { %p4419_p11 = scmp.ne.s32.totalorder %s3592_s14, %s4418_s15  ;;  %p4424_p13 = scmp.lt.s32.totalorder %s4418_s15, %s4418_s15 }
 0x987   :  { %p4425_p0 = por %p4424_p13, %p4423_p12 }
 0x989   :  { %p4426_p1 = pnand %p4425_p0, %p4419_p11 }
 0x98b   :  { %v4254_v33 = vpop.eup %4253 }
 0x98c   :  { %v4256_v47 = vpop.eup %4255  ;;  %v2850_v28 = vadd.f32 1.0, %v4254_v33 }
 0x98d   :  { %v4258_v50 = vpop.eup %4257  ;;  %v2862_v19 = vadd.f32 1.0, %v4256_v47 }
 0x98e   :  { %v4260_v55 = vpop.eup %4259  ;;  %v2851_v34 = vadd.f32 1.0, %v4258_v50  ;;  %4261 = vrcp.f32 %v2850_v28 }
 0x98f   :  { %v2863_v51 = vadd.f32 1.0, %v4260_v55  ;;  %4263 = vrcp.f32 %v2862_v19 }
 0x990   :  { %4265 = vrcp.f32 %v2851_v34 }
 0x99b   :  { %v4262_v41 = vpop.eup %4261 }
 0x99c   :  { %v4264_v16 = vpop.eup %4263 }
 0x99d   :  { %v4266_v5 = vpop.eup %4265  ;;  %v2882_v42 = vmul.f32 %v4264_v16, %v6087_v45 }
 0x9b9   :  { %v2788_v38 = vpop.f32.mrf.mxu0  ;;  %v2829_v43 = vpop.f32.mrf.mxu1 }
 0x9ba   :  { %v2840_v27 = vadd.f32 %v2788_v38, %v2666_v24  ;;  %v2842_v44 = vadd.f32 %v2829_v43, %v2668_v18 }
 0x9bb   :  { %v2790_v21 = vpop.f32.mrf.mxu0  ;;  %v2831_v46 = vpop.f32.mrf.mxu1 }
 0x9bc   :  { %4267 = vtanh.f32 %v2840_v27  ;;  %v3807_v53 = vmul.f32 -1.442695, %v2842_v44  ;;  %v2841_v23 = vadd.f32 %v2790_v21, %v2667_v29  ;;  %v2843_v37 = vadd.f32 %v2831_v46, %v2669_v30 }
 0x9bd   :  { %4269 = vrcp.f32 %v2863_v51  ;;  %v2792_v20 = vpop.f32.mrf.mxu0  ;;  %v2833_v36 = vpop.f32.mrf.mxu1 }
 0x9be   :  { %4271 = vpow2.f32 %v3807_v53  ;;  %v3808_v61 = vmul.f32 -1.442695, %v2843_v37 }
 0x9bf   :  { %4273 = vtanh.f32 %v2841_v23  ;;  %v2793_v1 = vpop.f32.mrf.mxu0  ;;  %v2834_v7 = vpop.f32.mrf.mxu1 }
 0x9c0   :  { %4275 = vpow2.f32 %v3808_v61 }
 0x9c9   :  { %v4268_v59 = vpop.eup %4267 }
 0x9ca   :  { %v4270_v26 = vpop.eup %4269  ;;  %v2884_v40 = vmul.f32 %v4268_v59, %v4262_v41 }
 0x9cb   :  { %v4272_v14 = vpop.eup %4271  ;;  %v2883_v63 = vmul.f32 %v4270_v26, %v6092_v15 }
 0x9cc   :  { %v4274_v48 = vpop.eup %4273  ;;  %v2886_v52 = vadd.f32 %v2884_v40, %v2882_v42  ;;  %v2876_v54 = vadd.f32 1.0, %v4272_v14 }
 0x9cd   :  { %v4276_v0 = vpop.eup %4275  ;;  %v2885_v8 = vmul.f32 %v4274_v48, %v4266_v5 }
 0x9ce   :  { %4277 = vtanh.f32 %v2886_v52  ;;  %v2877_v57 = vadd.f32 1.0, %v4276_v0  ;;  %v2900_v32 = vsel %vm2897_vm2, %v2886_v52, %v6087_v45 }
 0x9cf   :  { %4279 = vrcp.f32 %v2876_v54  ;;  %v2887_v62 = vadd.f32 %v2885_v8, %v2883_v63  ;;  %2918 = vst [vmem:[#allocation15] sm:$0xff] %v2900_v32 }
 0x9d0   :  { %4281 = vrcp.f32 %v2877_v57 }
 0x9d1   :  { %4283 = vtanh.f32 %v2887_v62  ;;  %v2901_v49 = vsel %vm2897_vm2, %v2887_v62, %v6092_v15 }
 0x9d2   :  { %2919 = vst [vmem:[#allocation15 + $0x8] sm:$0xff] %v2901_v49 }
 0x9db   :  { %v4278_v31 = vpop.eup %4277 }
 0x9dc   :  { %v4280_v4 = vpop.eup %4279 }
 0x9dd   :  { %v4282_v13 = vpop.eup %4281  ;;  %v2890_v25 = vmul.f32 %v4280_v4, %v4278_v31 }
 0x9de   :  { %v4284_v6 = vpop.eup %4283 }
 0x9df   :  { %v2891_v3 = vmul.f32 %v4284_v6, %v4282_v13  ;;  %v2898_v39 = vsel %vm2897_vm2, %v2890_v25, %v6102_v58  ;;  %v3905_v15 = vpack.c.bf16 %v2890_v25, %v6094_v9 }
 0x9e0   :  { %2916 = vst [vmem:[#allocation13] sm:$0xff] %v2898_v39 }
 0x9e1   :  { %v3902_v45 = vpack.c.bf16 %v2891_v3, %v6096_v10  ;;  %v2899_v35 = vsel %vm2897_vm2, %v2891_v3, %v6108_v2  ;;  %v2960_v10 = vld [vmem:[%s6259_s4] sm:$0x3] }
 0x9e2   :  { %2917 = vst [vmem:[#allocation13 + $0x8] sm:$0xff] %v2899_v35  ;;  %v2969_v33 = vrot.slane %v2960_v10, %v2968_v17  ;;  %v2965_v2 = vrot.slane %v2960_v10, %v2964_v22 }
 0x9e3   :  { %3903 = vmatprep.mubr.msk.bf16.mxu0 %vm3901_vm3, %v3902_v45 }
 0x9e4   :  { %3906 = vmatmul.mubr.msk.bf16.gmra.mxu0 %vm3901_vm3, %v3905_v15 }
 0x9f9   :  { %v3206_v58 = vpop.f32.mrf.mxu0 }
 0x9fa   :  { %v3207_v55 = vadd.f32 %v3206_v58, %v2965_v2 }
 0x9fb   :  { %v3208_v47 = vpop.f32.mrf.mxu0 }
 0x9fc   :  { %v3209_v50 = vadd.f32 %v3208_v47, %v2969_v33  ;;  %v3245_v38 = vmax.f32 %v3207_v55, 0.0 }
 0x9fd   :  { %v3210_v56 = vpop.f32.mrf.mxu0 }
 0x9fe   :  { %v3211_v28 = vadd.f32 %v3210_v56, %v2965_v2  ;;  %v3246_v18 = vmax.f32 %v3209_v50, 0.0 }
 0x9ff   :  { %v3212_v9 = vpop.f32.mrf.mxu0 }
 0xa00   :  { %v3213_v19 = vadd.f32 %v3212_v9, %v2969_v33  ;;  %v3247_v34 = vmax.f32 %v3211_v28, 0.0 }
 0xa01   :  { %v3216_v24 = vpop.f32.mrf.mxu0 }
 0xa02   :  { %v3248_v51 = vmax.f32 %v3213_v19, 0.0  ;;  %v3261_v30 = vpack.c.bf16 %v3247_v34, %v3245_v38  ;;  %v3217_v46 = vadd.f32 %v3216_v24, %v2965_v2 }
 0xa03   :  { %v3218_v43 = vpop.f32.mrf.mxu0 }
 0xa04   :  { %v3262_v29 = vpack.c.bf16 %v3248_v51, %v3246_v18  ;;  %v3219_v44 = vadd.f32 %v3218_v43, %v2969_v33  ;;  %v3249_v1 = vmax.f32 %v3217_v46, 0.0 }
 0xa05   :  { %v3220_v27 = vpop.f32.mrf.mxu0 }
 0xa06   :  { %v3221_v21 = vadd.f32 %v3220_v27, %v2965_v2  ;;  %3436 = vmatprep.mubr.bf16.mxu1 %v3262_v29  ;;  %v3250_v36 = vmax.f32 %v3219_v44, 0.0 }
 0xa07   :  { %v3222_v53 = vpop.f32.mrf.mxu0  ;;  %3437 = vmatmul.mubr.bf16.vlgmr.msra.gmra.mxu1 %v3261_v30 }
 0xa08   :  { %v3223_v23 = vadd.f32 %v3222_v53, %v2969_v33  ;;  %v3251_v37 = vmax.f32 %v3221_v21, 0.0 }
 0xa09   :  { %v3226_v20 = vpop.f32.mrf.mxu0 }
 0xa0a   :  { %v3252_v61 = vmax.f32 %v3223_v23, 0.0  ;;  %v3263_v16 = vpack.c.bf16 %v3251_v37, %v3249_v1  ;;  %v3227_v60 = vadd.f32 %v3226_v20, %v2965_v2 }
 0xa0b   :  { %v3228_v7 = vpop.f32.mrf.mxu0 }
 0xa0c   :  { %v3264_v41 = vpack.c.bf16 %v3252_v61, %v3250_v36  ;;  %v3229_v59 = vadd.f32 %v3228_v7, %v2969_v33  ;;  %v3253_v54 = vmax.f32 %v3227_v60, 0.0 }
 0xa0d   :  { %v3230_v5 = vpop.f32.mrf.mxu0 }
 0xa0e   :  { %v3231_v26 = vadd.f32 %v3230_v5, %v2965_v2  ;;  %3444 = vmatprep.mubr.bf16.mxu1 %v3264_v41  ;;  %v3254_v48 = vmax.f32 %v3229_v59, 0.0 }
 0xa0f   :  { %v3232_v42 = vpop.f32.mrf.mxu0  ;;  %3445 = vmatmul.mubr.bf16.gmra.mxu1 %v3263_v16 }
 0xa10   :  { %v3233_v40 = vadd.f32 %v3232_v42, %v2969_v33  ;;  %v3255_v14 = vmax.f32 %v3231_v26, 0.0 }
 0xa12   :  { %v3256_v52 = vmax.f32 %v3233_v40, 0.0  ;;  %v3265_v63 = vpack.c.bf16 %v3255_v14, %v3253_v54 }
 0xa14   :  { %v3266_v0 = vpack.c.bf16 %v3256_v52, %v3254_v48 }
 0xa16   :  { %3452 = vmatprep.mubr.bf16.mxu1 %v3266_v0 }
 0xa17   :  { %3453 = vmatmul.mubr.bf16.gmra.mxu1 %v3265_v63 }
 0xaa4   :  { %v3236_v8 = vpop.f32.mrf.mxu0 }
 0xaa5   :  { %v3237_v31 = vadd.f32 %v3236_v8, %v2965_v2 }
 0xaa6   :  { %v3238_v57 = vpop.f32.mrf.mxu0 }
 0xaa7   :  { %v3239_v62 = vadd.f32 %v3238_v57, %v2969_v33  ;;  %v3257_v39 = vmax.f32 %v3237_v31, 0.0 }
 0xaa8   :  { %v3240_v32 = vpop.f32.mrf.mxu0 }
 0xaa9   :  { %v3241_v49 = vadd.f32 %v3240_v32, %v2965_v2  ;;  %v3258_v6 = vmax.f32 %v3239_v62, 0.0 }
 0xaaa   :  { %v3242_v4 = vpop.f32.mrf.mxu0 }
 0xaab   :  { %v3243_v13 = vadd.f32 %v3242_v4, %v2969_v33  ;;  %v3259_v25 = vmax.f32 %v3241_v49, 0.0 }
 0xaad   :  { %v3260_v3 = vmax.f32 %v3243_v13, 0.0  ;;  %v3267_v35 = vpack.c.bf16 %v3259_v25, %v3257_v39 }
 0xaaf   :  { %v3268_v45 = vpack.c.bf16 %v3260_v3, %v3258_v6 }
 0xab1   :  { %3460 = vmatprep.mubr.bf16.mxu1 %v3268_v45 }
 0xab2   :  { %3461 = vmatmul.mubr.bf16.gmra.mxu1 %v3267_v35 }
 0xac7   :  { %v3923_v15 = vpop.f32.mrf.mxu1 }
 0xac9   :  { %v3924_v12 = vpop.f32.mrf.mxu1 }
 0xaca   :  { %v3925_v17 = vadd.f32 %v3924_v12, %v3923_v15 }
 0xacb   :  { %v3926_v22 = vpop.f32.mrf.mxu1 }
 0xacc   :  { %v3439_v10 = vadd.f32 %v3925_v17, %v3850_v11 }
 0xacd   :  { %v3927_v58 = vpop.f32.mrf.mxu1 }
 0xace   :  { %v3928_v2 = vadd.f32 %v3927_v58, %v3926_v22  ;;  %3469 = vmax.xlane.f32.xlu0 %v3439_v10 }
 0xacf   :  { %v3929_v33 = vpop.f32.mrf.mxu1 }
 0xad0   :  { %v3442_v47 = vadd.f32 %v3928_v2, %v3850_v11 }
 0xad1   :  { %v3930_v56 = vpop.f32.mrf.mxu1 }
 0xad2   :  { %v3931_v50 = vadd.f32 %v3930_v56, %v3929_v33  ;;  %3471 = vmax.xlane.f32.xlu1 %v3442_v47 }
 0xad3   :  { %v3932_v28 = vpop.f32.mrf.mxu1 }
 0xad4   :  { %v3447_v55 = vadd.f32 %v3931_v50, %v3850_v11 }
 0xad5   :  { %v3933_v9 = vpop.f32.mrf.mxu1 }
 0xad6   :  { %v3934_v19 = vadd.f32 %v3933_v9, %v3932_v28  ;;  %3473 = vmax.xlane.f32.xlu0 %v3447_v55 }
 0xad7   :  { %v3935_v34 = vpop.f32.mrf.mxu1 }
 0xad8   :  { %v3450_v24 = vadd.f32 %v3934_v19, %v3850_v11 }
 0xad9   :  { %v3936_v18 = vpop.f32.mrf.mxu1 }
 0xada   :  { %v3937_v51 = vadd.f32 %v3936_v18, %v3935_v34  ;;  %3475 = vmax.xlane.f32.xlu0 %v3450_v24 }
 0xadb   :  { %v3938_v38 = vpop.f32.mrf.mxu1 }
 0xadc   :  { %v3455_v43 = vadd.f32 %v3937_v51, %v3850_v11 }
 0xadd   :  { %v3939_v29 = vpop.f32.mrf.mxu1 }
 0xade   :  { %v3940_v30 = vadd.f32 %v3939_v29, %v3938_v38  ;;  %3477 = vmax.xlane.f32.xlu1 %v3455_v43 }
 0xae0   :  { %v3458_v27 = vadd.f32 %v3940_v30, %v3850_v11 }
 0xae2   :  { %3479 = vmax.xlane.f32.xlu0 %v3458_v27 }
 0xb57   :  { %v3470_v44 = vpop.xlane.xlu0 %3469 }
 0xb58   :  { %v3485_v46 = vsub.f32 %v3439_v10, %v3470_v44 }
 0xb5a   :  { %v3493_v37 = vmul.f32 1.442695, %v3485_v46 }
 0xb5b   :  { %v3472_v53 = vpop.xlane.xlu1 %3471 }
 0xb5c   :  { %v3486_v23 = vsub.f32 %v3442_v47, %v3472_v53  ;;  %4285 = vpow2.f32 %v3493_v37 }
 0xb5e   :  { %v3495_v1 = vmul.f32 1.442695, %v3486_v23 }
 0xb5f   :  { %v3474_v21 = vpop.xlane.xlu0 %3473 }
 0xb60   :  { %v3487_v20 = vsub.f32 %v3447_v55, %v3474_v21  ;;  %4287 = vpow2.f32 %v3495_v1 }
 0xb62   :  { %v3497_v41 = vmul.f32 1.442695, %v3487_v20 }
 0xb63   :  { %v3476_v36 = vpop.xlane.xlu0 %3475 }
 0xb64   :  { %v3488_v7 = vsub.f32 %v3450_v24, %v3476_v36  ;;  %4289 = vpow2.f32 %v3497_v41 }
 0xb66   :  { %v3499_v59 = vmul.f32 1.442695, %v3488_v7 }
 0xb67   :  { %v3478_v61 = vpop.xlane.xlu1 %3477 }
 0xb68   :  { %v3489_v16 = vsub.f32 %v3455_v43, %v3478_v61  ;;  %4291 = vpow2.f32 %v3499_v59 }
 0xb69   :  { %v4286_v57 = vpop.eup %4285 }
 0xb6a   :  { %v3501_v60 = vmul.f32 1.442695, %v3489_v16 }
 0xb6b   :  { %v3480_v5 = vpop.xlane.xlu0 %3479 }
 0xb6c   :  { %v3490_v42 = vsub.f32 %v3458_v27, %v3480_v5  ;;  %4293 = vpow2.f32 %v3501_v60 }
 0xb6d   :  { %v4288_v32 = vpop.eup %4287 }
 0xb6e   :  { %v3503_v52 = vmul.f32 1.442695, %v3490_v42 }
 0xb70   :  { %4295 = vpow2.f32 %v3503_v52 }
 0xb71   :  { %v4290_v62 = vpop.eup %4289 }
 0xb72   :  { %v3941_v26 = vpop.f32.mrf.mxu1 }
 0xb74   :  { %v3942_v40 = vpop.f32.mrf.mxu1 }
 0xb75   :  { %v3943_v14 = vadd.f32 %v3942_v40, %v3941_v26  ;;  %v4292_v49 = vpop.eup %4291 }
 0xb76   :  { %v3944_v48 = vpop.f32.mrf.mxu1 }
 0xb77   :  { %v3463_v54 = vadd.f32 %v3943_v14, %v3850_v11 }
 0xb78   :  { %v3945_v0 = vpop.f32.mrf.mxu1 }
 0xb79   :  { %v3946_v63 = vadd.f32 %v3945_v0, %v3944_v48  ;;  %3481 = vmax.xlane.f32.xlu1 %v3463_v54  ;;  %v4294_v31 = vpop.eup %4293 }
 0xb7b   :  { %v3466_v8 = vadd.f32 %v3946_v63, %v3850_v11 }
 0xb7d   :  { %3483 = vmax.xlane.f32.xlu0 %v3466_v8  ;;  %3509 = vadd.xlane.f32.xlu1 %v4286_v57  ;;  %v4296_v4 = vpop.eup %4295 }
 0xb81   :  { %3511 = vadd.xlane.f32.xlu0 %v4288_v32  ;;  %3513 = vadd.xlane.f32.xlu1 %v4290_v62 }
 0xb85   :  { %3517 = vadd.xlane.f32.xlu1 %v4294_v31  ;;  %3515 = vadd.xlane.f32.xlu0 %v4292_v49 }
 0xb89   :  { %3519 = vadd.xlane.f32.xlu0 %v4296_v4 }
 0xc02   :  { %v3482_v13 = vpop.xlane.xlu1 %3481 }
 0xc03   :  { %v3491_v25 = vsub.f32 %v3463_v54, %v3482_v13 }
 0xc05   :  { %v3505_v6 = vmul.f32 1.442695, %v3491_v25 }
 0xc06   :  { %v3510_v3 = vpop.xlane.xlu1 %3509  ;;  %v3484_v39 = vpop.xlane.xlu0 %3483 }
 0xc07   :  { %4297 = vpow2.f32 %v3505_v6  ;;  %v3492_v45 = vsub.f32 %v3466_v8, %v3484_v39 }
 0xc08   :  { %4299 = vrcp.f32 %v3510_v3 }
 0xc09   :  { %v3507_v35 = vmul.f32 1.442695, %v3492_v45 }
 0xc0a   :  { %v3514_v15 = vpop.xlane.xlu1 %3513  ;;  %v3512_v12 = vpop.xlane.xlu0 %3511 }
 0xc0b   :  { %4301 = vpow2.f32 %v3507_v35 }
 0xc0c   :  { %4303 = vrcp.f32 %v3514_v15 }
 0xc0d   :  { %4305 = vrcp.f32 %v3512_v12 }
 0xc0e   :  { %v3518_v11 = vpop.xlane.xlu1 %3517  ;;  %v3516_v17 = vpop.xlane.xlu0 %3515 }
 0xc0f   :  { %4307 = vrcp.f32 %v3518_v11 }
 0xc10   :  { %4309 = vrcp.f32 %v3516_v17 }
 0xc12   :  { %v3520_v22 = vpop.xlane.xlu0 %3519 }
 0xc13   :  { %4311 = vrcp.f32 %v3520_v22 }
 0xc14   :  { %v6235_v10 = vpop.eup %4297 }
 0xc15   :  { %v4300_v58 = vpop.eup %4299  ;;  %3521 = vadd.xlane.f32.xlu1 %v6235_v10 }
 0xc16   :  { %v3533_v2 = vmul.f32 %v4300_v58, %v3510_v3 }
 0xc18   :  { %v6238_v33 = vpop.eup %4301  ;;  %v3541_v47 = vsub.f32 2.0, %v3533_v2 }
 0xc19   :  { %v4304_v56 = vpop.eup %4303  ;;  %3523 = vadd.xlane.f32.xlu0 %v6238_v33 }
 0xc1a   :  { %v4306_v50 = vpop.eup %4305  ;;  %v3549_v28 = vmul.f32 %v4300_v58, %v3541_v47  ;;  %v3535_v55 = vmul.f32 %v4304_v56, %v3514_v15 }
 0xc1b   :  { %v3534_v9 = vmul.f32 %v4306_v50, %v3512_v12 }
 0xc1c   :  { %v4308_v19 = vpop.eup %4307  ;;  %v3557_v34 = vmul.f32 %v4286_v57, %v3549_v28  ;;  %v3543_v24 = vsub.f32 2.0, %v3535_v55 }
 0xc1d   :  { %v4310_v18 = vpop.eup %4309  ;;  %v3542_v51 = vsub.f32 2.0, %v3534_v9  ;;  %v3537_v38 = vmul.f32 %v4308_v19, %v3518_v11 }
 0xc1e   :  { %3565 = vst [vmem:[#allocation12] sm:$0xff] %v3557_v34  ;;  %v3551_v43 = vmul.f32 %v4304_v56, %v3543_v24  ;;  %v3536_v29 = vmul.f32 %v4310_v18, %v3516_v17 }
 0xc1f   :  { %v3550_v30 = vmul.f32 %v4306_v50, %v3542_v51  ;;  %v3545_v27 = vsub.f32 2.0, %v3537_v38 }
 0xc20   :  { %v4312_v44 = vpop.eup %4311  ;;  %v3559_v21 = vmul.f32 %v4290_v62, %v3551_v43  ;;  %v3544_v46 = vsub.f32 2.0, %v3536_v29 }
 0xc21   :  { %v3558_v53 = vmul.f32 %v4288_v32, %v3550_v30  ;;  %v3553_v23 = vmul.f32 %v4308_v19, %v3545_v27  ;;  %v3538_v37 = vmul.f32 %v4312_v44, %v3520_v22 }
 0xc22   :  { %3567 = vst [vmem:[#allocation12 + $0x10] sm:$0xff] %v3559_v21  ;;  %v3552_v20 = vmul.f32 %v4310_v18, %v3544_v46 }
 0xc23   :  { %3566 = vst [vmem:[#allocation12 + $0x8] sm:$0xff] %v3558_v53  ;;  %v3561_v36 = vmul.f32 %v4294_v31, %v3553_v23  ;;  %v3546_v61 = vsub.f32 2.0, %v3538_v37 }
 0xc24   :  { %v3560_v1 = vmul.f32 %v4292_v49, %v3552_v20 }
 0xc25   :  { %3569 = vst [vmem:[#allocation12 + $0x20] sm:$0xff] %v3561_v36  ;;  %v3554_v7 = vmul.f32 %v4312_v44, %v3546_v61 }
 0xc26   :  { %3568 = vst [vmem:[#allocation12 + $0x18] sm:$0xff] %v3560_v1 }
 0xc27   :  { %v3562_v41 = vmul.f32 %v4296_v4, %v3554_v7 }
 0xc29   :  { %3570 = vst [vmem:[#allocation12 + $0x28] sm:$0xff] %v3562_v41 }
 0xc2a   :  { %4429 = shalt.err (!%p4426_p1)
}
 0xc2b   :  { %3594 = dma.vmem_to_hbm [thread:$0]  %s3592_s14, 256, %s6265_s10, [#allocation14]  }
 0xc2c   :  { %s4502_s18 = smov [#allocation15]  }
 0xc2d   :  { %s3601_s19 = sshll.u32 %s4502_s18, 4  ;;  %s3602_s19 = int_to_ptr.vmem [resolvable:$true] %s3601_s19 }
 0xc2e   :  { %s4438_s21 = scalar_lea.vmem %s3602_s19, 256  ;;  %p4443_p3 = scmp.lt.s32.totalorder %s3602_s19, %s3602_s19 }
 0xc2f   :  { %p4439_p2 = scmp.ne.s32.totalorder %s3602_s19, %s4438_s21  ;;  %p4444_p4 = scmp.lt.s32.totalorder %s4438_s21, %s4438_s21 }
 0xc31   :  { %p4445_p5 = por %p4444_p4, %p4443_p3 }
 0xc33   :  { %p4446_p6 = pnand %p4445_p5, %p4439_p2 }
 0xc35   :  { %4449 = shalt.err (!%p4446_p6)
}
 0xc36   :  { %3604 = dma.vmem_to_hbm [thread:$0]  %s3602_s19, 256, %s6266_s11, [#allocation14]  }
 0xc37   :  { %s4503_s10 = smov [#allocation12]  }
 0xc38   :  { %s3578_s23 = sshll.u32 %s4503_s10, 4  ;;  %s3579_s23 = int_to_ptr.vmem [resolvable:$true] %s3578_s23 }
 0xc39   :  { %s4458_s11 = scalar_lea.vmem %s3579_s23, 1024  ;;  %p4463_p8 = scmp.lt.s32.totalorder %s3579_s23, %s3579_s23 }
 0xc3a   :  { %p4459_p7 = scmp.ne.s32.totalorder %s3579_s23, %s4458_s11  ;;  %p4464_p9 = scmp.lt.s32.totalorder %s4458_s11, %s4458_s11 }
 0xc3c   :  { %p4465_p10 = por %p4464_p9, %p4463_p8 }
 0xc3e   :  { %p4466_p11 = pnand %p4465_p10, %p4459_p7 }
 0xc9e   :  { %v3522_v16 = vpop.xlane.xlu1 %3521 }
 0xc9f   :  { %4313 = vrcp.f32 %v3522_v16 }
 0xca2   :  { %v3524_v5 = vpop.xlane.xlu0 %3523 }
 0xca3   :  { %4315 = vrcp.f32 %v3524_v5 }
 0xcac   :  { %v4314_v59 = vpop.eup %4313 }
 0xcad   :  { %v3539_v26 = vmul.f32 %v4314_v59, %v3522_v16 }
 0xcaf   :  { %v3547_v60 = vsub.f32 2.0, %v3539_v26 }
 0xcb0   :  { %v4316_v42 = vpop.eup %4315 }
 0xcb1   :  { %v3555_v40 = vmul.f32 %v4314_v59, %v3547_v60  ;;  %v3540_v14 = vmul.f32 %v4316_v42, %v3524_v5 }
 0xcb3   :  { %v3563_v48 = vmul.f32 %v6235_v10, %v3555_v40  ;;  %v3548_v52 = vsub.f32 2.0, %v3540_v14 }
 0xcb5   :  { %3571 = vst [vmem:[#allocation12 + $0x30] sm:$0xff] %v3563_v48  ;;  %v3556_v54 = vmul.f32 %v4316_v42, %v3548_v52 }
 0xcb7   :  { %v3564_v0 = vmul.f32 %v6238_v33, %v3556_v54 }
 0xcb9   :  { %3572 = vst [vmem:[#allocation12 + $0x38] sm:$0xff] %v3564_v0 }
 0xcba   :  { %4469 = shalt.err (!%p4466_p11)
}
 0xcbb   :  { %3584 = dma.vmem_to_hbm [thread:$0]  %s3579_s23, 1024, %s6264_s9, [#allocation5], %s4497_s5, %s4497_s5, %s4498_s20  }
 0xcbc   :  { %4484 = dma.done.wait [#allocation5], 1024  }
 0xcbd   :  { %4485 = vsyncadd [#allocation5], 4294966272 }
 0xcbe   :  { %4486 = dma.done.wait [#allocation14], 512  }
 0xcbf   :  { %4487 = vsyncadd [#allocation14], 4294966784 }
 0xcc0   :  { %3614 = vsyncpa [#allocation4], 1 }
 0xcc1   :  { %3615 = vsyncpa [#allocation7], 1 }
 0xcc2   :  { %3616 = vsyncpa [#allocation10], 1 }
 0xcc3   :  { %3617 = vsyncpa [#allocation5], 1 }
 0xcc4   :  { %3618 = vsyncpa [#allocation14], 1 }

</bundles_post_ra>
